<compile_context>
chip_gen: v7x
topology: tpu7x:2x2x1
jax: 0.10.0
libtpu: 0.0.40
codegen_flags: <defaults>
</compile_context>

<pallas_src>
import functools

import numpy as np

import jax
import jax.numpy as jnp
from jax.experimental import pallas as pl
from jax.experimental.pallas import tpu as pltpu


CFG = dict(
    dim_in_node=8, dim_in_u=4, hidden_dim=32, dim_lstm_out=16, dim_mid=16,
    dim_out=8, act_dims=8, dim_last=16, f_rfm_hidden_dim=32, f_last_hidden=32,
    mid_pair=16, mid_nodes=16,
)


# ----------------------------------------------------------------------------
# The single fused forward kernel
# ----------------------------------------------------------------------------
def _fused_forward_kernel(*refs, EP, H):
    """Whole LSTMMRF inference forward; everything VMEM-resident.

    refs layout:  [0:20]   data + static graph-structure matrices
                  [20:-6]  49 weight arrays (pre-split, biases as [1, d])
                  [-6:]    outputs (ret, logits, h1u, c1u, h1m, c1m)
    """
    (node_feat_ref, g_repr_ref, h0u_ref, c0u_ref, h0m_ref, c0m_ref,
     n2g_rep_ref, first_n_ref, gsrc2_ref, gdst2_ref, gfirst2_ref,
     scat_dst_ref, n2g_scat_ref, e2g_scat_ref, w_first_ref, nc_w_ref,
     rep_mat_ref, tile_mat_ref, sel_mod_ref, sel_div_ref) = refs[:20]
    (ret_ref, logits_ref, h1u_ref, c1u_ref, h1m_ref, c1m_ref) = refs[-6:]
    (u1a_wn, u1a_wg, u1a_b, u1b_w, u1b_b,
     ulstm_wih, ulstm_whh, ulstm_b, u2_w, u2_b,
     ju1_ws, ju1_wd, ju1_wf, ju1_b, ju3_w, ju3_b, ju2_w, ju2_b,
     iu1_wh, iu1_wf, iu1_b, iu3_w, iu3_b, iu2_w, iu2_b,
     o1_w, o1_b, o1a_wn, o1a_wg, o1a_b, o1b_w, o1b_b,
     olstm_wih, olstm_whh, olstm_b,
     ord1_w, ord1_b, ord2_w, ord2_b,
     fce_ws, fce_wd, fce_b, fce2_w, fce2_b,
     fcn_wn, fcn_wh, fcn_b, fcn2_w, fcn2_b) = [r[...] for r in refs[20:-6]]

    mm = lambda a, b: jnp.dot(a, b, preferred_element_type=jnp.float32)
    relu = lambda x: jnp.maximum(x, 0.0)

    node_feat = node_feat_ref[...]
    gsrc2 = gsrc2_ref[...]
    scat_dst = scat_dst_ref[...]
    n2g_scat = n2g_scat_ref[...]

    # observation = [node_feat, g_repr-per-node]; concat avoided via split weights.
    add_obs = mm(n2g_rep_ref[...], g_repr_ref[...])                  # [N, dim_in_u]

    # -- shared obs -> the two MLP heads (main u_ branch and opponent model) --
    x_u = mm(relu(mm(node_feat, u1a_wn) + mm(add_obs, u1a_wg) + u1a_b), u1b_w) + u1b_b
    x_m = mm(relu(mm(node_feat, o1a_wn) + mm(add_obs, o1a_wg) + o1a_b), o1b_w) + o1b_b

    # -- both single-step LSTM cells (PyTorch gate order i, f, g, o) ----------
    def lstm_cell(x, h0, c0, wih, whh, b):
        gates = mm(x, wih) + mm(h0, whh) + b                         # [N, 4H]
        sg = jax.nn.sigmoid(gates)                                   # whole-vreg EUP
        th = jnp.tanh(gates)
        i = sg[:, 0:H]
        f = sg[:, H:2 * H]
        g = th[:, 2 * H:3 * H]
        o = sg[:, 3 * H:4 * H]
        c1 = f * c0 + i * g
        return o * jnp.tanh(c1), c1

    h1u, c1u = lstm_cell(x_u, h0u_ref[...], c0u_ref[...], ulstm_wih, ulstm_whh, ulstm_b)
    h1m, c1m = lstm_cell(x_m, h0m_ref[...], c0m_ref[...], olstm_wih, olstm_whh, olstm_b)
    h1u_ref[...] = h1u
    c1u_ref[...] = c1u
    h1m_ref[...] = h1m
    c1m_ref[...] = c1m

    half = mm(relu(h1u), u2_w) + u2_b                                # [N, dim_out]
    un = mm(relu(h1m), o1_w) + o1_b                                  # [N, dim_out]

    # -- OppoModelNet: RFM block + readout -> action probabilities ------------
    un_pair = mm(gsrc2, un)                            # [2EP, d]; [:EP]=un[src], [EP:]=un[dst]
    e_new = mm(relu(mm(un_pair[:EP], fce_ws) + mm(un_pair[EP:], fce_wd) + fce_b),
               fce2_w) + fce2_b                                      # [EP, dim_last]
    h_agg = mm(scat_dst, e_new)                                      # in-edge sum  [N, dim_last]
    n_new = mm(relu(mm(un, fcn_wn) + mm(h_agg, fcn_wh) + fcn_b), fcn2_w) + fcn2_b
    # TODO(synk): RFMBlock's fc_u/fc_u2 global update is discarded by
    # OppoModelNet.forward, so it is intentionally not computed here.
    logits = mm(relu(mm(n_new, ord1_w) + ord1_b), ord2_w) + ord2_b   # [N, A]
    logits_ref[...] = logits
    z = jnp.exp(logits - jnp.max(logits, axis=-1, keepdims=True))
    probs = z / jnp.sum(z, axis=-1, keepdims=True)                   # Categorical.probs

    # -- UtilLayer: individual utilities (indiv_range='free') -----------------
    first_pn = mm(first_n_ref[...], half)              # half[first node of own graph]
    t = relu(mm(half, iu1_wh) + mm(first_pn, iu1_wf) + iu1_b)
    indiv_util = mm(relu(mm(t, iu3_w) + iu3_b), iu2_w) + iu2_b       # [N, A]

    # -- UtilLayer: pairwise utilities; fwd + reversed edges batched [2EP] ----
    half_a = mm(gsrc2, half)            # slot-1: half[src] (fwd rows) / half[dst] (rev rows)
    half_b = mm(gdst2_ref[...], half)   # slot-2: half[dst] (fwd rows) / half[src] (rev rows)
    half_f = mm(gfirst2_ref[...], half)  # slot-3: half[first node of the edge's graph]
    p = relu(mm(half_a, ju1_ws) + mm(half_b, ju1_wd) + mm(half_f, ju1_wf) + ju1_b)
    util_flat = mm(relu(mm(p, ju3_w) + ju3_b), ju2_w) + ju2_b        # [2EP, A*A]
    c_flat = util_flat[:EP]             # C[e, a, b] at lane a*A + b
    r_flat = util_flat[EP:]             # reflected R[e, a, b] at lane a*A + b

    # pair_comp='avg', pair_range='free':
    #   util_vals[e,a,b] = 0.5 * (C[e,b,a] + R[e,a,b])
    #   u_msg[e,a]       = sum_b util_vals[e,a,b] * src_prob[e,b]
    # computed transpose-free with constant 0/1 replication/selection matmuls.
    prob_pair = mm(gsrc2, probs)                       # [2EP, A]
    src_p = prob_pair[:EP]
    dst_p = prob_pair[EP:]
    u_msg = 0.5 * (mm(c_flat * mm(src_p, rep_mat_ref[...]), sel_mod_ref[...])
                   + mm(r_flat * mm(src_p, tile_mat_ref[...]), sel_div_ref[...]))  # [EP, A]

    # -- graph-level reductions as dense incidence matmuls --------------------
    util_dst = mm(scat_dst, u_msg)                                   # [N, A]
    w_first = w_first_ref[...]                                       # 1 at first node per graph
    total_connected = mm(n2g_scat, w_first * util_dst)               # [G, A]
    total_indiv_zero = mm(n2g_scat, w_first * indiv_util)            # [G, A]
    total_expected_oth = jnp.sum(
        mm(n2g_scat, (1.0 - w_first) * (indiv_util * probs)), axis=-1, keepdims=True)  # [G, 1]
    total_nc = jnp.sum(
        mm(e2g_scat_ref[...], nc_w_ref[...] * (u_msg * dst_p)), axis=-1, keepdims=True)  # [G, 1]
    ret_ref[...] = total_connected + total_nc + (total_expected_oth + total_indiv_zero)


# ----------------------------------------------------------------------------
# Parameter initialization (deterministic, PyTorch-style uniform fan-in)
# ----------------------------------------------------------------------------
def _init_linear(key, din, dout):
    kw, kb = jax.random.split(key)
    bound = 1.0 / (din ** 0.5)
    w = jax.random.uniform(kw, (din, dout), jnp.float32, -bound, bound)
    b = jax.random.uniform(kb, (dout,), jnp.float32, -bound, bound)
    return (w, b)


def _init_lstm(key, din, hidden):
    k1, k2, k3, k4 = jax.random.split(key, 4)
    bound = 1.0 / (hidden ** 0.5)
    wih = jax.random.uniform(k1, (din, 4 * hidden), jnp.float32, -bound, bound)
    whh = jax.random.uniform(k2, (hidden, 4 * hidden), jnp.float32, -bound, bound)
    b = (jax.random.uniform(k3, (4 * hidden,), jnp.float32, -bound, bound)
         + jax.random.uniform(k4, (4 * hidden,), jnp.float32, -bound, bound))
    return (wih, whh, b)


def init_params(key, c=CFG):
    keys = iter(jax.random.split(key, 20))
    p = {}
    # LSTMMRF main branch
    p['u_mlp1a'] = _init_linear(next(keys), c['dim_in_node'] + c['dim_in_u'], c['hidden_dim'])
    p['u_mlp1b'] = _init_linear(next(keys), c['hidden_dim'], c['dim_mid'])
    p['u_lstm2'] = _init_lstm(next(keys), c['dim_mid'], c['dim_lstm_out'])
    p['u_mlp2'] = _init_linear(next(keys), c['dim_lstm_out'], c['dim_out'])
    # q_net = UtilLayer(dim_out, mid_pair, mid_nodes, act_dims, pair_comp='avg')
    p['ju1'] = _init_linear(next(keys), 3 * c['dim_out'], c['mid_pair'])
    p['ju3'] = _init_linear(next(keys), c['mid_pair'], c['mid_pair'])
    p['ju2'] = _init_linear(next(keys), c['mid_pair'], c['act_dims'] * c['act_dims'])
    p['iu1'] = _init_linear(next(keys), 2 * c['dim_out'], c['mid_nodes'])
    p['iu3'] = _init_linear(next(keys), c['mid_nodes'], c['mid_nodes'])
    p['iu2'] = _init_linear(next(keys), c['mid_nodes'], c['act_dims'])
    # oppo_model_net
    p['o_mlp1'] = _init_linear(next(keys), c['dim_lstm_out'], c['dim_out'])
    p['o_mlp1a'] = _init_linear(next(keys), c['dim_in_node'] + c['dim_in_u'], c['hidden_dim'])
    p['o_mlp1b'] = _init_linear(next(keys), c['hidden_dim'], c['dim_mid'])
    p['o_lstm1'] = _init_lstm(next(keys), c['dim_mid'], c['dim_lstm_out'])
    p['o_readout'] = _init_linear(next(keys), c['dim_last'], c['f_last_hidden'])
    p['o_readout2'] = _init_linear(next(keys), c['f_last_hidden'], c['act_dims'])
    # RFMBlock (the fc_u / fc_u2 global update is discarded by OppoModelNet)
    p['fc_edge'] = _init_linear(next(keys), 2 * c['dim_out'], c['f_rfm_hidden_dim'])
    p['fc_edge2'] = _init_linear(next(keys), c['f_rfm_hidden_dim'], c['dim_last'])
    p['fc_node'] = _init_linear(next(keys), c['dim_last'] + c['dim_out'], c['f_rfm_hidden_dim'])
    p['fc_node2'] = _init_linear(next(keys), c['f_rfm_hidden_dim'], c['dim_last'])
    return p


def flatten_params_for_kernel(p, c=CFG):
    """Pre-split concat-style weights and reshape biases to [1, d] ONCE."""
    d_in = c['dim_in_node']
    d_out = c['dim_out']
    b2d = lambda b: b.reshape(1, -1)
    u1a_w, u1a_b = p['u_mlp1a']
    o1a_w, o1a_b = p['o_mlp1a']
    ju1_w, ju1_b = p['ju1']
    iu1_w, iu1_b = p['iu1']
    fce_w, fce_b = p['fc_edge']
    fcn_w, fcn_b = p['fc_node']
    flat = [
        # main (u_) branch
        u1a_w[:d_in], u1a_w[d_in:], b2d(u1a_b),
        p['u_mlp1b'][0], b2d(p['u_mlp1b'][1]),
        p['u_lstm2'][0], p['u_lstm2'][1], b2d(p['u_lstm2'][2]),
        p['u_mlp2'][0], b2d(p['u_mlp2'][1]),
        # pairwise (ju) chain: slot-1 / slot-2 / first-node weight splits
        ju1_w[:d_out], ju1_w[d_out:2 * d_out], ju1_w[2 * d_out:], b2d(ju1_b),
        p['ju3'][0], b2d(p['ju3'][1]),
        p['ju2'][0], b2d(p['ju2'][1]),
        # individual (iu) chain: half / first-node weight splits
        iu1_w[:d_out], iu1_w[d_out:], b2d(iu1_b),
        p['iu3'][0], b2d(p['iu3'][1]),
        p['iu2'][0], b2d(p['iu2'][1]),
        # OppoModelNet
        p['o_mlp1'][0], b2d(p['o_mlp1'][1]),
        o1a_w[:d_in], o1a_w[d_in:], b2d(o1a_b),
        p['o_mlp1b'][0], b2d(p['o_mlp1b'][1]),
        p['o_lstm1'][0], p['o_lstm1'][1], b2d(p['o_lstm1'][2]),
        p['o_readout'][0], b2d(p['o_readout'][1]),
        p['o_readout2'][0], b2d(p['o_readout2'][1]),
        # RFM block
        fce_w[:d_out], fce_w[d_out:], b2d(fce_b),
        p['fc_edge2'][0], b2d(p['fc_edge2'][1]),
        fcn_w[:d_out], fcn_w[d_out:], b2d(fcn_b),
        p['fc_node2'][0], b2d(p['fc_node2'][1]),
    ]
    return [jnp.asarray(x, jnp.float32) for x in flat]


# ----------------------------------------------------------------------------
# Graph construction (replaces the batched DGL graph): complete digraphs.
# Dense gather / scatter / incidence matrices are built once, host-side.
# ----------------------------------------------------------------------------
def build_batched_complete_graph(num_graphs, nodes_per_graph, act_dims=CFG['act_dims']):
    src, dst, e2g, n2g, first = [], [], [], [], []
    for g in range(num_graphs):
        base = g * nodes_per_graph
        first.append(base)
        n2g.extend([g] * nodes_per_graph)
        for i in range(nodes_per_graph):
            for j in range(nodes_per_graph):
                if i != j:
                    src.append(base + i)
                    dst.append(base + j)
                    e2g.append(g)
    N = num_graphs * nodes_per_graph
    E = len(src)
    EP = ((E + 7) // 8) * 8                 # pad the edge axis to a sublane multiple
    A = act_dims
    AA = A * A
    src_np, dst_np = np.asarray(src), np.asarray(dst)
    n2g_np, e2g_np = np.asarray(n2g), np.asarray(e2g)
    first_np = np.asarray(first)

    def onehot(idx, depth):
        m = np.zeros((len(idx), depth), np.float32)
        m[np.arange(len(idx)), idx] = 1.0
        return m

    def pad_rows(m):
        out = np.zeros((EP, m.shape[1]), np.float32)
        out[:m.shape[0]] = m
        return out

    gsrc, gdst = onehot(src_np, N), onehot(dst_np, N)
    gfirst_e = onehot(first_np[e2g_np], N)
    n2g_oh = onehot(n2g_np, num_graphs)
    e2g_oh = onehot(e2g_np, num_graphs)

    w_first = np.zeros((N, 1), np.float32)
    w_first[first_np] = 1.0
    is_zero = np.zeros((N,), bool)
    is_zero[first_np] = True
    nc_w = np.zeros((EP, 1), np.float32)
    nc_w[:E, 0] = np.where(~is_zero[src_np] & ~is_zero[dst_np], 0.5, 0.0)

    k = np.arange(AA)
    rep_mat = (k[None, :] // A == np.arange(A)[:, None]).astype(np.float32)   # [A, A*A]
    tile_mat = (k[None, :] % A == np.arange(A)[:, None]).astype(np.float32)   # [A, A*A]

    j = jnp.asarray
    return dict(
        # index form (used only by the plain-JAX reference check)
        src=j(src_np, jnp.int32), dst=j(dst_np, jnp.int32),
        node2graph=j(n2g_np, jnp.int32), edge2graph=j(e2g_np, jnp.int32),
        first_node_idx=j(first_np, jnp.int32),
        num_graphs=num_graphs, num_nodes=N, num_edges=E, num_edges_padded=EP,
        # dense static structure (consumed by the fused Pallas kernel)
        n2g_rep=j(n2g_oh),                                    # [N, G]
        first_n=j(onehot(first_np[n2g_np], N)),               # [N, N]
        gsrc2=j(np.concatenate([pad_rows(gsrc), pad_rows(gdst)], axis=0)),     # [2EP, N]
        gdst2=j(np.concatenate([pad_rows(gdst), pad_rows(gsrc)], axis=0)),     # [2EP, N]
        gfirst2=j(np.concatenate([pad_rows(gfirst_e), pad_rows(gfirst_e)], axis=0)),
        scat_dst=j(pad_rows(gdst).T.copy()),                  # [N, EP]
        n2g_scat=j(n2g_oh.T.copy()),                          # [G, N]
        e2g_scat=j(pad_rows(e2g_oh).T.copy()),                # [G, EP]
        w_first=j(w_first), nc_w=j(nc_w),
        rep_mat=j(rep_mat), tile_mat=j(tile_mat),
        sel_mod=j(tile_mat.T.copy()), sel_div=j(rep_mat.T.copy()),
    )


# ----------------------------------------------------------------------------
# LSTMMRF forward (mrf_mode='inference'): one fused pallas_call
# ----------------------------------------------------------------------------
def lstm_mrf_forward(kernel_params, graph, node_feat, node_feat_u, g_repr,
                     hidden_n, hidden_n_u, c=CFG):
    del node_feat_u  # unused by the reference forward as well
    G, N = graph['num_graphs'], graph['num_nodes']
    A, H = c['act_dims'], c['dim_lstm_out']
    inputs = [
        node_feat, g_repr,
        hidden_n_u[0][0], hidden_n_u[1][0],      # u_lstm2 (h0, c0)
        hidden_n[0][0], hidden_n[1][0],          # o_lstm1 (h0, c0)
        graph['n2g_rep'], graph['first_n'], graph['gsrc2'], graph['gdst2'],
        graph['gfirst2'], graph['scat_dst'], graph['n2g_scat'], graph['e2g_scat'],
        graph['w_first'], graph['nc_w'],
        graph['rep_mat'], graph['tile_mat'], graph['sel_mod'], graph['sel_div'],
    ] + list(kernel_params)

    vmem = pl.BlockSpec(memory_space=pltpu.MemorySpace.VMEM)
    f32 = jnp.float32
    ret, logits, h1u, c1u, h1m, c1m = pl.pallas_call(
        functools.partial(_fused_forward_kernel, EP=graph['num_edges_padded'], H=H),
        out_shape=(jax.ShapeDtypeStruct((G, A), f32),   # returned_values
                   jax.ShapeDtypeStruct((N, A), f32),   # act_logits
                   jax.ShapeDtypeStruct((N, H), f32),   # h1 (u_lstm2)
                   jax.ShapeDtypeStruct((N, H), f32),   # c1 (u_lstm2)
                   jax.ShapeDtypeStruct((N, H), f32),   # h1 (o_lstm1)
                   jax.ShapeDtypeStruct((N, H), f32)),  # c1 (o_lstm1)
        in_specs=[vmem] * len(inputs),
        out_specs=(vmem,) * 6,
    )(*inputs)
    model_hid = (h1m[None], c1m[None])
    n_hid_u = (h1u[None], c1u[None])
    return ret, logits, model_hid, n_hid_u


# ----------------------------------------------------------------------------
# Plain-JAX reference (XLA) used only to verify the fused kernel numerically
# ----------------------------------------------------------------------------
def reference_forward(params, graph, node_feat, g_repr, hidden_n, hidden_n_u, c=CFG):
    hi = jax.lax.Precision.HIGHEST
    relu = jax.nn.relu
    lin = lambda x, wb: jnp.dot(x, wb[0], precision=hi) + wb[1]

    def lstm(x, h, cc, p):
        wih, whh, b = p
        Hh = h.shape[-1]
        g = jnp.dot(x, wih, precision=hi) + jnp.dot(h, whh, precision=hi) + b
        i = jax.nn.sigmoid(g[:, :Hh])
        f = jax.nn.sigmoid(g[:, Hh:2 * Hh])
        gg = jnp.tanh(g[:, 2 * Hh:3 * Hh])
        o = jax.nn.sigmoid(g[:, 3 * Hh:])
        c1 = f * cc + i * gg
        return o * jnp.tanh(c1), c1

    src, dst = graph['src'], graph['dst']
    n2g, e2g, first = graph['node2graph'], graph['edge2graph'], graph['first_node_idx']
    N, G, A = graph['num_nodes'], graph['num_graphs'], c['act_dims']
    E = src.shape[0]

    obs = jnp.concatenate([node_feat, g_repr[n2g]], axis=-1)
    x_u = lin(relu(lin(obs, params['u_mlp1a'])), params['u_mlp1b'])
    h1u, c1u = lstm(x_u, hidden_n_u[0][0], hidden_n_u[1][0], params['u_lstm2'])
    half = lin(relu(h1u), params['u_mlp2'])
    first_u = half[first]
    n_feat_u_full = jnp.concatenate([half, first_u[n2g]], axis=-1)
    e_src, e_dst, f_e = half[src], half[dst], first_u[e2g]
    e_feat_u = jnp.concatenate([e_src, e_dst, f_e], axis=-1)
    rev_feat_u = jnp.concatenate([e_dst, e_src, f_e], axis=-1)

    x_m = lin(relu(lin(obs, params['o_mlp1a'])), params['o_mlp1b'])
    h1m, c1m = lstm(x_m, hidden_n[0][0], hidden_n[1][0], params['o_lstm1'])
    un = lin(relu(h1m), params['o_mlp1'])
    e_new = lin(relu(lin(jnp.concatenate([un[src], un[dst]], -1), params['fc_edge'])),
                params['fc_edge2'])
    h_agg = jax.ops.segment_sum(e_new, dst, num_segments=N)
    n_new = lin(relu(lin(jnp.concatenate([un, h_agg], -1), params['fc_node'])),
                params['fc_node2'])
    logits = lin(relu(lin(n_new, params['o_readout'])), params['o_readout2'])
    probs = jax.nn.softmax(logits, axis=-1)

    iu = lambda x: lin(relu(lin(relu(lin(x, params['iu1'])), params['iu3'])), params['iu2'])
    ju = lambda x: lin(relu(lin(relu(lin(x, params['ju1'])), params['ju3'])), params['ju2'])
    indiv_util = iu(n_feat_u_full)
    C = ju(e_feat_u).reshape(E, A, A)
    R = ju(rev_feat_u).reshape(E, A, A)
    util_vals = 0.5 * (jnp.transpose(C, (0, 2, 1)) + R)
    sp, dp = probs[src], probs[dst]
    u_msg = jnp.sum(util_vals * sp[:, None, :], axis=-1)
    e_all = jnp.sum(u_msg * dp, axis=-1, keepdims=True)
    util_dst = jax.ops.segment_sum(u_msg, dst, num_segments=N)
    exp_ind = jnp.sum(indiv_util * probs, axis=-1, keepdims=True)
    w = jnp.zeros((N, 1), jnp.float32).at[first].set(1.0)
    iz = jnp.zeros((N,), bool).at[first].set(True)
    ncw = jnp.where(jnp.logical_and(~iz[src], ~iz[dst]), 0.5, 0.0)[:, None]
    seg_n = lambda v: jax.ops.segment_sum(v, n2g, num_segments=G)
    seg_e = lambda v: jax.ops.segment_sum(v, e2g, num_segments=G)
    ret = (seg_n(w * util_dst) + seg_e(ncw * e_all)
           + (seg_n((1.0 - w) * exp_ind) + seg_n(w * indiv_util)))
    return ret, logits, (h1m[None], c1m[None]), (h1u[None], c1u[None])


# ----------------------------------------------------------------------------
if __name__ == "__main__":
    key = jax.random.PRNGKey(0)
    kp, k1, k2, k3, k4, k5, k6, k7 = jax.random.split(key, 8)

    params = init_params(kp)
    kernel_params = flatten_params_for_kernel(params)

    num_graphs, nodes_per_graph = 2, 3
    graph = build_batched_complete_graph(num_graphs, nodes_per_graph)
    N = graph['num_nodes']

    node_feat = jax.random.normal(k1, (N, CFG['dim_in_node']), jnp.float32)
    node_feat_u = jax.random.normal(k2, (N, CFG['dim_in_node']), jnp.float32)  # unused (as in reference)
    g_repr = jax.random.normal(k3, (num_graphs, CFG['dim_in_u']), jnp.float32)
    hidden_n = (jax.random.normal(k4, (1, N, CFG['dim_lstm_out']), jnp.float32),
                jax.random.normal(k5, (1, N, CFG['dim_lstm_out']), jnp.float32))
    hidden_n_u = (jax.random.normal(k6, (1, N, CFG['dim_lstm_out']), jnp.float32),
                  jax.random.normal(k7, (1, N, CFG['dim_lstm_out']), jnp.float32))

    out, act_logits, model_hid, n_hid_u = lstm_mrf_forward(
        kernel_params, graph, node_feat, node_feat_u, g_repr, hidden_n, hidden_n_u)
    jax.block_until_ready((out, act_logits, model_hid, n_hid_u))

    # Light-weight numerical check against the plain-JAX reference.
    ref_out, ref_logits, ref_mh, ref_nhu = jax.block_until_ready(
        reference_forward(params, graph, node_feat, g_repr, hidden_n, hidden_n_u))
    np.testing.assert_allclose(np.asarray(out), np.asarray(ref_out), rtol=5e-2, atol=5e-2)
    np.testing.assert_allclose(np.asarray(act_logits), np.asarray(ref_logits), rtol=5e-2, atol=5e-2)
    for got, want in zip(model_hid + n_hid_u, ref_mh + ref_nhu):
        np.testing.assert_allclose(np.asarray(got), np.asarray(want), rtol=5e-2, atol=5e-2)

    assert out.shape == (num_graphs, CFG['act_dims'])
    assert act_logits.shape == (N, CFG['act_dims'])
    print("KERNEL_OK")
</pallas_src>

<mosaic_0001>
module attributes {stable_mosaic.version = 11 : i64} {
  func.func @_fused_forward_kernel(%arg0: memref<6x8xf32, #tpu.memory_space<vmem>>, %arg1: memref<2x4xf32, #tpu.memory_space<vmem>>, %arg2: memref<6x16xf32, #tpu.memory_space<vmem>>, %arg3: memref<6x16xf32, #tpu.memory_space<vmem>>, %arg4: memref<6x16xf32, #tpu.memory_space<vmem>>, %arg5: memref<6x16xf32, #tpu.memory_space<vmem>>, %arg6: memref<6x2xf32, #tpu.memory_space<vmem>>, %arg7: memref<6x6xf32, #tpu.memory_space<vmem>>, %arg8: memref<32x6xf32, #tpu.memory_space<vmem>>, %arg9: memref<32x6xf32, #tpu.memory_space<vmem>>, %arg10: memref<32x6xf32, #tpu.memory_space<vmem>>, %arg11: memref<6x16xf32, #tpu.memory_space<vmem>>, %arg12: memref<2x6xf32, #tpu.memory_space<vmem>>, %arg13: memref<2x16xf32, #tpu.memory_space<vmem>>, %arg14: memref<6x1xf32, #tpu.memory_space<vmem>>, %arg15: memref<16x1xf32, #tpu.memory_space<vmem>>, %arg16: memref<8x64xf32, #tpu.memory_space<vmem>>, %arg17: memref<8x64xf32, #tpu.memory_space<vmem>>, %arg18: memref<64x8xf32, #tpu.memory_space<vmem>>, %arg19: memref<64x8xf32, #tpu.memory_space<vmem>>, %arg20: memref<8x32xf32, #tpu.memory_space<vmem>>, %arg21: memref<4x32xf32, #tpu.memory_space<vmem>>, %arg22: memref<1x32xf32, #tpu.memory_space<vmem>>, %arg23: memref<32x16xf32, #tpu.memory_space<vmem>>, %arg24: memref<1x16xf32, #tpu.memory_space<vmem>>, %arg25: memref<16x64xf32, #tpu.memory_space<vmem>>, %arg26: memref<16x64xf32, #tpu.memory_space<vmem>>, %arg27: memref<1x64xf32, #tpu.memory_space<vmem>>, %arg28: memref<16x8xf32, #tpu.memory_space<vmem>>, %arg29: memref<1x8xf32, #tpu.memory_space<vmem>>, %arg30: memref<8x16xf32, #tpu.memory_space<vmem>>, %arg31: memref<8x16xf32, #tpu.memory_space<vmem>>, %arg32: memref<8x16xf32, #tpu.memory_space<vmem>>, %arg33: memref<1x16xf32, #tpu.memory_space<vmem>>, %arg34: memref<16x16xf32, #tpu.memory_space<vmem>>, %arg35: memref<1x16xf32, #tpu.memory_space<vmem>>, %arg36: memref<16x64xf32, #tpu.memory_space<vmem>>, %arg37: memref<1x64xf32, #tpu.memory_space<vmem>>, %arg38: memref<8x16xf32, #tpu.memory_space<vmem>>, %arg39: memref<8x16xf32, #tpu.memory_space<vmem>>, %arg40: memref<1x16xf32, #tpu.memory_space<vmem>>, %arg41: memref<16x16xf32, #tpu.memory_space<vmem>>, %arg42: memref<1x16xf32, #tpu.memory_space<vmem>>, %arg43: memref<16x8xf32, #tpu.memory_space<vmem>>, %arg44: memref<1x8xf32, #tpu.memory_space<vmem>>, %arg45: memref<16x8xf32, #tpu.memory_space<vmem>>, %arg46: memref<1x8xf32, #tpu.memory_space<vmem>>, %arg47: memref<8x32xf32, #tpu.memory_space<vmem>>, %arg48: memref<4x32xf32, #tpu.memory_space<vmem>>, %arg49: memref<1x32xf32, #tpu.memory_space<vmem>>, %arg50: memref<32x16xf32, #tpu.memory_space<vmem>>, %arg51: memref<1x16xf32, #tpu.memory_space<vmem>>, %arg52: memref<16x64xf32, #tpu.memory_space<vmem>>, %arg53: memref<16x64xf32, #tpu.memory_space<vmem>>, %arg54: memref<1x64xf32, #tpu.memory_space<vmem>>, %arg55: memref<16x32xf32, #tpu.memory_space<vmem>>, %arg56: memref<1x32xf32, #tpu.memory_space<vmem>>, %arg57: memref<32x8xf32, #tpu.memory_space<vmem>>, %arg58: memref<1x8xf32, #tpu.memory_space<vmem>>, %arg59: memref<8x32xf32, #tpu.memory_space<vmem>>, %arg60: memref<8x32xf32, #tpu.memory_space<vmem>>, %arg61: memref<1x32xf32, #tpu.memory_space<vmem>>, %arg62: memref<32x16xf32, #tpu.memory_space<vmem>>, %arg63: memref<1x16xf32, #tpu.memory_space<vmem>>, %arg64: memref<8x32xf32, #tpu.memory_space<vmem>>, %arg65: memref<16x32xf32, #tpu.memory_space<vmem>>, %arg66: memref<1x32xf32, #tpu.memory_space<vmem>>, %arg67: memref<32x16xf32, #tpu.memory_space<vmem>>, %arg68: memref<1x16xf32, #tpu.memory_space<vmem>>, %arg69: memref<2x8xf32, #tpu.memory_space<vmem>>, %arg70: memref<6x8xf32, #tpu.memory_space<vmem>>, %arg71: memref<6x16xf32, #tpu.memory_space<vmem>>, %arg72: memref<6x16xf32, #tpu.memory_space<vmem>>, %arg73: memref<6x16xf32, #tpu.memory_space<vmem>>, %arg74: memref<6x16xf32, #tpu.memory_space<vmem>>) attributes {dimension_semantics = [], scalar_prefetch = 0 : i64, scratch_operands = 0 : i64, tpu.core_type = #tpu.core_type<tc>} {
    %c0 = arith.constant 0 : index
    %c0_0 = arith.constant 0 : index
    %0 = vector.load %arg20[%c0, %c0_0] : memref<8x32xf32, #tpu.memory_space<vmem>>, vector<8x32xf32>
    %c0_1 = arith.constant 0 : index
    %c0_2 = arith.constant 0 : index
    %1 = vector.load %arg21[%c0_1, %c0_2] : memref<4x32xf32, #tpu.memory_space<vmem>>, vector<4x32xf32>
    %c0_3 = arith.constant 0 : index
    %c0_4 = arith.constant 0 : index
    %2 = vector.load %arg22[%c0_3, %c0_4] : memref<1x32xf32, #tpu.memory_space<vmem>>, vector<1x32xf32>
    %c0_5 = arith.constant 0 : index
    %c0_6 = arith.constant 0 : index
    %3 = vector.load %arg23[%c0_5, %c0_6] : memref<32x16xf32, #tpu.memory_space<vmem>>, vector<32x16xf32>
    %c0_7 = arith.constant 0 : index
    %c0_8 = arith.constant 0 : index
    %4 = vector.load %arg24[%c0_7, %c0_8] : memref<1x16xf32, #tpu.memory_space<vmem>>, vector<1x16xf32>
    %c0_9 = arith.constant 0 : index
    %c0_10 = arith.constant 0 : index
    %5 = vector.load %arg25[%c0_9, %c0_10] : memref<16x64xf32, #tpu.memory_space<vmem>>, vector<16x64xf32>
    %c0_11 = arith.constant 0 : index
    %c0_12 = arith.constant 0 : index
    %6 = vector.load %arg26[%c0_11, %c0_12] : memref<16x64xf32, #tpu.memory_space<vmem>>, vector<16x64xf32>
    %c0_13 = arith.constant 0 : index
    %c0_14 = arith.constant 0 : index
    %7 = vector.load %arg27[%c0_13, %c0_14] : memref<1x64xf32, #tpu.memory_space<vmem>>, vector<1x64xf32>
    %c0_15 = arith.constant 0 : index
    %c0_16 = arith.constant 0 : index
    %8 = vector.load %arg28[%c0_15, %c0_16] : memref<16x8xf32, #tpu.memory_space<vmem>>, vector<16x8xf32>
    %c0_17 = arith.constant 0 : index
    %c0_18 = arith.constant 0 : index
    %9 = vector.load %arg29[%c0_17, %c0_18] : memref<1x8xf32, #tpu.memory_space<vmem>>, vector<1x8xf32>
    %c0_19 = arith.constant 0 : index
    %c0_20 = arith.constant 0 : index
    %10 = vector.load %arg30[%c0_19, %c0_20] : memref<8x16xf32, #tpu.memory_space<vmem>>, vector<8x16xf32>
    %c0_21 = arith.constant 0 : index
    %c0_22 = arith.constant 0 : index
    %11 = vector.load %arg31[%c0_21, %c0_22] : memref<8x16xf32, #tpu.memory_space<vmem>>, vector<8x16xf32>
    %c0_23 = arith.constant 0 : index
    %c0_24 = arith.constant 0 : index
    %12 = vector.load %arg32[%c0_23, %c0_24] : memref<8x16xf32, #tpu.memory_space<vmem>>, vector<8x16xf32>
    %c0_25 = arith.constant 0 : index
    %c0_26 = arith.constant 0 : index
    %13 = vector.load %arg33[%c0_25, %c0_26] : memref<1x16xf32, #tpu.memory_space<vmem>>, vector<1x16xf32>
    %c0_27 = arith.constant 0 : index
    %c0_28 = arith.constant 0 : index
    %14 = vector.load %arg34[%c0_27, %c0_28] : memref<16x16xf32, #tpu.memory_space<vmem>>, vector<16x16xf32>
    %c0_29 = arith.constant 0 : index
    %c0_30 = arith.constant 0 : index
    %15 = vector.load %arg35[%c0_29, %c0_30] : memref<1x16xf32, #tpu.memory_space<vmem>>, vector<1x16xf32>
    %c0_31 = arith.constant 0 : index
    %c0_32 = arith.constant 0 : index
    %16 = vector.load %arg36[%c0_31, %c0_32] : memref<16x64xf32, #tpu.memory_space<vmem>>, vector<16x64xf32>
    %c0_33 = arith.constant 0 : index
    %c0_34 = arith.constant 0 : index
    %17 = vector.load %arg37[%c0_33, %c0_34] : memref<1x64xf32, #tpu.memory_space<vmem>>, vector<1x64xf32>
    %c0_35 = arith.constant 0 : index
    %c0_36 = arith.constant 0 : index
    %18 = vector.load %arg38[%c0_35, %c0_36] : memref<8x16xf32, #tpu.memory_space<vmem>>, vector<8x16xf32>
    %c0_37 = arith.constant 0 : index
    %c0_38 = arith.constant 0 : index
    %19 = vector.load %arg39[%c0_37, %c0_38] : memref<8x16xf32, #tpu.memory_space<vmem>>, vector<8x16xf32>
    %c0_39 = arith.constant 0 : index
    %c0_40 = arith.constant 0 : index
    %20 = vector.load %arg40[%c0_39, %c0_40] : memref<1x16xf32, #tpu.memory_space<vmem>>, vector<1x16xf32>
    %c0_41 = arith.constant 0 : index
    %c0_42 = arith.constant 0 : index
    %21 = vector.load %arg41[%c0_41, %c0_42] : memref<16x16xf32, #tpu.memory_space<vmem>>, vector<16x16xf32>
    %c0_43 = arith.constant 0 : index
    %c0_44 = arith.constant 0 : index
    %22 = vector.load %arg42[%c0_43, %c0_44] : memref<1x16xf32, #tpu.memory_space<vmem>>, vector<1x16xf32>
    %c0_45 = arith.constant 0 : index
    %c0_46 = arith.constant 0 : index
    %23 = vector.load %arg43[%c0_45, %c0_46] : memref<16x8xf32, #tpu.memory_space<vmem>>, vector<16x8xf32>
    %c0_47 = arith.constant 0 : index
    %c0_48 = arith.constant 0 : index
    %24 = vector.load %arg44[%c0_47, %c0_48] : memref<1x8xf32, #tpu.memory_space<vmem>>, vector<1x8xf32>
    %c0_49 = arith.constant 0 : index
    %c0_50 = arith.constant 0 : index
    %25 = vector.load %arg45[%c0_49, %c0_50] : memref<16x8xf32, #tpu.memory_space<vmem>>, vector<16x8xf32>
    %c0_51 = arith.constant 0 : index
    %c0_52 = arith.constant 0 : index
    %26 = vector.load %arg46[%c0_51, %c0_52] : memref<1x8xf32, #tpu.memory_space<vmem>>, vector<1x8xf32>
    %c0_53 = arith.constant 0 : index
    %c0_54 = arith.constant 0 : index
    %27 = vector.load %arg47[%c0_53, %c0_54] : memref<8x32xf32, #tpu.memory_space<vmem>>, vector<8x32xf32>
    %c0_55 = arith.constant 0 : index
    %c0_56 = arith.constant 0 : index
    %28 = vector.load %arg48[%c0_55, %c0_56] : memref<4x32xf32, #tpu.memory_space<vmem>>, vector<4x32xf32>
    %c0_57 = arith.constant 0 : index
    %c0_58 = arith.constant 0 : index
    %29 = vector.load %arg49[%c0_57, %c0_58] : memref<1x32xf32, #tpu.memory_space<vmem>>, vector<1x32xf32>
    %c0_59 = arith.constant 0 : index
    %c0_60 = arith.constant 0 : index
    %30 = vector.load %arg50[%c0_59, %c0_60] : memref<32x16xf32, #tpu.memory_space<vmem>>, vector<32x16xf32>
    %c0_61 = arith.constant 0 : index
    %c0_62 = arith.constant 0 : index
    %31 = vector.load %arg51[%c0_61, %c0_62] : memref<1x16xf32, #tpu.memory_space<vmem>>, vector<1x16xf32>
    %c0_63 = arith.constant 0 : index
    %c0_64 = arith.constant 0 : index
    %32 = vector.load %arg52[%c0_63, %c0_64] : memref<16x64xf32, #tpu.memory_space<vmem>>, vector<16x64xf32>
    %c0_65 = arith.constant 0 : index
    %c0_66 = arith.constant 0 : index
    %33 = vector.load %arg53[%c0_65, %c0_66] : memref<16x64xf32, #tpu.memory_space<vmem>>, vector<16x64xf32>
    %c0_67 = arith.constant 0 : index
    %c0_68 = arith.constant 0 : index
    %34 = vector.load %arg54[%c0_67, %c0_68] : memref<1x64xf32, #tpu.memory_space<vmem>>, vector<1x64xf32>
    %c0_69 = arith.constant 0 : index
    %c0_70 = arith.constant 0 : index
    %35 = vector.load %arg55[%c0_69, %c0_70] : memref<16x32xf32, #tpu.memory_space<vmem>>, vector<16x32xf32>
    %c0_71 = arith.constant 0 : index
    %c0_72 = arith.constant 0 : index
    %36 = vector.load %arg56[%c0_71, %c0_72] : memref<1x32xf32, #tpu.memory_space<vmem>>, vector<1x32xf32>
    %c0_73 = arith.constant 0 : index
    %c0_74 = arith.constant 0 : index
    %37 = vector.load %arg57[%c0_73, %c0_74] : memref<32x8xf32, #tpu.memory_space<vmem>>, vector<32x8xf32>
    %c0_75 = arith.constant 0 : index
    %c0_76 = arith.constant 0 : index
    %38 = vector.load %arg58[%c0_75, %c0_76] : memref<1x8xf32, #tpu.memory_space<vmem>>, vector<1x8xf32>
    %c0_77 = arith.constant 0 : index
    %c0_78 = arith.constant 0 : index
    %39 = vector.load %arg59[%c0_77, %c0_78] : memref<8x32xf32, #tpu.memory_space<vmem>>, vector<8x32xf32>
    %c0_79 = arith.constant 0 : index
    %c0_80 = arith.constant 0 : index
    %40 = vector.load %arg60[%c0_79, %c0_80] : memref<8x32xf32, #tpu.memory_space<vmem>>, vector<8x32xf32>
    %c0_81 = arith.constant 0 : index
    %c0_82 = arith.constant 0 : index
    %41 = vector.load %arg61[%c0_81, %c0_82] : memref<1x32xf32, #tpu.memory_space<vmem>>, vector<1x32xf32>
    %c0_83 = arith.constant 0 : index
    %c0_84 = arith.constant 0 : index
    %42 = vector.load %arg62[%c0_83, %c0_84] : memref<32x16xf32, #tpu.memory_space<vmem>>, vector<32x16xf32>
    %c0_85 = arith.constant 0 : index
    %c0_86 = arith.constant 0 : index
    %43 = vector.load %arg63[%c0_85, %c0_86] : memref<1x16xf32, #tpu.memory_space<vmem>>, vector<1x16xf32>
    %c0_87 = arith.constant 0 : index
    %c0_88 = arith.constant 0 : index
    %44 = vector.load %arg64[%c0_87, %c0_88] : memref<8x32xf32, #tpu.memory_space<vmem>>, vector<8x32xf32>
    %c0_89 = arith.constant 0 : index
    %c0_90 = arith.constant 0 : index
    %45 = vector.load %arg65[%c0_89, %c0_90] : memref<16x32xf32, #tpu.memory_space<vmem>>, vector<16x32xf32>
    %c0_91 = arith.constant 0 : index
    %c0_92 = arith.constant 0 : index
    %46 = vector.load %arg66[%c0_91, %c0_92] : memref<1x32xf32, #tpu.memory_space<vmem>>, vector<1x32xf32>
    %c0_93 = arith.constant 0 : index
    %c0_94 = arith.constant 0 : index
    %47 = vector.load %arg67[%c0_93, %c0_94] : memref<32x16xf32, #tpu.memory_space<vmem>>, vector<32x16xf32>
    %c0_95 = arith.constant 0 : index
    %c0_96 = arith.constant 0 : index
    %48 = vector.load %arg68[%c0_95, %c0_96] : memref<1x16xf32, #tpu.memory_space<vmem>>, vector<1x16xf32>
    %c0_97 = arith.constant 0 : index
    %c0_98 = arith.constant 0 : index
    %49 = vector.load %arg0[%c0_97, %c0_98] : memref<6x8xf32, #tpu.memory_space<vmem>>, vector<6x8xf32>
    %c0_99 = arith.constant 0 : index
    %c0_100 = arith.constant 0 : index
    %50 = vector.load %arg8[%c0_99, %c0_100] : memref<32x6xf32, #tpu.memory_space<vmem>>, vector<32x6xf32>
    %c0_101 = arith.constant 0 : index
    %c0_102 = arith.constant 0 : index
    %51 = vector.load %arg11[%c0_101, %c0_102] : memref<6x16xf32, #tpu.memory_space<vmem>>, vector<6x16xf32>
    %c0_103 = arith.constant 0 : index
    %c0_104 = arith.constant 0 : index
    %52 = vector.load %arg12[%c0_103, %c0_104] : memref<2x6xf32, #tpu.memory_space<vmem>>, vector<2x6xf32>
    %c0_105 = arith.constant 0 : index
    %c0_106 = arith.constant 0 : index
    %53 = vector.load %arg6[%c0_105, %c0_106] : memref<6x2xf32, #tpu.memory_space<vmem>>, vector<6x2xf32>
    %c0_107 = arith.constant 0 : index
    %c0_108 = arith.constant 0 : index
    %54 = vector.load %arg1[%c0_107, %c0_108] : memref<2x4xf32, #tpu.memory_space<vmem>>, vector<2x4xf32>
    %cst = arith.constant dense<0.000000e+00> : vector<6x4xf32>
    %55 = tpu.matmul %53, %54, %cst {dimension_numbers = #tpu.dot_dimension_numbers<[1], [0], [0], [1], [0, 0, 1, 1], [], []>} : vector<6x2xf32>, vector<2x4xf32>, vector<6x4xf32> -> vector<6x4xf32>
    %cst_109 = arith.constant dense<0.000000e+00> : vector<6x32xf32>
    %56 = tpu.matmul %49, %0, %cst_109 {dimension_numbers = #tpu.dot_dimension_numbers<[1], [0], [0], [1], [0, 0, 1, 1], [], []>} : vector<6x8xf32>, vector<8x32xf32>, vector<6x32xf32> -> vector<6x32xf32>
    %cst_110 = arith.constant dense<0.000000e+00> : vector<6x32xf32>
    %57 = tpu.matmul %55, %1, %cst_110 {dimension_numbers = #tpu.dot_dimension_numbers<[1], [0], [0], [1], [0, 0, 1, 1], [], []>} : vector<6x4xf32>, vector<4x32xf32>, vector<6x32xf32> -> vector<6x32xf32>
    %58 = arith.addf %56, %57 : vector<6x32xf32>
    %59 = vector.broadcast %2 : vector<1x32xf32> to vector<6x32xf32>
    %60 = arith.addf %58, %59 : vector<6x32xf32>
    %cst_111 = arith.constant 0.000000e+00 : f32
    %61 = vector.broadcast %cst_111 : f32 to vector<6x32xf32>
    %62 = arith.maximumf %60, %61 : vector<6x32xf32>
    %cst_112 = arith.constant dense<0.000000e+00> : vector<6x16xf32>
    %63 = tpu.matmul %62, %3, %cst_112 {dimension_numbers = #tpu.dot_dimension_numbers<[1], [0], [0], [1], [0, 0, 1, 1], [], []>} : vector<6x32xf32>, vector<32x16xf32>, vector<6x16xf32> -> vector<6x16xf32>
    %64 = vector.broadcast %4 : vector<1x16xf32> to vector<6x16xf32>
    %65 = arith.addf %63, %64 : vector<6x16xf32>
    %cst_113 = arith.constant dense<0.000000e+00> : vector<6x32xf32>
    %66 = tpu.matmul %49, %27, %cst_113 {dimension_numbers = #tpu.dot_dimension_numbers<[1], [0], [0], [1], [0, 0, 1, 1], [], []>} : vector<6x8xf32>, vector<8x32xf32>, vector<6x32xf32> -> vector<6x32xf32>
    %cst_114 = arith.constant dense<0.000000e+00> : vector<6x32xf32>
    %67 = tpu.matmul %55, %28, %cst_114 {dimension_numbers = #tpu.dot_dimension_numbers<[1], [0], [0], [1], [0, 0, 1, 1], [], []>} : vector<6x4xf32>, vector<4x32xf32>, vector<6x32xf32> -> vector<6x32xf32>
    %68 = arith.addf %66, %67 : vector<6x32xf32>
    %69 = vector.broadcast %29 : vector<1x32xf32> to vector<6x32xf32>
    %70 = arith.addf %68, %69 : vector<6x32xf32>
    %cst_115 = arith.constant 0.000000e+00 : f32
    %71 = vector.broadcast %cst_115 : f32 to vector<6x32xf32>
    %72 = arith.maximumf %70, %71 : vector<6x32xf32>
    %cst_116 = arith.constant dense<0.000000e+00> : vector<6x16xf32>
    %73 = tpu.matmul %72, %30, %cst_116 {dimension_numbers = #tpu.dot_dimension_numbers<[1], [0], [0], [1], [0, 0, 1, 1], [], []>} : vector<6x32xf32>, vector<32x16xf32>, vector<6x16xf32> -> vector<6x16xf32>
    %74 = vector.broadcast %31 : vector<1x16xf32> to vector<6x16xf32>
    %75 = arith.addf %73, %74 : vector<6x16xf32>
    %c0_117 = arith.constant 0 : index
    %c0_118 = arith.constant 0 : index
    %76 = vector.load %arg2[%c0_117, %c0_118] : memref<6x16xf32, #tpu.memory_space<vmem>>, vector<6x16xf32>
    %c0_119 = arith.constant 0 : index
    %c0_120 = arith.constant 0 : index
    %77 = vector.load %arg3[%c0_119, %c0_120] : memref<6x16xf32, #tpu.memory_space<vmem>>, vector<6x16xf32>
    %cst_121 = arith.constant dense<0.000000e+00> : vector<6x64xf32>
    %78 = tpu.matmul %65, %5, %cst_121 {dimension_numbers = #tpu.dot_dimension_numbers<[1], [0], [0], [1], [0, 0, 1, 1], [], []>} : vector<6x16xf32>, vector<16x64xf32>, vector<6x64xf32> -> vector<6x64xf32>
    %cst_122 = arith.constant dense<0.000000e+00> : vector<6x64xf32>
    %79 = tpu.matmul %76, %6, %cst_122 {dimension_numbers = #tpu.dot_dimension_numbers<[1], [0], [0], [1], [0, 0, 1, 1], [], []>} : vector<6x16xf32>, vector<16x64xf32>, vector<6x64xf32> -> vector<6x64xf32>
    %80 = arith.addf %78, %79 : vector<6x64xf32>
    %81 = vector.broadcast %7 : vector<1x64xf32> to vector<6x64xf32>
    %82 = arith.addf %80, %81 : vector<6x64xf32>
    %83 = arith.negf %82 : vector<6x64xf32>
    %84 = math.exp %83 : vector<6x64xf32>
    %cst_123 = arith.constant 1.000000e+00 : f32
    %85 = vector.broadcast %cst_123 : f32 to vector<6x64xf32>
    %86 = arith.addf %85, %84 : vector<6x64xf32>
    %87 = arith.divf %85, %86 : vector<6x64xf32>
    %88 = math.tanh %82 : vector<6x64xf32>
    %89 = vector.extract_strided_slice %87 {offsets = [0, 0], sizes = [6, 16], strides = [1, 1]} : vector<6x64xf32> to vector<6x16xf32>
    %90 = vector.extract_strided_slice %87 {offsets = [0, 16], sizes = [6, 16], strides = [1, 1]} : vector<6x64xf32> to vector<6x16xf32>
    %91 = vector.extract_strided_slice %88 {offsets = [0, 32], sizes = [6, 16], strides = [1, 1]} : vector<6x64xf32> to vector<6x16xf32>
    %92 = vector.extract_strided_slice %87 {offsets = [0, 48], sizes = [6, 16], strides = [1, 1]} : vector<6x64xf32> to vector<6x16xf32>
    %93 = arith.mulf %90, %77 : vector<6x16xf32>
    %94 = arith.mulf %89, %91 : vector<6x16xf32>
    %95 = arith.addf %93, %94 : vector<6x16xf32>
    %96 = math.tanh %95 : vector<6x16xf32>
    %97 = arith.mulf %92, %96 : vector<6x16xf32>
    %c0_124 = arith.constant 0 : index
    %c0_125 = arith.constant 0 : index
    %98 = vector.load %arg4[%c0_124, %c0_125] : memref<6x16xf32, #tpu.memory_space<vmem>>, vector<6x16xf32>
    %c0_126 = arith.constant 0 : index
    %c0_127 = arith.constant 0 : index
    %99 = vector.load %arg5[%c0_126, %c0_127] : memref<6x16xf32, #tpu.memory_space<vmem>>, vector<6x16xf32>
    %cst_128 = arith.constant dense<0.000000e+00> : vector<6x64xf32>
    %100 = tpu.matmul %75, %32, %cst_128 {dimension_numbers = #tpu.dot_dimension_numbers<[1], [0], [0], [1], [0, 0, 1, 1], [], []>} : vector<6x16xf32>, vector<16x64xf32>, vector<6x64xf32> -> vector<6x64xf32>
    %cst_129 = arith.constant dense<0.000000e+00> : vector<6x64xf32>
    %101 = tpu.matmul %98, %33, %cst_129 {dimension_numbers = #tpu.dot_dimension_numbers<[1], [0], [0], [1], [0, 0, 1, 1], [], []>} : vector<6x16xf32>, vector<16x64xf32>, vector<6x64xf32> -> vector<6x64xf32>
    %102 = arith.addf %100, %101 : vector<6x64xf32>
    %103 = vector.broadcast %34 : vector<1x64xf32> to vector<6x64xf32>
    %104 = arith.addf %102, %103 : vector<6x64xf32>
    %105 = arith.negf %104 : vector<6x64xf32>
    %106 = math.exp %105 : vector<6x64xf32>
    %cst_130 = arith.constant 1.000000e+00 : f32
    %107 = vector.broadcast %cst_130 : f32 to vector<6x64xf32>
    %108 = arith.addf %107, %106 : vector<6x64xf32>
    %109 = arith.divf %107, %108 : vector<6x64xf32>
    %110 = math.tanh %104 : vector<6x64xf32>
    %111 = vector.extract_strided_slice %109 {offsets = [0, 0], sizes = [6, 16], strides = [1, 1]} : vector<6x64xf32> to vector<6x16xf32>
    %112 = vector.extract_strided_slice %109 {offsets = [0, 16], sizes = [6, 16], strides = [1, 1]} : vector<6x64xf32> to vector<6x16xf32>
    %113 = vector.extract_strided_slice %110 {offsets = [0, 32], sizes = [6, 16], strides = [1, 1]} : vector<6x64xf32> to vector<6x16xf32>
    %114 = vector.extract_strided_slice %109 {offsets = [0, 48], sizes = [6, 16], strides = [1, 1]} : vector<6x64xf32> to vector<6x16xf32>
    %115 = arith.mulf %112, %99 : vector<6x16xf32>
    %116 = arith.mulf %111, %113 : vector<6x16xf32>
    %117 = arith.addf %115, %116 : vector<6x16xf32>
    %118 = math.tanh %117 : vector<6x16xf32>
    %119 = arith.mulf %114, %118 : vector<6x16xf32>
    %c0_131 = arith.constant 0 : index
    %c0_132 = arith.constant 0 : index
    %120 = vector.load %arg71[%c0_131, %c0_132] : memref<6x16xf32, #tpu.memory_space<vmem>>, vector<6x16xf32>
    tpu.vector_store %arg71[%c0_131, %c0_132], %97 {strides = array<i32>} : memref<6x16xf32, #tpu.memory_space<vmem>>, vector<6x16xf32>,
    %c0_133 = arith.constant 0 : index
    %c0_134 = arith.constant 0 : index
    %121 = vector.load %arg72[%c0_133, %c0_134] : memref<6x16xf32, #tpu.memory_space<vmem>>, vector<6x16xf32>
    tpu.vector_store %arg72[%c0_133, %c0_134], %95 {strides = array<i32>} : memref<6x16xf32, #tpu.memory_space<vmem>>, vector<6x16xf32>,
    %c0_135 = arith.constant 0 : index
    %c0_136 = arith.constant 0 : index
    %122 = vector.load %arg73[%c0_135, %c0_136] : memref<6x16xf32, #tpu.memory_space<vmem>>, vector<6x16xf32>
    tpu.vector_store %arg73[%c0_135, %c0_136], %119 {strides = array<i32>} : memref<6x16xf32, #tpu.memory_space<vmem>>, vector<6x16xf32>,
    %c0_137 = arith.constant 0 : index
    %c0_138 = arith.constant 0 : index
    %123 = vector.load %arg74[%c0_137, %c0_138] : memref<6x16xf32, #tpu.memory_space<vmem>>, vector<6x16xf32>
    tpu.vector_store %arg74[%c0_137, %c0_138], %117 {strides = array<i32>} : memref<6x16xf32, #tpu.memory_space<vmem>>, vector<6x16xf32>,
    %cst_139 = arith.constant 0.000000e+00 : f32
    %124 = vector.broadcast %cst_139 : f32 to vector<6x16xf32>
    %125 = arith.maximumf %97, %124 : vector<6x16xf32>
    %cst_140 = arith.constant dense<0.000000e+00> : vector<6x8xf32>
    %126 = tpu.matmul %125, %8, %cst_140 {dimension_numbers = #tpu.dot_dimension_numbers<[1], [0], [0], [1], [0, 0, 1, 1], [], []>} : vector<6x16xf32>, vector<16x8xf32>, vector<6x8xf32> -> vector<6x8xf32>
    %127 = vector.broadcast %9 : vector<1x8xf32> to vector<6x8xf32>
    %128 = arith.addf %126, %127 : vector<6x8xf32>
    %cst_141 = arith.constant 0.000000e+00 : f32
    %129 = vector.broadcast %cst_141 : f32 to vector<6x16xf32>
    %130 = arith.maximumf %119, %129 : vector<6x16xf32>
    %cst_142 = arith.constant dense<0.000000e+00> : vector<6x8xf32>
    %131 = tpu.matmul %130, %25, %cst_142 {dimension_numbers = #tpu.dot_dimension_numbers<[1], [0], [0], [1], [0, 0, 1, 1], [], []>} : vector<6x16xf32>, vector<16x8xf32>, vector<6x8xf32> -> vector<6x8xf32>
    %132 = vector.broadcast %26 : vector<1x8xf32> to vector<6x8xf32>
    %133 = arith.addf %131, %132 : vector<6x8xf32>
    %cst_143 = arith.constant dense<0.000000e+00> : vector<32x8xf32>
    %134 = tpu.matmul %50, %133, %cst_143 {dimension_numbers = #tpu.dot_dimension_numbers<[1], [0], [0], [1], [0, 0, 1, 1], [], []>} : vector<32x6xf32>, vector<6x8xf32>, vector<32x8xf32> -> vector<32x8xf32>
    %135 = vector.extract_strided_slice %134 {offsets = [0, 0], sizes = [16, 8], strides = [1, 1]} : vector<32x8xf32> to vector<16x8xf32>
    %cst_144 = arith.constant dense<0.000000e+00> : vector<16x32xf32>
    %136 = tpu.matmul %135, %39, %cst_144 {dimension_numbers = #tpu.dot_dimension_numbers<[1], [0], [0], [1], [0, 0, 1, 1], [], []>} : vector<16x8xf32>, vector<8x32xf32>, vector<16x32xf32> -> vector<16x32xf32>
    %137 = vector.extract_strided_slice %134 {offsets = [16, 0], sizes = [16, 8], strides = [1, 1]} : vector<32x8xf32> to vector<16x8xf32>
    %cst_145 = arith.constant dense<0.000000e+00> : vector<16x32xf32>
    %138 = tpu.matmul %137, %40, %cst_145 {dimension_numbers = #tpu.dot_dimension_numbers<[1], [0], [0], [1], [0, 0, 1, 1], [], []>} : vector<16x8xf32>, vector<8x32xf32>, vector<16x32xf32> -> vector<16x32xf32>
    %139 = arith.addf %136, %138 : vector<16x32xf32>
    %140 = vector.broadcast %41 : vector<1x32xf32> to vector<16x32xf32>
    %141 = arith.addf %139, %140 : vector<16x32xf32>
    %cst_146 = arith.constant 0.000000e+00 : f32
    %142 = vector.broadcast %cst_146 : f32 to vector<16x32xf32>
    %143 = arith.maximumf %141, %142 : vector<16x32xf32>
    %cst_147 = arith.constant dense<0.000000e+00> : vector<16x16xf32>
    %144 = tpu.matmul %143, %42, %cst_147 {dimension_numbers = #tpu.dot_dimension_numbers<[1], [0], [0], [1], [0, 0, 1, 1], [], []>} : vector<16x32xf32>, vector<32x16xf32>, vector<16x16xf32> -> vector<16x16xf32>
    %145 = vector.broadcast %43 : vector<1x16xf32> to vector<16x16xf32>
    %146 = arith.addf %144, %145 : vector<16x16xf32>
    %cst_148 = arith.constant dense<0.000000e+00> : vector<6x16xf32>
    %147 = tpu.matmul %51, %146, %cst_148 {dimension_numbers = #tpu.dot_dimension_numbers<[1], [0], [0], [1], [0, 0, 1, 1], [], []>} : vector<6x16xf32>, vector<16x16xf32>, vector<6x16xf32> -> vector<6x16xf32>
    %cst_149 = arith.constant dense<0.000000e+00> : vector<6x32xf32>
    %148 = tpu.matmul %133, %44, %cst_149 {dimension_numbers = #tpu.dot_dimension_numbers<[1], [0], [0], [1], [0, 0, 1, 1], [], []>} : vector<6x8xf32>, vector<8x32xf32>, vector<6x32xf32> -> vector<6x32xf32>
    %cst_150 = arith.constant dense<0.000000e+00> : vector<6x32xf32>
    %149 = tpu.matmul %147, %45, %cst_150 {dimension_numbers = #tpu.dot_dimension_numbers<[1], [0], [0], [1], [0, 0, 1, 1], [], []>} : vector<6x16xf32>, vector<16x32xf32>, vector<6x32xf32> -> vector<6x32xf32>
    %150 = arith.addf %148, %149 : vector<6x32xf32>
    %151 = vector.broadcast %46 : vector<1x32xf32> to vector<6x32xf32>
    %152 = arith.addf %150, %151 : vector<6x32xf32>
    %cst_151 = arith.constant 0.000000e+00 : f32
    %153 = vector.broadcast %cst_151 : f32 to vector<6x32xf32>
    %154 = arith.maximumf %152, %153 : vector<6x32xf32>
    %cst_152 = arith.constant dense<0.000000e+00> : vector<6x16xf32>
    %155 = tpu.matmul %154, %47, %cst_152 {dimension_numbers = #tpu.dot_dimension_numbers<[1], [0], [0], [1], [0, 0, 1, 1], [], []>} : vector<6x32xf32>, vector<32x16xf32>, vector<6x16xf32> -> vector<6x16xf32>
    %156 = vector.broadcast %48 : vector<1x16xf32> to vector<6x16xf32>
    %157 = arith.addf %155, %156 : vector<6x16xf32>
    %cst_153 = arith.constant dense<0.000000e+00> : vector<6x32xf32>
    %158 = tpu.matmul %157, %35, %cst_153 {dimension_numbers = #tpu.dot_dimension_numbers<[1], [0], [0], [1], [0, 0, 1, 1], [], []>} : vector<6x16xf32>, vector<16x32xf32>, vector<6x32xf32> -> vector<6x32xf32>
    %159 = vector.broadcast %36 : vector<1x32xf32> to vector<6x32xf32>
    %160 = arith.addf %158, %159 : vector<6x32xf32>
    %cst_154 = arith.constant 0.000000e+00 : f32
    %161 = vector.broadcast %cst_154 : f32 to vector<6x32xf32>
    %162 = arith.maximumf %160, %161 : vector<6x32xf32>
    %cst_155 = arith.constant dense<0.000000e+00> : vector<6x8xf32>
    %163 = tpu.matmul %162, %37, %cst_155 {dimension_numbers = #tpu.dot_dimension_numbers<[1], [0], [0], [1], [0, 0, 1, 1], [], []>} : vector<6x32xf32>, vector<32x8xf32>, vector<6x8xf32> -> vector<6x8xf32>
    %164 = vector.broadcast %38 : vector<1x8xf32> to vector<6x8xf32>
    %165 = arith.addf %163, %164 : vector<6x8xf32>
    %c0_156 = arith.constant 0 : index
    %c0_157 = arith.constant 0 : index
    %166 = vector.load %arg70[%c0_156, %c0_157] : memref<6x8xf32, #tpu.memory_space<vmem>>, vector<6x8xf32>
    tpu.vector_store %arg70[%c0_156, %c0_157], %165 {strides = array<i32>} : memref<6x8xf32, #tpu.memory_space<vmem>>, vector<6x8xf32>,
    %cst_158 = arith.constant dense<0xFF800000> : vector<6xf32>
    %167 = vector.multi_reduction <maximumf>, %165, %cst_158 [1] : vector<6x8xf32> to vector<6xf32>
    %168 = vector.shape_cast %167 : vector<6xf32> to vector<6x1xf32>
    %169 = vector.broadcast %168 : vector<6x1xf32> to vector<6x8xf32>
    %170 = arith.subf %165, %169 : vector<6x8xf32>
    %171 = math.exp %170 : vector<6x8xf32>
    %cst_159 = arith.constant dense<0.000000e+00> : vector<6xf32>
    %172 = vector.multi_reduction <add>, %171, %cst_159 [1] : vector<6x8xf32> to vector<6xf32>
    %173 = vector.shape_cast %172 : vector<6xf32> to vector<6x1xf32>
    %174 = vector.broadcast %173 : vector<6x1xf32> to vector<6x8xf32>
    %175 = arith.divf %171, %174 : vector<6x8xf32>
    %c0_160 = arith.constant 0 : index
    %c0_161 = arith.constant 0 : index
    %176 = vector.load %arg7[%c0_160, %c0_161] : memref<6x6xf32, #tpu.memory_space<vmem>>, vector<6x6xf32>
    %cst_162 = arith.constant dense<0.000000e+00> : vector<6x8xf32>
    %177 = tpu.matmul %176, %128, %cst_162 {dimension_numbers = #tpu.dot_dimension_numbers<[1], [0], [0], [1], [0, 0, 1, 1], [], []>} : vector<6x6xf32>, vector<6x8xf32>, vector<6x8xf32> -> vector<6x8xf32>
    %cst_163 = arith.constant dense<0.000000e+00> : vector<6x16xf32>
    %178 = tpu.matmul %128, %18, %cst_163 {dimension_numbers = #tpu.dot_dimension_numbers<[1], [0], [0], [1], [0, 0, 1, 1], [], []>} : vector<6x8xf32>, vector<8x16xf32>, vector<6x16xf32> -> vector<6x16xf32>
    %cst_164 = arith.constant dense<0.000000e+00> : vector<6x16xf32>
    %179 = tpu.matmul %177, %19, %cst_164 {dimension_numbers = #tpu.dot_dimension_numbers<[1], [0], [0], [1], [0, 0, 1, 1], [], []>} : vector<6x8xf32>, vector<8x16xf32>, vector<6x16xf32> -> vector<6x16xf32>
    %180 = arith.addf %178, %179 : vector<6x16xf32>
    %181 = vector.broadcast %20 : vector<1x16xf32> to vector<6x16xf32>
    %182 = arith.addf %180, %181 : vector<6x16xf32>
    %cst_165 = arith.constant 0.000000e+00 : f32
    %183 = vector.broadcast %cst_165 : f32 to vector<6x16xf32>
    %184 = arith.maximumf %182, %183 : vector<6x16xf32>
    %cst_166 = arith.constant dense<0.000000e+00> : vector<6x16xf32>
    %185 = tpu.matmul %184, %21, %cst_166 {dimension_numbers = #tpu.dot_dimension_numbers<[1], [0], [0], [1], [0, 0, 1, 1], [], []>} : vector<6x16xf32>, vector<16x16xf32>, vector<6x16xf32> -> vector<6x16xf32>
    %186 = vector.broadcast %22 : vector<1x16xf32> to vector<6x16xf32>
    %187 = arith.addf %185, %186 : vector<6x16xf32>
    %cst_167 = arith.constant 0.000000e+00 : f32
    %188 = vector.broadcast %cst_167 : f32 to vector<6x16xf32>
    %189 = arith.maximumf %187, %188 : vector<6x16xf32>
    %cst_168 = arith.constant dense<0.000000e+00> : vector<6x8xf32>
    %190 = tpu.matmul %189, %23, %cst_168 {dimension_numbers = #tpu.dot_dimension_numbers<[1], [0], [0], [1], [0, 0, 1, 1], [], []>} : vector<6x16xf32>, vector<16x8xf32>, vector<6x8xf32> -> vector<6x8xf32>
    %191 = vector.broadcast %24 : vector<1x8xf32> to vector<6x8xf32>
    %192 = arith.addf %190, %191 : vector<6x8xf32>
    %cst_169 = arith.constant dense<0.000000e+00> : vector<32x8xf32>
    %193 = tpu.matmul %50, %128, %cst_169 {dimension_numbers = #tpu.dot_dimension_numbers<[1], [0], [0], [1], [0, 0, 1, 1], [], []>} : vector<32x6xf32>, vector<6x8xf32>, vector<32x8xf32> -> vector<32x8xf32>
    %c0_170 = arith.constant 0 : index
    %c0_171 = arith.constant 0 : index
    %194 = vector.load %arg9[%c0_170, %c0_171] : memref<32x6xf32, #tpu.memory_space<vmem>>, vector<32x6xf32>
    %cst_172 = arith.constant dense<0.000000e+00> : vector<32x8xf32>
    %195 = tpu.matmul %194, %128, %cst_172 {dimension_numbers = #tpu.dot_dimension_numbers<[1], [0], [0], [1], [0, 0, 1, 1], [], []>} : vector<32x6xf32>, vector<6x8xf32>, vector<32x8xf32> -> vector<32x8xf32>
    %c0_173 = arith.constant 0 : index
    %c0_174 = arith.constant 0 : index
    %196 = vector.load %arg10[%c0_173, %c0_174] : memref<32x6xf32, #tpu.memory_space<vmem>>, vector<32x6xf32>
    %cst_175 = arith.constant dense<0.000000e+00> : vector<32x8xf32>
    %197 = tpu.matmul %196, %128, %cst_175 {dimension_numbers = #tpu.dot_dimension_numbers<[1], [0], [0], [1], [0, 0, 1, 1], [], []>} : vector<32x6xf32>, vector<6x8xf32>, vector<32x8xf32> -> vector<32x8xf32>
    %cst_176 = arith.constant dense<0.000000e+00> : vector<32x16xf32>
    %198 = tpu.matmul %193, %10, %cst_176 {dimension_numbers = #tpu.dot_dimension_numbers<[1], [0], [0], [1], [0, 0, 1, 1], [], []>} : vector<32x8xf32>, vector<8x16xf32>, vector<32x16xf32> -> vector<32x16xf32>
    %cst_177 = arith.constant dense<0.000000e+00> : vector<32x16xf32>
    %199 = tpu.matmul %195, %11, %cst_177 {dimension_numbers = #tpu.dot_dimension_numbers<[1], [0], [0], [1], [0, 0, 1, 1], [], []>} : vector<32x8xf32>, vector<8x16xf32>, vector<32x16xf32> -> vector<32x16xf32>
    %200 = arith.addf %198, %199 : vector<32x16xf32>
    %cst_178 = arith.constant dense<0.000000e+00> : vector<32x16xf32>
    %201 = tpu.matmul %197, %12, %cst_178 {dimension_numbers = #tpu.dot_dimension_numbers<[1], [0], [0], [1], [0, 0, 1, 1], [], []>} : vector<32x8xf32>, vector<8x16xf32>, vector<32x16xf32> -> vector<32x16xf32>
    %202 = arith.addf %200, %201 : vector<32x16xf32>
    %203 = vector.broadcast %13 : vector<1x16xf32> to vector<32x16xf32>
    %204 = arith.addf %202, %203 : vector<32x16xf32>
    %cst_179 = arith.constant 0.000000e+00 : f32
    %205 = vector.broadcast %cst_179 : f32 to vector<32x16xf32>
    %206 = arith.maximumf %204, %205 : vector<32x16xf32>
    %cst_180 = arith.constant dense<0.000000e+00> : vector<32x16xf32>
    %207 = tpu.matmul %206, %14, %cst_180 {dimension_numbers = #tpu.dot_dimension_numbers<[1], [0], [0], [1], [0, 0, 1, 1], [], []>} : vector<32x16xf32>, vector<16x16xf32>, vector<32x16xf32> -> vector<32x16xf32>
    %208 = vector.broadcast %15 : vector<1x16xf32> to vector<32x16xf32>
    %209 = arith.addf %207, %208 : vector<32x16xf32>
    %cst_181 = arith.constant 0.000000e+00 : f32
    %210 = vector.broadcast %cst_181 : f32 to vector<32x16xf32>
    %211 = arith.maximumf %209, %210 : vector<32x16xf32>
    %cst_182 = arith.constant dense<0.000000e+00> : vector<32x64xf32>
    %212 = tpu.matmul %211, %16, %cst_182 {dimension_numbers = #tpu.dot_dimension_numbers<[1], [0], [0], [1], [0, 0, 1, 1], [], []>} : vector<32x16xf32>, vector<16x64xf32>, vector<32x64xf32> -> vector<32x64xf32>
    %213 = vector.broadcast %17 : vector<1x64xf32> to vector<32x64xf32>
    %214 = arith.addf %212, %213 : vector<32x64xf32>
    %215 = vector.extract_strided_slice %214 {offsets = [0, 0], sizes = [16, 64], strides = [1, 1]} : vector<32x64xf32> to vector<16x64xf32>
    %216 = vector.extract_strided_slice %214 {offsets = [16, 0], sizes = [16, 64], strides = [1, 1]} : vector<32x64xf32> to vector<16x64xf32>
    %cst_183 = arith.constant dense<0.000000e+00> : vector<32x8xf32>
    %217 = tpu.matmul %50, %175, %cst_183 {dimension_numbers = #tpu.dot_dimension_numbers<[1], [0], [0], [1], [0, 0, 1, 1], [], []>} : vector<32x6xf32>, vector<6x8xf32>, vector<32x8xf32> -> vector<32x8xf32>
    %218 = vector.extract_strided_slice %217 {offsets = [0, 0], sizes = [16, 8], strides = [1, 1]} : vector<32x8xf32> to vector<16x8xf32>
    %219 = vector.extract_strided_slice %217 {offsets = [16, 0], sizes = [16, 8], strides = [1, 1]} : vector<32x8xf32> to vector<16x8xf32>
    %c0_184 = arith.constant 0 : index
    %c0_185 = arith.constant 0 : index
    %220 = vector.load %arg16[%c0_184, %c0_185] : memref<8x64xf32, #tpu.memory_space<vmem>>, vector<8x64xf32>
    %cst_186 = arith.constant dense<0.000000e+00> : vector<16x64xf32>
    %221 = tpu.matmul %218, %220, %cst_186 {dimension_numbers = #tpu.dot_dimension_numbers<[1], [0], [0], [1], [0, 0, 1, 1], [], []>} : vector<16x8xf32>, vector<8x64xf32>, vector<16x64xf32> -> vector<16x64xf32>
    %222 = arith.mulf %215, %221 : vector<16x64xf32>
    %c0_187 = arith.constant 0 : index
    %c0_188 = arith.constant 0 : index
    %223 = vector.load %arg18[%c0_187, %c0_188] : memref<64x8xf32, #tpu.memory_space<vmem>>, vector<64x8xf32>
    %cst_189 = arith.constant dense<0.000000e+00> : vector<16x8xf32>
    %224 = tpu.matmul %222, %223, %cst_189 {dimension_numbers = #tpu.dot_dimension_numbers<[1], [0], [0], [1], [0, 0, 1, 1], [], []>} : vector<16x64xf32>, vector<64x8xf32>, vector<16x8xf32> -> vector<16x8xf32>
    %c0_190 = arith.constant 0 : index
    %c0_191 = arith.constant 0 : index
    %225 = vector.load %arg17[%c0_190, %c0_191] : memref<8x64xf32, #tpu.memory_space<vmem>>, vector<8x64xf32>
    %cst_192 = arith.constant dense<0.000000e+00> : vector<16x64xf32>
    %226 = tpu.matmul %218, %225, %cst_192 {dimension_numbers = #tpu.dot_dimension_numbers<[1], [0], [0], [1], [0, 0, 1, 1], [], []>} : vector<16x8xf32>, vector<8x64xf32>, vector<16x64xf32> -> vector<16x64xf32>
    %227 = arith.mulf %216, %226 : vector<16x64xf32>
    %c0_193 = arith.constant 0 : index
    %c0_194 = arith.constant 0 : index
    %228 = vector.load %arg19[%c0_193, %c0_194] : memref<64x8xf32, #tpu.memory_space<vmem>>, vector<64x8xf32>
    %cst_195 = arith.constant dense<0.000000e+00> : vector<16x8xf32>
    %229 = tpu.matmul %227, %228, %cst_195 {dimension_numbers = #tpu.dot_dimension_numbers<[1], [0], [0], [1], [0, 0, 1, 1], [], []>} : vector<16x64xf32>, vector<64x8xf32>, vector<16x8xf32> -> vector<16x8xf32>
    %230 = arith.addf %224, %229 : vector<16x8xf32>
    %cst_196 = arith.constant 5.000000e-01 : f32
    %231 = vector.broadcast %cst_196 : f32 to vector<16x8xf32>
    %232 = arith.mulf %231, %230 : vector<16x8xf32>
    %cst_197 = arith.constant dense<0.000000e+00> : vector<6x8xf32>
    %233 = tpu.matmul %51, %232, %cst_197 {dimension_numbers = #tpu.dot_dimension_numbers<[1], [0], [0], [1], [0, 0, 1, 1], [], []>} : vector<6x16xf32>, vector<16x8xf32>, vector<6x8xf32> -> vector<6x8xf32>
    %c0_198 = arith.constant 0 : index
    %c0_199 = arith.constant 0 : index
    %234 = vector.load %arg14[%c0_198, %c0_199] : memref<6x1xf32, #tpu.memory_space<vmem>>, vector<6x1xf32>
    %235 = vector.broadcast %234 : vector<6x1xf32> to vector<6x8xf32>
    %236 = arith.mulf %235, %233 : vector<6x8xf32>
    %cst_200 = arith.constant dense<0.000000e+00> : vector<2x8xf32>
    %237 = tpu.matmul %52, %236, %cst_200 {dimension_numbers = #tpu.dot_dimension_numbers<[1], [0], [0], [1], [0, 0, 1, 1], [], []>} : vector<2x6xf32>, vector<6x8xf32>, vector<2x8xf32> -> vector<2x8xf32>
    %238 = vector.broadcast %234 : vector<6x1xf32> to vector<6x8xf32>
    %239 = arith.mulf %238, %192 : vector<6x8xf32>
    %cst_201 = arith.constant dense<0.000000e+00> : vector<2x8xf32>
    %240 = tpu.matmul %52, %239, %cst_201 {dimension_numbers = #tpu.dot_dimension_numbers<[1], [0], [0], [1], [0, 0, 1, 1], [], []>} : vector<2x6xf32>, vector<6x8xf32>, vector<2x8xf32> -> vector<2x8xf32>
    %cst_202 = arith.constant 1.000000e+00 : f32
    %241 = vector.broadcast %cst_202 : f32 to vector<6x1xf32>
    %242 = arith.subf %241, %234 : vector<6x1xf32>
    %243 = arith.mulf %192, %175 : vector<6x8xf32>
    %244 = vector.broadcast %242 : vector<6x1xf32> to vector<6x8xf32>
    %245 = arith.mulf %244, %243 : vector<6x8xf32>
    %cst_203 = arith.constant dense<0.000000e+00> : vector<2x8xf32>
    %246 = tpu.matmul %52, %245, %cst_203 {dimension_numbers = #tpu.dot_dimension_numbers<[1], [0], [0], [1], [0, 0, 1, 1], [], []>} : vector<2x6xf32>, vector<6x8xf32>, vector<2x8xf32> -> vector<2x8xf32>
    %cst_204 = arith.constant dense<0.000000e+00> : vector<2xf32>
    %247 = vector.multi_reduction <add>, %246, %cst_204 [1] : vector<2x8xf32> to vector<2xf32>
    %248 = vector.shape_cast %247 : vector<2xf32> to vector<2x1xf32>
    %c0_205 = arith.constant 0 : index
    %c0_206 = arith.constant 0 : index
    %249 = vector.load %arg13[%c0_205, %c0_206] : memref<2x16xf32, #tpu.memory_space<vmem>>, vector<2x16xf32>
    %c0_207 = arith.constant 0 : index
    %c0_208 = arith.constant 0 : index
    %250 = vector.load %arg15[%c0_207, %c0_208] : memref<16x1xf32, #tpu.memory_space<vmem>>, vector<16x1xf32>
    %251 = arith.mulf %232, %219 : vector<16x8xf32>
    %252 = vector.broadcast %250 : vector<16x1xf32> to vector<16x8xf32>
    %253 = arith.mulf %252, %251 : vector<16x8xf32>
    %cst_209 = arith.constant dense<0.000000e+00> : vector<2x8xf32>
    %254 = tpu.matmul %249, %253, %cst_209 {dimension_numbers = #tpu.dot_dimension_numbers<[1], [0], [0], [1], [0, 0, 1, 1], [], []>} : vector<2x16xf32>, vector<16x8xf32>, vector<2x8xf32> -> vector<2x8xf32>
    %cst_210 = arith.constant dense<0.000000e+00> : vector<2xf32>
    %255 = vector.multi_reduction <add>, %254, %cst_210 [1] : vector<2x8xf32> to vector<2xf32>
    %256 = vector.shape_cast %255 : vector<2xf32> to vector<2x1xf32>
    %257 = vector.broadcast %256 : vector<2x1xf32> to vector<2x8xf32>
    %258 = arith.addf %237, %257 : vector<2x8xf32>
    %259 = vector.broadcast %248 : vector<2x1xf32> to vector<2x8xf32>
    %260 = arith.addf %259, %240 : vector<2x8xf32>
    %261 = arith.addf %258, %260 : vector<2x8xf32>
    %c0_211 = arith.constant 0 : index
    %c0_212 = arith.constant 0 : index
    %262 = vector.load %arg69[%c0_211, %c0_212] : memref<2x8xf32, #tpu.memory_space<vmem>>, vector<2x8xf32>
    tpu.vector_store %arg69[%c0_211, %c0_212], %261 {strides = array<i32>} : memref<2x8xf32, #tpu.memory_space<vmem>>, vector<2x8xf32>,
    return
  }
}

</mosaic_0001>

<bundles_post_ra>
// kernel: tpu_custom_call.1
= control target key start
LH: loop header
LB: loop body
LE: loop exit
PB: predicated region body
PF: predicated region fallthrough
CT: control target
= control target key end

     0   :  { %s6322_s6 = smov 1   ;;  %s6323_s10 = smov 2   ;;  %s7307_s0 = inlined_call_operand.smem [shape: u32[75], index: -1, kind: input, shape index: {}] }
   0x1   :  { %s6441_s5 = sld [smem:[%s7307_s0]]   ;;  %s6324_s14 = smov 3  }
   0x2   :  { %s6446_s9 = sld [smem:[%s7307_s0 + %s6322_s6]]   ;;  %s6325_s18 = smov 4  }
   0x3   :  { %s6451_s13 = sld [smem:[%s7307_s0 + %s6323_s10]]   ;;  %s6326_s22 = smov 5  }
   0x4   :  { %s6456_s17 = sld [smem:[%s7307_s0 + %s6324_s14]]   ;;  %s6327_s26 = smov 6  }
   0x5   :  { %s6461_s21 = sld [smem:[%s7307_s0 + %s6325_s18]]   ;;  %s6328_s30 = smov 7  }
   0x6   :  { %s6466_s25 = sld [smem:[%s7307_s0 + %s6326_s22]]   ;;  %s6329_s4 = smov 8  }
   0x7   :  { %7341 = sst [smem:[#allocation62_spill]] %s6441_s5  ;;  %s6330_s10 = smov 9  }
   0x8   :  { %7342 = sst [smem:[#allocation63_spill]] %s6446_s9  ;;  %s6331_s15 = smov 10  }
   0x9   :  { %7343 = sst [smem:[#allocation64_spill]] %s6451_s13  ;;  %s6332_s20 = smov 11  }
   0xa   :  { %7344 = sst [smem:[#allocation65_spill]] %s6456_s17  ;;  %s6334_s1 = smov 13  }
   0xb   :  { %7345 = sst [smem:[#allocation66_spill]] %s6461_s21  ;;  %s6335_s7 = smov 14  }
   0xc   :  { %7346 = sst [smem:[#allocation67_spill]] %s6466_s25  ;;  %s6337_s22 = smov 16  }
   0xd   :  { %s6471_s29 = sld [smem:[%s7307_s0 + %s6327_s26]]   ;;  %s6333_s26 = smov 12  }
   0xe   :  { %s6476_s3 = sld [smem:[%s7307_s0 + %s6328_s30]]   ;;  %s6338_s28 = smov 17  }
   0xf   :  { %s6481_s8 = sld [smem:[%s7307_s0 + %s6329_s4]]  }
  0x10   :  { %s6486_s14 = sld [smem:[%s7307_s0 + %s6330_s10]]  }
  0x11   :  { %s6491_s19 = sld [smem:[%s7307_s0 + %s6331_s15]]   ;;  %s6336_s15 = smov 15  }
  0x12   :  { %s6496_s24 = sld [smem:[%s7307_s0 + %s6332_s20]]  }
  0x13   :  { %7347 = sst [smem:[#allocation68_spill]] %s6471_s29 }
  0x14   :  { %7348 = sst [smem:[#allocation69_spill]] %s6476_s3 }
  0x15   :  { %7349 = sst [smem:[#allocation70_spill]] %s6481_s8 }
  0x16   :  { %7350 = sst [smem:[#allocation71_spill]] %s6486_s14 }
  0x17   :  { %7351 = sst [smem:[#allocation72_spill]] %s6491_s19 }
  0x18   :  { %7352 = sst [smem:[#allocation73_spill]] %s6496_s24 }
  0x19   :  { %s6501_s30 = sld [smem:[%s7307_s0 + %s6333_s26]]  }
  0x1a   :  { %s6506_s6 = sld [smem:[%s7307_s0 + %s6334_s1]]  }
  0x1b   :  { %s6511_s12 = sld [smem:[%s7307_s0 + %s6335_s7]]   ;;  %s6339_s7 = smov 18  }
  0x1c   :  { %s6516_s20 = sld [smem:[%s7307_s0 + %s6336_s15]]   ;;  %s6340_s15 = smov 19  }
  0x1d   :  { %s6521_s27 = sld [smem:[%s7307_s0 + %s6337_s22]]   ;;  %s6341_s22 = smov 20  }
  0x1e   :  { %s6526_s4 = sld [smem:[%s7307_s0 + %s6338_s28]]   ;;  %s6342_s28 = smov 21  }
  0x1f   :  { %s6531_s14 = sld [smem:[%s7307_s0 + %s6339_s7]]   ;;  %s6343_s7 = smov 22  }
  0x21   :  { %7353 = sst [smem:[#allocation74_spill]] %s6511_s12 }
  0x22   :  { %7354 = sst [smem:[#allocation75_spill]] %s6516_s20 }
  0x23   :  { %7355 = sst [smem:[#allocation76_spill]] %s6521_s27 }
  0x24   :  { %7356 = sst [smem:[#allocation77_spill]] %s6526_s4 }
  0x25   :  { %7357 = sst [smem:[#allocation78_spill]] %s6531_s14 }
  0x26   :  { %s6536_s20 = sld [smem:[%s7307_s0 + %s6340_s15]]   ;;  %s6344_s15 = smov 23  }
  0x27   :  { %s6541_s27 = sld [smem:[%s7307_s0 + %s6341_s22]]   ;;  %s6345_s22 = smov 24  }
  0x28   :  { %s6546_s4 = sld [smem:[%s7307_s0 + %s6342_s28]]   ;;  %s6346_s28 = smov 25  }
  0x29   :  { %s6551_s14 = sld [smem:[%s7307_s0 + %s6343_s7]]   ;;  %s6347_s7 = smov 26  }
  0x2a   :  { %s6561_s19 = sld [smem:[%s7307_s0 + %s6345_s22]]   ;;  %s6349_s22 = smov 28  }
  0x2b   :  { %s6566_s12 = sld [smem:[%s7307_s0 + %s6346_s28]]   ;;  %s6350_s28 = smov 29  }
  0x2c   :  { %7358 = sst [smem:[#allocation79_spill]] %s6536_s20 }
  0x2d   :  { %7359 = sst [smem:[#allocation80_spill]] %s6541_s27 }
  0x2e   :  { %7360 = sst [smem:[#allocation81_spill]] %s6546_s4 }
  0x2f   :  { %s6556_s20 = sld [smem:[%s7307_s0 + %s6344_s15]]   ;;  %s6348_s15 = smov 27  }
  0x30   :  { %s6571_s3 = sld [smem:[%s7307_s0 + %s6347_s7]]   ;;  %s6351_s7 = smov 30  }
  0x31   :  { %7362 = sst [smem:[#allocation83_spill]] %s6566_s12 }
  0x32   :  { %s6576_s24 = sld [smem:[%s7307_s0 + %s6348_s15]]   ;;  %s6352_s15 = smov 31  }
  0x33   :  { %s6581_s8 = sld [smem:[%s7307_s0 + %s6349_s22]]   ;;  %s6353_s22 = smov 32  }
  0x34   :  { %s6586_s17 = sld [smem:[%s7307_s0 + %s6350_s28]]   ;;  %s6354_s28 = smov 33  }
  0x35   :  { %7361 = sst [smem:[#allocation82_spill]] %s6556_s20 }
  0x36   :  { %7363 = sst [smem:[#allocation84_spill]] %s6571_s3 }
  0x37   :  { %s6591_s25 = sld [smem:[%s7307_s0 + %s6351_s7]]   ;;  %s6355_s7 = smov 34  }
  0x38   :  { %s6596_s21 = sld [smem:[%s7307_s0 + %s6352_s15]]   ;;  %s6356_s15 = smov 35  }
  0x39   :  { %7364 = sst [smem:[#allocation85_spill]] %s6581_s8 }
  0x3a   :  { %s6601_s8 = sld [smem:[%s7307_s0 + %s6353_s22]]   ;;  %s6357_s22 = smov 36  }
  0x3b   :  { %s6606_s12 = sld [smem:[%s7307_s0 + %s6354_s28]]   ;;  %s6358_s28 = smov 37  }
  0x3c   :  { %s6626_s13 = sld [smem:[%s7307_s0 + %s6358_s28]]   ;;  %s6362_s28 = smov 41  }
  0x3d   :  { %7365 = sst [smem:[#allocation86_spill]] %s6591_s25 }
  0x3e   :  { %7366 = sst [smem:[#allocation87_spill]] %s6596_s21 }
  0x3f   :  { %s6611_s25 = sld [smem:[%s7307_s0 + %s6355_s7]]   ;;  %s6359_s7 = smov 38  }
  0x40   :  { %7367 = sst [smem:[#allocation88_spill]] %s6601_s8 }
  0x41   :  { %s6616_s21 = sld [smem:[%s7307_s0 + %s6356_s15]]   ;;  %s6360_s15 = smov 39  }
  0x42   :  { %s6621_s8 = sld [smem:[%s7307_s0 + %s6357_s22]]   ;;  %s6361_s22 = smov 40  }
  0x43   :  { %7370 = sst [smem:[#allocation91_spill]] %s6626_s13 }
  0x44   :  { %s6636_s3 = sld [smem:[%s7307_s0 + %s6360_s15]]   ;;  %s6364_s15 = smov 43  }
  0x45   :  { %7368 = sst [smem:[#allocation89_spill]] %s6611_s25 }
  0x46   :  { %s6631_s25 = sld [smem:[%s7307_s0 + %s6359_s7]]   ;;  %s6363_s7 = smov 42  }
  0x47   :  { %s6646_s20 = sld [smem:[%s7307_s0 + %s6362_s28]]   ;;  %s6366_s28 = smov 45  }
  0x48   :  { %7369 = sst [smem:[#allocation90_spill]] %s6621_s8 }
  0x49   :  { %s6641_s8 = sld [smem:[%s7307_s0 + %s6361_s22]]   ;;  %s6365_s22 = smov 44  }
  0x4a   :  { %7372 = sst [smem:[#allocation93_spill]] %s6636_s3 }
  0x4b   :  { %s6656_s3 = sld [smem:[%s7307_s0 + %s6364_s15]]   ;;  %s6368_s15 = smov 47  }
  0x4c   :  { %7371 = sst [smem:[#allocation92_spill]] %s6631_s25 }
  0x4d   :  { %7373 = sst [smem:[#allocation94_spill]] %s6646_s20 }
  0x4e   :  { %s6651_s25 = sld [smem:[%s7307_s0 + %s6363_s7]]   ;;  %s6367_s7 = smov 46  }
  0x4f   :  { %s6661_s4 = sld [smem:[%s7307_s0 + %s6365_s22]]   ;;  %s6369_s22 = smov 48  }
  0x50   :  { %s6666_s20 = sld [smem:[%s7307_s0 + %s6366_s28]]   ;;  %s6370_s28 = smov 49  }
  0x51   :  { %7375 = sst [smem:[#allocation96_spill]] %s6656_s3 }
  0x52   :  { %s6671_s5 = sld [smem:[%s7307_s0 + %s6367_s7]]   ;;  %s6371_s7 = smov 50  }
  0x53   :  { %s6676_s3 = sld [smem:[%s7307_s0 + %s6368_s15]]   ;;  %s6372_s15 = smov 51  }
  0x54   :  { %7374 = sst [smem:[#allocation95_spill]] %s6651_s25 }
  0x55   :  { %s6681_s27 = sld [smem:[%s7307_s0 + %s6369_s22]]   ;;  %s6373_s22 = smov 52  }
  0x56   :  { %7376 = sst [smem:[#allocation97_spill]] %s6666_s20 }
  0x57   :  { %s6686_s20 = sld [smem:[%s7307_s0 + %s6370_s28]]   ;;  %s6374_s28 = smov 53  }
  0x58   :  { %7377 = sst [smem:[#allocation98_spill]] %s6671_s5 }
  0x59   :  { %7378 = sst [smem:[#allocation99_spill]] %s6676_s3 }
  0x5a   :  { %s6691_s29 = sld [smem:[%s7307_s0 + %s6371_s7]]   ;;  %s6375_s7 = smov 54  }
  0x5b   :  { %7379 = sst [smem:[#allocation100_spill]] %s6681_s27 }
  0x5c   :  { %s6696_s3 = sld [smem:[%s7307_s0 + %s6372_s15]]   ;;  %s6376_s15 = smov 55  }
  0x5d   :  { %s6701_s27 = sld [smem:[%s7307_s0 + %s6373_s22]]   ;;  %s6377_s22 = smov 56  }
  0x5e   :  { %s6706_s9 = sld [smem:[%s7307_s0 + %s6374_s28]]   ;;  %s6378_s28 = smov 57  }
  0x60   :  { %7380 = sst [smem:[#allocation101_spill]] %s6691_s29 }
  0x61   :  { %s6711_s29 = sld [smem:[%s7307_s0 + %s6375_s7]]   ;;  %s6379_s7 = smov 58  }
  0x62   :  { %7381 = sst [smem:[#allocation102_spill]] %s6696_s3 }
  0x63   :  { %7382 = sst [smem:[#allocation103_spill]] %s6701_s27 }
  0x64   :  { %7383 = sst [smem:[#allocation104_spill]] %s6706_s9 }
  0x65   :  { %s6716_s3 = sld [smem:[%s7307_s0 + %s6376_s15]]   ;;  %s6380_s15 = smov 59  }
  0x66   :  { %s6721_s27 = sld [smem:[%s7307_s0 + %s6377_s22]]   ;;  %s6381_s22 = smov 60  }
  0x67   :  { %s6726_s9 = sld [smem:[%s7307_s0 + %s6378_s28]]   ;;  %s6382_s28 = smov 61  }
  0x68   :  { %s6731_s5 = sld [smem:[%s7307_s0 + %s6379_s7]]   ;;  %s6383_s7 = smov 62  }
  0x69   :  { %s6751_s25 = sld [smem:[%s7307_s0 + %s6383_s7]]   ;;  %s6387_s7 = smov 66  }
  0x6b   :  { %7384 = sst [smem:[#allocation105_spill]] %s6716_s3 }
  0x6c   :  { %7385 = sst [smem:[#allocation106_spill]] %s6721_s27 }
  0x6d   :  { %7386 = sst [smem:[#allocation107_spill]] %s6726_s9 }
  0x6e   :  { %s6736_s3 = sld [smem:[%s7307_s0 + %s6380_s15]]   ;;  %s6384_s15 = smov 63  }
  0x6f   :  { %s6741_s27 = sld [smem:[%s7307_s0 + %s6381_s22]]   ;;  %s6385_s22 = smov 64  }
  0x70   :  { %s6746_s9 = sld [smem:[%s7307_s0 + %s6382_s28]]   ;;  %s6386_s28 = smov 65  }
  0x71   :  { %7390 = sst [smem:[#allocation111_spill]] %s6751_s25 }
  0x72   :  { %s6771_s25 = sld [smem:[%s7307_s0 + %s6387_s7]]   ;;  %s6391_s7 = smov 70  }
  0x74   :  { %7387 = sst [smem:[#allocation108_spill]] %s6736_s3 }
  0x75   :  { %7388 = sst [smem:[#allocation109_spill]] %s6741_s27 }
  0x76   :  { %7389 = sst [smem:[#allocation110_spill]] %s6746_s9 }
  0x77   :  { %s6756_s3 = sld [smem:[%s7307_s0 + %s6384_s15]]   ;;  %s6388_s15 = smov 67  }
  0x78   :  { %s6761_s27 = sld [smem:[%s7307_s0 + %s6385_s22]]   ;;  %s6389_s22 = smov 68  }
  0x79   :  { %s6766_s9 = sld [smem:[%s7307_s0 + %s6386_s28]]   ;;  %s6390_s28 = smov 69  }
  0x7a   :  { %7393 = sst [smem:[#allocation114_spill]] %s6771_s25 }
  0x7b   :  { %s6776_s13 = sld [smem:[%s7307_s0 + %s6388_s15]]   ;;  %s6392_s15 = smov 71  }
  0x7c   :  { %s6791_s25 = sld [smem:[%s7307_s0 + %s6391_s7]]   ;;  %s6395_s7 = smov 74  }
  0x7e   :  { %7391 = sst [smem:[#allocation112_spill]] %s6761_s27 }
  0x7f   :  { %7392 = sst [smem:[#allocation113_spill]] %s6766_s9 }
  0x80   :  { %s6781_s27 = sld [smem:[%s7307_s0 + %s6389_s22]]   ;;  %s6393_s22 = smov 72  }
  0x81   :  { %7394 = sst [smem:[#allocation115_spill]] %s6776_s13 }
  0x82   :  { %s6786_s9 = sld [smem:[%s7307_s0 + %s6390_s28]]   ;;  %s6394_s28 = smov 73  }
  0x83   :  { %7397 = sst [smem:[#allocation118_spill]] %s6791_s25 }
  0x84   :  { %s6796_s13 = sld [smem:[%s7307_s0 + %s6392_s15]]  }
  0x85   :  { %s6811_s25 = sld [smem:[%s7307_s0 + %s6395_s7]]  }
  0x86   :  { %7395 = sst [smem:[#allocation116_spill]] %s6781_s27 }
  0x87   :  { %s6801_s27 = sld [smem:[%s7307_s0 + %s6393_s22]]  }
  0x88   :  { %7396 = sst [smem:[#allocation117_spill]] %s6786_s9 }
  0x89   :  { %s6806_s9 = sld [smem:[%s7307_s0 + %s6394_s28]]  }
  0x8a   :  { %155 = vsyncpa [#allocation3], 0 }
  0x8b   :  { %156 = vsyncpa [#allocation6], 0 }
  0x8c   :  { %157 = vsyncpa [#allocation9], 0 }
  0x8d   :  { %158 = vsyncpa [#allocation12], 0 }
  0x8e   :  { %159 = vsyncpa [#allocation15], 0 }
  0x8f   :  { %160 = vsyncpa [#allocation18], 0 }
  0x90   :  { %161 = vsyncpa [#allocation21], 0 }
  0x91   :  { %162 = vsyncpa [#allocation24], 0 }
  0x92   :  { %163 = vsyncpa [#allocation27], 0 }
  0x93   :  { %164 = vsyncpa [#allocation30], 0 }
  0x94   :  { %165 = vsyncpa [#allocation33], 0 }
  0x95   :  { %166 = vsyncpa [#allocation36], 0 }
  0x96   :  { %167 = vsyncpa [#allocation4], 0 }
  0x97   :  { %168 = vsyncpa [#allocation39], 0 }
  0x98   :  { %169 = vsyncpa [#allocation42], 0 }
  0x99   :  { %170 = vsyncpa [#allocation45], 0  ;;  %s6396_s0 = smov [#allocation5]   ;;  %s6397_s16 = smov [#allocation8]  }
  0x9a   :  { %s211_s15 = sshll.u32 %s6396_s0, 4  ;;  %s249_s18 = sshll.u32 %s6397_s16, 4  ;;  %s212_s15 = int_to_ptr.vmem [resolvable:$true] %s211_s15  ;;  %s250_s18 = int_to_ptr.vmem [resolvable:$true] %s249_s18 }
  0x9b   :  { %s5674_s22 = scalar_lea.hbm %s6506_s6, 32 }
  0x9c   :  { %p5675_p0 = scmp.ne.s32.totalorder %s6506_s6, %s5674_s22  ;;  %p5678_p1 = scmp.lt.u32.totalorder %s5674_s22, %s6506_s6 }
  0x9e   :  { %p5680_p2 = pnand %p5678_p1, %p5675_p0 }
  0xa0   :  { %5683 = shalt.err (!%p5680_p2)
}
  0xa1   :  { %s5684_s23 = scalar_lea.vmem %s212_s15, 32  ;;  %p5689_p4 = scmp.lt.s32.totalorder %s212_s15, %s212_s15 }
  0xa2   :  { %p5685_p3 = scmp.ne.s32.totalorder %s212_s15, %s5684_s23  ;;  %p5690_p5 = scmp.lt.s32.totalorder %s5684_s23, %s5684_s23 }
  0xa4   :  { %p5691_p6 = por %p5690_p5, %p5689_p4 }
  0xa6   :  { %p5692_p7 = pnand %p5691_p6, %p5685_p3 }
  0xa8   :  { %5695 = shalt.err (!%p5692_p7)
}
  0xa9   :  { %214 = dma.hbm_to_vmem [thread:$0]  %s6506_s6, 32, %s212_s15, [#allocation6]  }
  0xaa   :  { %s5696_s26 = scalar_lea.hbm %s6561_s19, 16 }
  0xab   :  { %p5697_p8 = scmp.ne.s32.totalorder %s6561_s19, %s5696_s26  ;;  %p5700_p9 = scmp.lt.u32.totalorder %s5696_s26, %s6561_s19 }
  0xad   :  { %p5702_p10 = pnand %p5700_p9, %p5697_p8 }
  0xaf   :  { %5705 = shalt.err (!%p5702_p10)
}
  0xb0   :  { %s5706_s28 = scalar_lea.vmem %s250_s18, 16  ;;  %s5710_s1 = scalar_lea.vmem %s250_s18, 32 }
  0xb1   :  { %p5707_p11 = scmp.ne.s32.totalorder %s250_s18, %s5706_s28  ;;  %p5711_p12 = scmp.lt.s32.totalorder %s250_s18, %s250_s18 }
  0xb2   :  { %p5712_p13 = scmp.lt.s32.totalorder %s5710_s1, %s5706_s28 }
  0xb4   :  { %p5713_p0 = por %p5712_p13, %p5711_p12 }
  0xb6   :  { %p5714_p1 = pnand %p5713_p0, %p5707_p11 }
  0xb8   :  { %5717 = shalt.err (!%p5714_p1)
}
  0xb9   :  { %252 = dma.hbm_to_vmem [thread:$0]  %s6561_s19, 16, %s250_s18, [#allocation9]  }
  0xba   :  { %s6398_s2 = smov [#allocation11]   ;;  %s6399_s7 = smov [#allocation14]  }
  0xbb   :  { %s275_s6 = sshll.u32 %s6398_s2, 4  ;;  %s303_s10 = sshll.u32 %s6399_s7, 4  ;;  %s276_s6 = int_to_ptr.vmem [resolvable:$true] %s275_s6  ;;  %s304_s10 = int_to_ptr.vmem [resolvable:$true] %s303_s10 }
  0xbc   :  { %s5718_s11 = scalar_lea.hbm %s6586_s17, 16 }
  0xbd   :  { %p5719_p2 = scmp.ne.s32.totalorder %s6586_s17, %s5718_s11  ;;  %p5722_p3 = scmp.lt.u32.totalorder %s5718_s11, %s6586_s17 }
  0xbf   :  { %p5724_p4 = pnand %p5722_p3, %p5719_p2 }
  0xc1   :  { %5727 = shalt.err (!%p5724_p4)
}
  0xc2   :  { %s5728_s0 = scalar_lea.vmem %s276_s6, 16  ;;  %s5732_s15 = scalar_lea.vmem %s276_s6, 32 }
  0xc3   :  { %p5729_p5 = scmp.ne.s32.totalorder %s276_s6, %s5728_s0  ;;  %p5733_p6 = scmp.lt.s32.totalorder %s276_s6, %s276_s6 }
  0xc4   :  { %p5734_p7 = scmp.lt.s32.totalorder %s5732_s15, %s5728_s0 }
  0xc6   :  { %p5735_p8 = por %p5734_p7, %p5733_p6 }
  0xc8   :  { %p5736_p9 = pnand %p5735_p8, %p5729_p5 }
  0xca   :  { %5739 = shalt.err (!%p5736_p9)
}
  0xcb   :  { %278 = dma.hbm_to_vmem [thread:$0]  %s6586_s17, 16, %s276_s6, [#allocation12]  }
  0xcc   :  { %s5740_s19 = scalar_lea.hbm %s6616_s21, 16 }
  0xcd   :  { %p5741_p10 = scmp.ne.s32.totalorder %s6616_s21, %s5740_s19  ;;  %p5744_p11 = scmp.lt.u32.totalorder %s5740_s19, %s6616_s21 }
  0xcf   :  { %p5746_p12 = pnand %p5744_p11, %p5741_p10 }
  0xd1   :  { %5749 = shalt.err (!%p5746_p12)
}
  0xd2   :  { %s5750_s16 = scalar_lea.vmem %s304_s10, 16  ;;  %s5754_s18 = scalar_lea.vmem %s304_s10, 32 }
  0xd3   :  { %p5751_p13 = scmp.ne.s32.totalorder %s304_s10, %s5750_s16  ;;  %p5755_p0 = scmp.lt.s32.totalorder %s304_s10, %s304_s10 }
  0xd4   :  { %p5756_p1 = scmp.lt.s32.totalorder %s5754_s18, %s5750_s16 }
  0xd6   :  { %p5757_p2 = por %p5756_p1, %p5755_p0 }
  0xd8   :  { %p5758_p3 = pnand %p5757_p2, %p5751_p13 }
  0xda   :  { %5761 = shalt.err (!%p5758_p3)
}
  0xdb   :  { %306 = dma.hbm_to_vmem [thread:$0]  %s6616_s21, 16, %s304_s10, [#allocation15]  }
  0xdc   :  { %s6400_s22 = smov [#allocation17]   ;;  %s6401_s23 = smov [#allocation20]  }
  0xdd   :  { %s329_s17 = sshll.u32 %s6400_s22, 4  ;;  %s353_s26 = sshll.u32 %s6401_s23, 4  ;;  %s330_s17 = int_to_ptr.vmem [resolvable:$true] %s329_s17  ;;  %s354_s26 = int_to_ptr.vmem [resolvable:$true] %s353_s26 }
  0xde   :  { %s5762_s28 = scalar_lea.hbm %s6641_s8, 16 }
  0xdf   :  { %p5763_p4 = scmp.ne.s32.totalorder %s6641_s8, %s5762_s28  ;;  %p5766_p5 = scmp.lt.u32.totalorder %s5762_s28, %s6641_s8 }
  0xe1   :  { %p5768_p6 = pnand %p5766_p5, %p5763_p4 }
  0xe3   :  { %5771 = shalt.err (!%p5768_p6)
}
  0xe4   :  { %s5772_s1 = scalar_lea.vmem %s330_s17, 16  ;;  %s5776_s2 = scalar_lea.vmem %s330_s17, 32 }
  0xe5   :  { %p5773_p7 = scmp.ne.s32.totalorder %s330_s17, %s5772_s1  ;;  %p5777_p8 = scmp.lt.s32.totalorder %s330_s17, %s330_s17 }
  0xe6   :  { %p5778_p9 = scmp.lt.s32.totalorder %s5776_s2, %s5772_s1 }
  0xe8   :  { %p5779_p10 = por %p5778_p9, %p5777_p8 }
  0xea   :  { %p5780_p11 = pnand %p5779_p10, %p5773_p7 }
  0xec   :  { %5783 = shalt.err (!%p5780_p11)
}
  0xed   :  { %332 = dma.hbm_to_vmem [thread:$0]  %s6641_s8, 16, %s330_s17, [#allocation18]  }
  0xee   :  { %s5784_s21 = scalar_lea.hbm %s6661_s4, 16 }
  0xef   :  { %p5785_p12 = scmp.ne.s32.totalorder %s6661_s4, %s5784_s21  ;;  %p5788_p13 = scmp.lt.u32.totalorder %s5784_s21, %s6661_s4 }
  0xf1   :  { %p5790_p0 = pnand %p5788_p13, %p5785_p12 }
  0xf3   :  { %5793 = shalt.err (!%p5790_p0)
}
  0xf4   :  { %s5794_s6 = scalar_lea.vmem %s354_s26, 16  ;;  %s5798_s7 = scalar_lea.vmem %s354_s26, 32 }
  0xf5   :  { %p5795_p1 = scmp.ne.s32.totalorder %s354_s26, %s5794_s6  ;;  %p5799_p2 = scmp.lt.s32.totalorder %s354_s26, %s354_s26 }
  0xf6   :  { %p5800_p3 = scmp.lt.s32.totalorder %s5798_s7, %s5794_s6 }
  0xf8   :  { %p5801_p4 = por %p5800_p3, %p5799_p2 }
  0xfa   :  { %p5802_p5 = pnand %p5801_p4, %p5795_p1 }
  0xfc   :  { %5805 = shalt.err (!%p5802_p5)
}
  0xfd   :  { %356 = dma.hbm_to_vmem [thread:$0]  %s6661_s4, 16, %s354_s26, [#allocation21]  }
  0xfe   :  { %s6402_s10 = smov [#allocation23]   ;;  %s6403_s11 = smov [#allocation26]  }
  0xff   :  { %s379_s8 = sshll.u32 %s6402_s10, 4  ;;  %s405_s0 = sshll.u32 %s6403_s11, 4  ;;  %s380_s8 = int_to_ptr.vmem [resolvable:$true] %s379_s8  ;;  %s406_s0 = int_to_ptr.vmem [resolvable:$true] %s405_s0 }
 0x100   :  { %s5806_s15 = scalar_lea.hbm %s6686_s20, 16 }
 0x101   :  { %p5807_p6 = scmp.ne.s32.totalorder %s6686_s20, %s5806_s15  ;;  %p5810_p7 = scmp.lt.u32.totalorder %s5806_s15, %s6686_s20 }
 0x103   :  { %p5812_p8 = pnand %p5810_p7, %p5807_p6 }
 0x105   :  { %5815 = shalt.err (!%p5812_p8)
}
 0x106   :  { %s5816_s19 = scalar_lea.vmem %s380_s8, 16  ;;  %s5820_s16 = scalar_lea.vmem %s380_s8, 32 }
 0x107   :  { %p5817_p9 = scmp.ne.s32.totalorder %s380_s8, %s5816_s19  ;;  %p5821_p10 = scmp.lt.s32.totalorder %s380_s8, %s380_s8 }
 0x108   :  { %p5822_p11 = scmp.lt.s32.totalorder %s5820_s16, %s5816_s19 }
 0x10a   :  { %p5823_p12 = por %p5822_p11, %p5821_p10 }
 0x10c   :  { %p5824_p13 = pnand %p5823_p12, %p5817_p9 }
 0x10e   :  { %5827 = shalt.err (!%p5824_p13)
}
 0x10f   :  { %382 = dma.hbm_to_vmem [thread:$0]  %s6686_s20, 16, %s380_s8, [#allocation24]  }
 0x110   :  { %s5828_s4 = scalar_lea.hbm %s6711_s29, 16 }
 0x111   :  { %p5829_p0 = scmp.ne.s32.totalorder %s6711_s29, %s5828_s4  ;;  %p5832_p1 = scmp.lt.u32.totalorder %s5828_s4, %s6711_s29 }
 0x113   :  { %p5834_p2 = pnand %p5832_p1, %p5829_p0 }
 0x115   :  { %5837 = shalt.err (!%p5834_p2)
}
 0x116   :  { %s5838_s18 = scalar_lea.vmem %s406_s0, 16  ;;  %s5842_s22 = scalar_lea.vmem %s406_s0, 32 }
 0x117   :  { %p5839_p3 = scmp.ne.s32.totalorder %s406_s0, %s5838_s18  ;;  %p5843_p4 = scmp.lt.s32.totalorder %s406_s0, %s406_s0 }
 0x118   :  { %p5844_p5 = scmp.lt.s32.totalorder %s5842_s22, %s5838_s18 }
 0x11a   :  { %p5845_p6 = por %p5844_p5, %p5843_p4 }
 0x11c   :  { %p5846_p7 = pnand %p5845_p6, %p5839_p3 }
 0x11e   :  { %5849 = shalt.err (!%p5846_p7)
}
 0x11f   :  { %408 = dma.hbm_to_vmem [thread:$0]  %s6711_s29, 16, %s406_s0, [#allocation27]  }
 0x120   :  { %s6404_s17 = smov [#allocation29]   ;;  %s6405_s23 = smov [#allocation32]  }
 0x121   :  { %s429_s20 = sshll.u32 %s6404_s17, 4  ;;  %s455_s26 = sshll.u32 %s6405_s23, 4  ;;  %s430_s20 = int_to_ptr.vmem [resolvable:$true] %s429_s20  ;;  %s456_s26 = int_to_ptr.vmem [resolvable:$true] %s455_s26 }
 0x122   :  { %s5850_s28 = scalar_lea.hbm %s6731_s5, 16 }
 0x123   :  { %p5851_p8 = scmp.ne.s32.totalorder %s6731_s5, %s5850_s28  ;;  %p5854_p9 = scmp.lt.u32.totalorder %s5850_s28, %s6731_s5 }
 0x125   :  { %p5856_p10 = pnand %p5854_p9, %p5851_p8 }
 0x127   :  { %5859 = shalt.err (!%p5856_p10)
}
 0x128   :  { %s5860_s1 = scalar_lea.vmem %s430_s20, 16  ;;  %s5864_s2 = scalar_lea.vmem %s430_s20, 32 }
 0x129   :  { %p5861_p11 = scmp.ne.s32.totalorder %s430_s20, %s5860_s1  ;;  %p5865_p12 = scmp.lt.s32.totalorder %s430_s20, %s430_s20 }
 0x12a   :  { %p5866_p13 = scmp.lt.s32.totalorder %s5864_s2, %s5860_s1 }
 0x12c   :  { %p5867_p0 = por %p5866_p13, %p5865_p12 }
 0x12e   :  { %p5868_p1 = pnand %p5867_p0, %p5861_p11 }
 0x130   :  { %5871 = shalt.err (!%p5868_p1)
}
 0x131   :  { %432 = dma.hbm_to_vmem [thread:$0]  %s6731_s5, 16, %s430_s20, [#allocation30]  }
 0x132   :  { %s5872_s29 = scalar_lea.hbm %s6756_s3, 16 }
 0x133   :  { %p5873_p2 = scmp.ne.s32.totalorder %s6756_s3, %s5872_s29  ;;  %p5876_p3 = scmp.lt.u32.totalorder %s5872_s29, %s6756_s3 }
 0x135   :  { %p5878_p4 = pnand %p5876_p3, %p5873_p2 }
 0x137   :  { %5881 = shalt.err (!%p5878_p4)
}
 0x138   :  { %s5882_s21 = scalar_lea.vmem %s456_s26, 16  ;;  %s5886_s6 = scalar_lea.vmem %s456_s26, 32 }
 0x139   :  { %p5883_p5 = scmp.ne.s32.totalorder %s456_s26, %s5882_s21  ;;  %p5887_p6 = scmp.lt.s32.totalorder %s456_s26, %s456_s26 }
 0x13a   :  { %p5888_p7 = scmp.lt.s32.totalorder %s5886_s6, %s5882_s21 }
 0x13c   :  { %p5889_p8 = por %p5888_p7, %p5887_p6 }
 0x13e   :  { %p5890_p9 = pnand %p5889_p8, %p5883_p5 }
 0x140   :  { %5893 = shalt.err (!%p5890_p9)
}
 0x141   :  { %458 = dma.hbm_to_vmem [thread:$0]  %s6756_s3, 16, %s456_s26, [#allocation33]  }
 0x142   :  { %s6406_s7 = smov [#allocation2]   ;;  %s6407_s10 = smov [#allocation7]  }
 0x143   :  { %s201_s5 = sshll.u32 %s6406_s7, 4  ;;  %s237_s8 = sshll.u32 %s6407_s10, 4  ;;  %s202_s5 = int_to_ptr.vmem [resolvable:$true] %s201_s5  ;;  %s238_s8 = int_to_ptr.vmem [resolvable:$true] %s237_s8 }
 0x144   :  { %s5894_s11 = scalar_lea.hbm %s6501_s30, 32 }
 0x145   :  { %p5895_p10 = scmp.ne.s32.totalorder %s6501_s30, %s5894_s11  ;;  %p5898_p11 = scmp.lt.u32.totalorder %s5894_s11, %s6501_s30 }
 0x147   :  { %p5900_p12 = pnand %p5898_p11, %p5895_p10 }
 0x149   :  { %5903 = shalt.err (!%p5900_p12)
}
 0x14a   :  { %s5904_s0 = scalar_lea.vmem %s202_s5, 32  ;;  %p5909_p0 = scmp.lt.s32.totalorder %s202_s5, %s202_s5 }
 0x14b   :  { %p5905_p13 = scmp.ne.s32.totalorder %s202_s5, %s5904_s0  ;;  %p5910_p1 = scmp.lt.s32.totalorder %s5904_s0, %s5904_s0 }
 0x14d   :  { %p5911_p2 = por %p5910_p1, %p5909_p0 }
 0x14f   :  { %p5912_p3 = pnand %p5911_p2, %p5905_p13 }
 0x151   :  { %5915 = shalt.err (!%p5912_p3)
}
 0x152   :  { %204 = dma.hbm_to_vmem [thread:$0]  %s6501_s30, 32, %s202_s5, [#allocation3]  }
 0x153   :  { %s5916_s3 = scalar_lea.hbm %s6551_s14, 16 }
 0x154   :  { %p5917_p4 = scmp.ne.s32.totalorder %s6551_s14, %s5916_s3  ;;  %p5920_p5 = scmp.lt.u32.totalorder %s5916_s3, %s6551_s14 }
 0x156   :  { %p5922_p6 = pnand %p5920_p5, %p5917_p4 }
 0x158   :  { %5925 = shalt.err (!%p5922_p6)
}
 0x159   :  { %s5926_s15 = scalar_lea.vmem %s238_s8, 16  ;;  %s5930_s19 = scalar_lea.vmem %s238_s8, 32 }
 0x15a   :  { %p5927_p7 = scmp.ne.s32.totalorder %s238_s8, %s5926_s15  ;;  %p5931_p8 = scmp.lt.s32.totalorder %s238_s8, %s238_s8 }
 0x15b   :  { %p5932_p9 = scmp.lt.s32.totalorder %s5930_s19, %s5926_s15 }
 0x15d   :  { %p5933_p10 = por %p5932_p9, %p5931_p8 }
 0x15f   :  { %p5934_p11 = pnand %p5933_p10, %p5927_p7 }
 0x161   :  { %5937 = shalt.err (!%p5934_p11)
}
 0x162   :  { %240 = dma.hbm_to_vmem [thread:$0]  %s6551_s14, 16, %s238_s8, [#allocation6]  }
 0x163   :  { %s6408_s16 = smov [#allocation10]   ;;  %s6409_s4 = smov [#allocation13]  }
 0x164   :  { %s263_s30 = sshll.u32 %s6408_s16, 4  ;;  %s291_s18 = sshll.u32 %s6409_s4, 4  ;;  %s264_s30 = int_to_ptr.vmem [resolvable:$true] %s263_s30  ;;  %s292_s18 = int_to_ptr.vmem [resolvable:$true] %s291_s18 }
 0x165   :  { %s5938_s22 = scalar_lea.hbm %s6576_s24, 16 }
 0x166   :  { %p5939_p12 = scmp.ne.s32.totalorder %s6576_s24, %s5938_s22  ;;  %p5942_p13 = scmp.lt.u32.totalorder %s5938_s22, %s6576_s24 }
 0x168   :  { %p5944_p0 = pnand %p5942_p13, %p5939_p12 }
 0x16a   :  { %5947 = shalt.err (!%p5944_p0)
}
 0x16b   :  { %s5948_s17 = scalar_lea.vmem %s264_s30, 16  ;;  %s5952_s20 = scalar_lea.vmem %s264_s30, 32 }
 0x16c   :  { %p5949_p1 = scmp.ne.s32.totalorder %s264_s30, %s5948_s17  ;;  %p5953_p2 = scmp.lt.s32.totalorder %s264_s30, %s264_s30 }
 0x16d   :  { %p5954_p3 = scmp.lt.s32.totalorder %s5952_s20, %s5948_s17 }
 0x16f   :  { %p5955_p4 = por %p5954_p3, %p5953_p2 }
 0x171   :  { %p5956_p5 = pnand %p5955_p4, %p5949_p1 }
 0x173   :  { %5959 = shalt.err (!%p5956_p5)
}
 0x174   :  { %266 = dma.hbm_to_vmem [thread:$0]  %s6576_s24, 16, %s264_s30, [#allocation9]  }
 0x175   :  { %s5960_s14 = scalar_lea.hbm %s6606_s12, 16 }
 0x176   :  { %p5961_p6 = scmp.ne.s32.totalorder %s6606_s12, %s5960_s14  ;;  %p5964_p7 = scmp.lt.u32.totalorder %s5960_s14, %s6606_s12 }
 0x178   :  { %p5966_p8 = pnand %p5964_p7, %p5961_p6 }
 0x17a   :  { %5969 = shalt.err (!%p5966_p8)
}
 0x17b   :  { %s5970_s23 = scalar_lea.vmem %s292_s18, 16  ;;  %s5974_s26 = scalar_lea.vmem %s292_s18, 32 }
 0x17c   :  { %p5971_p9 = scmp.ne.s32.totalorder %s292_s18, %s5970_s23  ;;  %p5975_p10 = scmp.lt.s32.totalorder %s292_s18, %s292_s18 }
 0x17d   :  { %p5976_p11 = scmp.lt.s32.totalorder %s5974_s26, %s5970_s23 }
 0x17f   :  { %p5977_p12 = por %p5976_p11, %p5975_p10 }
 0x181   :  { %p5978_p13 = pnand %p5977_p12, %p5971_p9 }
 0x183   :  { %5981 = shalt.err (!%p5978_p13)
}
 0x184   :  { %s7398_s28 = sld [smem:[#allocation91_spill]]  ;;  %s6410_s1 = smov [#allocation16]  }
 0x185   :  { %294 = dma.hbm_to_vmem [thread:$0]  %s6606_s12, 16, %s292_s18, [#allocation12]  }
 0x186   :  { %s315_s24 = sshll.u32 %s6410_s1, 4  ;;  %s6411_s2 = smov [#allocation19]   ;;  %s316_s24 = int_to_ptr.vmem [resolvable:$true] %s315_s24 }
 0x187   :  { %s341_s29 = sshll.u32 %s6411_s2, 4  ;;  %s342_s29 = int_to_ptr.vmem [resolvable:$true] %s341_s29 }
 0x18a   :  { %s5982_s21 = scalar_lea.hbm %s7398_s28, 16 }
 0x18b   :  { %p5983_p0 = scmp.ne.s32.totalorder %s7398_s28, %s5982_s21  ;;  %p5986_p1 = scmp.lt.u32.totalorder %s5982_s21, %s7398_s28 }
 0x18d   :  { %p5988_p2 = pnand %p5986_p1, %p5983_p0 }
 0x18f   :  { %5991 = shalt.err (!%p5988_p2)
}
 0x190   :  { %s5992_s6 = scalar_lea.vmem %s316_s24, 16  ;;  %s5996_s7 = scalar_lea.vmem %s316_s24, 32 }
 0x191   :  { %p5993_p3 = scmp.ne.s32.totalorder %s316_s24, %s5992_s6  ;;  %p5997_p4 = scmp.lt.s32.totalorder %s316_s24, %s316_s24 }
 0x192   :  { %p5998_p5 = scmp.lt.s32.totalorder %s5996_s7, %s5992_s6 }
 0x194   :  { %p5999_p6 = por %p5998_p5, %p5997_p4 }
 0x196   :  { %p6000_p7 = pnand %p5999_p6, %p5993_p3 }
 0x198   :  { %6003 = shalt.err (!%p6000_p7)
}
 0x199   :  { %s7399_s12 = sld [smem:[#allocation95_spill]] }
 0x19a   :  { %318 = dma.hbm_to_vmem [thread:$0]  %s7398_s28, 16, %s316_s24, [#allocation15]  }
 0x19f   :  { %s6004_s5 = scalar_lea.hbm %s7399_s12, 16 }
 0x1a0   :  { %p6005_p8 = scmp.ne.s32.totalorder %s7399_s12, %s6004_s5  ;;  %p6008_p9 = scmp.lt.u32.totalorder %s6004_s5, %s7399_s12 }
 0x1a2   :  { %p6010_p10 = pnand %p6008_p9, %p6005_p8 }
 0x1a4   :  { %6013 = shalt.err (!%p6010_p10)
}
 0x1a5   :  { %s6014_s10 = scalar_lea.vmem %s342_s29, 16  ;;  %s6018_s8 = scalar_lea.vmem %s342_s29, 32 }
 0x1a6   :  { %p6015_p11 = scmp.ne.s32.totalorder %s342_s29, %s6014_s10  ;;  %p6019_p12 = scmp.lt.s32.totalorder %s342_s29, %s342_s29 }
 0x1a7   :  { %p6020_p13 = scmp.lt.s32.totalorder %s6018_s8, %s6014_s10 }
 0x1a9   :  { %p6021_p0 = por %p6020_p13, %p6019_p12 }
 0x1ab   :  { %p6022_p1 = pnand %p6021_p0, %p6015_p11 }
 0x1ad   :  { %6025 = shalt.err (!%p6022_p1)
}
 0x1ae   :  { %s7400_s11 = sld [smem:[#allocation98_spill]]  ;;  %s6412_s0 = smov [#allocation22]  }
 0x1af   :  { %344 = dma.hbm_to_vmem [thread:$0]  %s7399_s12, 16, %s342_s29, [#allocation18]  }
 0x1b0   :  { %s365_s3 = sshll.u32 %s6412_s0, 4  ;;  %s6413_s15 = smov [#allocation25]   ;;  %s366_s3 = int_to_ptr.vmem [resolvable:$true] %s365_s3 }
 0x1b1   :  { %s391_s19 = sshll.u32 %s6413_s15, 4  ;;  %s392_s19 = int_to_ptr.vmem [resolvable:$true] %s391_s19 }
 0x1b4   :  { %s6026_s16 = scalar_lea.hbm %s7400_s11, 16 }
 0x1b5   :  { %p6027_p2 = scmp.ne.s32.totalorder %s7400_s11, %s6026_s16  ;;  %p6030_p3 = scmp.lt.u32.totalorder %s6026_s16, %s7400_s11 }
 0x1b7   :  { %p6032_p4 = pnand %p6030_p3, %p6027_p2 }
 0x1b9   :  { %6035 = shalt.err (!%p6032_p4)
}
 0x1ba   :  { %s6036_s30 = scalar_lea.vmem %s366_s3, 16  ;;  %s6040_s4 = scalar_lea.vmem %s366_s3, 32 }
 0x1bb   :  { %p6037_p5 = scmp.ne.s32.totalorder %s366_s3, %s6036_s30  ;;  %p6041_p6 = scmp.lt.s32.totalorder %s366_s3, %s366_s3 }
 0x1bc   :  { %p6042_p7 = scmp.lt.s32.totalorder %s6040_s4, %s6036_s30 }
 0x1be   :  { %p6043_p8 = por %p6042_p7, %p6041_p6 }
 0x1c0   :  { %p6044_p9 = pnand %p6043_p8, %p6037_p5 }
 0x1c2   :  { %6047 = shalt.err (!%p6044_p9)
}
 0x1c3   :  { %s7401_s18 = sld [smem:[#allocation102_spill]] }
 0x1c4   :  { %368 = dma.hbm_to_vmem [thread:$0]  %s7400_s11, 16, %s366_s3, [#allocation21]  }
 0x1c9   :  { %s6048_s22 = scalar_lea.hbm %s7401_s18, 16 }
 0x1ca   :  { %p6049_p10 = scmp.ne.s32.totalorder %s7401_s18, %s6048_s22  ;;  %p6052_p11 = scmp.lt.u32.totalorder %s6048_s22, %s7401_s18 }
 0x1cc   :  { %p6054_p12 = pnand %p6052_p11, %p6049_p10 }
 0x1ce   :  { %6057 = shalt.err (!%p6054_p12)
}
 0x1cf   :  { %s6058_s17 = scalar_lea.vmem %s392_s19, 16  ;;  %s6062_s20 = scalar_lea.vmem %s392_s19, 32 }
 0x1d0   :  { %p6059_p13 = scmp.ne.s32.totalorder %s392_s19, %s6058_s17  ;;  %p6063_p0 = scmp.lt.s32.totalorder %s392_s19, %s392_s19 }
 0x1d1   :  { %p6064_p1 = scmp.lt.s32.totalorder %s6062_s20, %s6058_s17 }
 0x1d3   :  { %p6065_p2 = por %p6064_p1, %p6063_p0 }
 0x1d5   :  { %p6066_p3 = pnand %p6065_p2, %p6059_p13 }
 0x1d7   :  { %6069 = shalt.err (!%p6066_p3)
}
 0x1d8   :  { %s7402_s14 = sld [smem:[#allocation106_spill]]  ;;  %s6414_s23 = smov [#allocation28]  }
 0x1d9   :  { %394 = dma.hbm_to_vmem [thread:$0]  %s7401_s18, 16, %s392_s19, [#allocation24]  }
 0x1da   :  { %s417_s26 = sshll.u32 %s6414_s23, 4  ;;  %s6415_s28 = smov [#allocation31]   ;;  %s418_s26 = int_to_ptr.vmem [resolvable:$true] %s417_s26 }
 0x1db   :  { %s443_s1 = sshll.u32 %s6415_s28, 4  ;;  %s444_s1 = int_to_ptr.vmem [resolvable:$true] %s443_s1 }
 0x1de   :  { %s6070_s24 = scalar_lea.hbm %s7402_s14, 16 }
 0x1df   :  { %p6071_p4 = scmp.ne.s32.totalorder %s7402_s14, %s6070_s24  ;;  %p6074_p5 = scmp.lt.u32.totalorder %s6070_s24, %s7402_s14 }
 0x1e1   :  { %p6076_p6 = pnand %p6074_p5, %p6071_p4 }
 0x1e3   :  { %6079 = shalt.err (!%p6076_p6)
}
 0x1e4   :  { %s6080_s2 = scalar_lea.vmem %s418_s26, 16  ;;  %s6084_s29 = scalar_lea.vmem %s418_s26, 32 }
 0x1e5   :  { %p6081_p7 = scmp.ne.s32.totalorder %s418_s26, %s6080_s2  ;;  %p6085_p8 = scmp.lt.s32.totalorder %s418_s26, %s418_s26 }
 0x1e6   :  { %p6086_p9 = scmp.lt.s32.totalorder %s6084_s29, %s6080_s2 }
 0x1e8   :  { %p6087_p10 = por %p6086_p9, %p6085_p8 }
 0x1ea   :  { %p6088_p11 = pnand %p6087_p10, %p6081_p7 }
 0x1ec   :  { %6091 = shalt.err (!%p6088_p11)
}
 0x1ed   :  { %s7403_s21 = sld [smem:[#allocation110_spill]] }
 0x1ee   :  { %420 = dma.hbm_to_vmem [thread:$0]  %s7402_s14, 16, %s418_s26, [#allocation27]  }
 0x1f3   :  { %s6092_s6 = scalar_lea.hbm %s7403_s21, 16 }
 0x1f4   :  { %p6093_p12 = scmp.ne.s32.totalorder %s7403_s21, %s6092_s6  ;;  %p6096_p13 = scmp.lt.u32.totalorder %s6092_s6, %s7403_s21 }
 0x1f6   :  { %p6098_p0 = pnand %p6096_p13, %p6093_p12 }
 0x1f8   :  { %6101 = shalt.err (!%p6098_p0)
}
 0x1f9   :  { %s6102_s7 = scalar_lea.vmem %s444_s1, 16  ;;  %s6106_s12 = scalar_lea.vmem %s444_s1, 32 }
 0x1fa   :  { %p6103_p1 = scmp.ne.s32.totalorder %s444_s1, %s6102_s7  ;;  %p6107_p2 = scmp.lt.s32.totalorder %s444_s1, %s444_s1 }
 0x1fb   :  { %p6108_p3 = scmp.lt.s32.totalorder %s6106_s12, %s6102_s7 }
 0x1fd   :  { %p6109_p4 = por %p6108_p3, %p6107_p2 }
 0x1ff   :  { %p6110_p5 = pnand %p6109_p4, %p6103_p1 }
 0x201   :  { %6113 = shalt.err (!%p6110_p5)
}
 0x202   :  { %s7404_s5 = sld [smem:[#allocation114_spill]]  ;;  %s6416_s10 = smov [#allocation34]  }
 0x203   :  { %446 = dma.hbm_to_vmem [thread:$0]  %s7403_s21, 16, %s444_s1, [#allocation30]  }
 0x204   :  { %s469_s8 = sshll.u32 %s6416_s10, 4  ;;  %s6417_s11 = smov [#allocation35]   ;;  %s470_s8 = int_to_ptr.vmem [resolvable:$true] %s469_s8 }
 0x205   :  { %s481_s0 = sshll.u32 %s6417_s11, 4  ;;  %s482_s0 = int_to_ptr.vmem [resolvable:$true] %s481_s0 }
 0x208   :  { %s6114_s3 = scalar_lea.hbm %s7404_s5, 16 }
 0x209   :  { %p6115_p6 = scmp.ne.s32.totalorder %s7404_s5, %s6114_s3  ;;  %p6118_p7 = scmp.lt.u32.totalorder %s6114_s3, %s7404_s5 }
 0x20b   :  { %p6120_p8 = pnand %p6118_p7, %p6115_p6 }
 0x20d   :  { %6123 = shalt.err (!%p6120_p8)
}
 0x20e   :  { %s6124_s15 = scalar_lea.vmem %s470_s8, 16  ;;  %s6128_s19 = scalar_lea.vmem %s470_s8, 32 }
 0x20f   :  { %p6125_p9 = scmp.ne.s32.totalorder %s470_s8, %s6124_s15  ;;  %p6129_p10 = scmp.lt.s32.totalorder %s470_s8, %s470_s8 }
 0x210   :  { %p6130_p11 = scmp.lt.s32.totalorder %s6128_s19, %s6124_s15 }
 0x212   :  { %p6131_p12 = por %p6130_p11, %p6129_p10 }
 0x214   :  { %p6132_p13 = pnand %p6131_p12, %p6125_p9 }
 0x216   :  { %6135 = shalt.err (!%p6132_p13)
}
 0x217   :  { %s7405_s16 = sld [smem:[#allocation116_spill]] }
 0x218   :  { %472 = dma.hbm_to_vmem [thread:$0]  %s7404_s5, 16, %s470_s8, [#allocation33]  }
 0x21d   :  { %s6136_s30 = scalar_lea.hbm %s7405_s16, 16 }
 0x21e   :  { %p6137_p0 = scmp.ne.s32.totalorder %s7405_s16, %s6136_s30  ;;  %p6140_p1 = scmp.lt.u32.totalorder %s6136_s30, %s7405_s16 }
 0x220   :  { %p6142_p2 = pnand %p6140_p1, %p6137_p0 }
 0x222   :  { %6145 = shalt.err (!%p6142_p2)
}
 0x223   :  { %s6146_s4 = scalar_lea.vmem %s482_s0, 16  ;;  %s6150_s18 = scalar_lea.vmem %s482_s0, 32 }
 0x224   :  { %p6147_p3 = scmp.ne.s32.totalorder %s482_s0, %s6146_s4  ;;  %p6151_p4 = scmp.lt.s32.totalorder %s482_s0, %s482_s0 }
 0x225   :  { %p6152_p5 = scmp.lt.s32.totalorder %s6150_s18, %s6146_s4 }
 0x227   :  { %p6153_p6 = por %p6152_p5, %p6151_p4 }
 0x229   :  { %p6154_p7 = pnand %p6153_p6, %p6147_p3 }
 0x22b   :  { %6157 = shalt.err (!%p6154_p7)
}
 0x22c   :  { %484 = dma.hbm_to_vmem [thread:$0]  %s7405_s16, 16, %s482_s0, [#allocation36]  }
 0x22d   :  { %6290 = dma.done.wait [#allocation3], 32  }
 0x22e   :  { %6291 = vsyncadd [#allocation3], 4294967264 }
 0x22f   :  { %6292 = dma.done.wait [#allocation6], 48  }
 0x230   :  { %6293 = vsyncadd [#allocation6], 4294967248 }
 0x231   :  { %6294 = dma.done.wait [#allocation9], 32  }
 0x232   :  { %6295 = vsyncadd [#allocation9], 4294967264 }
 0x233   :  { %6296 = dma.done.wait [#allocation12], 32  }
 0x234   :  { %6297 = vsyncadd [#allocation12], 4294967264 }
 0x235   :  { %6298 = dma.done.wait [#allocation15], 32  }
 0x236   :  { %6299 = vsyncadd [#allocation15], 4294967264 }
 0x237   :  { %6300 = dma.done.wait [#allocation18], 32  }
 0x238   :  { %6301 = vsyncadd [#allocation18], 4294967264 }
 0x239   :  { %6302 = dma.done.wait [#allocation21], 32  }
 0x23a   :  { %6303 = vsyncadd [#allocation21], 4294967264 }
 0x23b   :  { %6304 = dma.done.wait [#allocation24], 32  }
 0x23c   :  { %6305 = vsyncadd [#allocation24], 4294967264 }
 0x23d   :  { %6306 = dma.done.wait [#allocation27], 32  }
 0x23e   :  { %6307 = vsyncadd [#allocation27], 4294967264 }
 0x23f   :  { %6308 = dma.done.wait [#allocation30], 32  }
 0x240   :  { %6309 = vsyncadd [#allocation30], 4294967264 }
 0x241   :  { %6310 = dma.done.wait [#allocation33], 32  }
 0x242   :  { %6311 = vsyncadd [#allocation33], 4294967264 }
 0x243   :  { %6312 = dma.done.wait [#allocation36], 16  }
 0x244   :  { %6313 = vsyncadd [#allocation36], 4294967280  ;;  %s7406_s22 = sld [smem:[#allocation63_spill]]  ;;  %s7407_s17 = sld [smem:[#allocation68_spill]]  ;;  %v6418_v0 = vmov 0.0   ;;  %vm6419_vm0 = vmmov 0  }
 0x245   :  { %s7408_s20 = sld [smem:[#allocation80_spill]]  ;;  %s7409_s14 = sld [smem:[#allocation62_spill]]  ;;  %5066 = vmatprep.subr.mxu0 %v6418_v0  ;;  %5068 = vmatprep.mubr.msk.f32.mxu0 %vm6419_vm0, %v6418_v0  ;;  %vm640_vm1 = vcmask 1041408   ;;  %vm636_vm2 = vcmask 15360   ;;  %vm792_vm3 = vcmask 64512   ;;  %vm718_vm4 = vcmask 1043456  }
 0x246   :  { %5071 = vmatprep.subr.mxu1 %v6418_v0  ;;  %5073 = vmatprep.mubr.msk.f32.mxu1 %vm6419_vm0, %v6418_v0  ;;  %s7410_s23 = sld [smem:[#allocation81_spill]]  ;;  %s7411_s26 = sld [smem:[#allocation100_spill]]  ;;  %v6420_v7 = vmov 0.0|0.0   ;;  %vm714_vm5 = vcmask 31744   ;;  %vm1186_vm6 = vcmask 130048   ;;  %vm880_vm7 = vcmask 261120  }
 0x247   :  { %s7412_s28 = sld [smem:[#allocation82_spill]]  ;;  %s7413_s1 = sld [smem:[#allocation99_spill]]  ;;  %v4781_v23 = vld [vmem:[#allocation7] ss:$0 sm:$0xff]  ;;  %v4787_v39 = vld [vmem:[#allocation23] ss:$0 sm:$0xff] }
 0x248   :  { %s7414_s24 = sld [smem:[#allocation84_spill]]  ;;  %s7415_s2 = sld [smem:[#allocation64_spill]]  ;;  %v4782_v54 = vld [vmem:[#allocation8] ss:$0 sm:$0xff]  ;;  %v4788_v59 = vld [vmem:[#allocation25] ss:$0 sm:$0xff] }
 0x249   :  { %s7416_s29 = sld [smem:[#allocation101_spill]]  ;;  %s7417_s21 = sld [smem:[#allocation83_spill]]  ;;  %vm1749_vm8 = vcmask 1045504   ;;  %vm1736_vm9 = vcmask 48128   ;;  %vm2561_vm10 = vcmask 62464   ;;  %vm1555_vm11 = vcmask 128000  }
 0x24a   :  { %v635_v1 = vld [vmem:[%s7406_s22] sm:$0x3]  ;;  %s7418_s6 = sld [smem:[#allocation104_spill]]  ;;  %s7419_s7 = sld [smem:[#allocation66_spill]]  ;;  %vm4035_vm12 = vcmask 523264   ;;  %vm4435_vm13 = vcmask 58368  }
 0x24b   :  { %v634_v2 = vld [vmem:[%s7407_s17] sm:$0x3f]  ;;  %5067 = vmatpush3.msk.msra.mxu0 %vm640_vm1, %v635_v1  ;;  %s7420_s12 = sld [smem:[#allocation103_spill]]  ;;  %s7421_s5 = sld [smem:[#allocation67_spill]] }
 0x24c   :  { %v551_v3 = vld [vmem:[%s7408_s20] sm:$0xff]  ;;  %5069 = vmatmul.mubr.msk.f32.vlgmr.msra.gmra.mrb[0].mxu0 %vm636_vm2, %v634_v2  ;;  %5076 = vmatprep.subr.mxu0 %v6418_v0  ;;  %s6421_s10 = smov 96   ;;  %s6422_s8 = smov 16  }
 0x24d   :  { %5077 = vmatpush3.msra.mxu0 %v551_v3  ;;  %5078 = vmatprep.mubr.msk.f32.mxu0 %vm6419_vm0, %v6418_v0  ;;  %v627_v4 = vld [vmem:[%s7409_s14] sm:$0x3f]  ;;  %v555_v9 = vld [vmem:[%s7412_s28 + $0x8] sm:$0xff]  ;;  %v556_v16 = vld [vmem:[%s7412_s28 + $0x10] sm:$0xff]  ;;  %s7422_s11 = sld [smem:[#allocation97_spill]]  ;;  %s6423_s0 = smov 32  }
 0x24e   :  { %5092 = vmatprep.subr.mxu0 %v6418_v0  ;;  %v552_v5 = vld [vmem:[%s7410_s23] sm:$0xf]  ;;  %v557_v17 = vld [vmem:[%s7412_s28 + $0x18] sm:$0xff]  ;;  %v562_v20 = vld [vmem:[%s7414_s24 + $0x8] sm:$0xff]  ;;  %s7423_s3 = sld [smem:[#allocation65_spill]]  ;;  %s7424_s15 = sld [smem:[#allocation85_spill]] }
 0x24f   :  { %v590_v6 = vld [vmem:[%s7411_s26] sm:$0xf]  ;;  %5072 = vmatpush3.msk.msra.mxu1 %vm718_vm4, %v552_v5  ;;  %v5418_v18 = vpack.c.bf16 %v557_v17, %v556_v16  ;;  %v593_v30 = vld [vmem:[%s7416_s29 + $0x8] sm:$0xff]  ;;  %v594_v37 = vld [vmem:[%s7416_s29 + $0x10] sm:$0xff]  ;;  %s6424_s19 = smov 80   ;;  %s7425_s16 = sld [smem:[#allocation70_spill]] }
 0x250   :  { %5079 = vmatmul.mubr.msk.f32.vlgmr.msra.gmra.mrb[2].mxu0 %vm792_vm3, %v627_v4  ;;  %5414 = vmatprep.subr.bf16.mxu1 %v6420_v7  ;;  %v554_v8 = vld [vmem:[%s7412_s28] sm:$0xff]  ;;  %v595_v38 = vld [vmem:[%s7416_s29 + $0x18] sm:$0xff]  ;;  %v560_v44 = vld [vmem:[%s7417_s21 + $0x8] sm:$0xff]  ;;  %s7426_s30 = sld [smem:[#allocation109_spill]]  ;;  %s7427_s4 = sld [smem:[#allocation108_spill]] }
 0x251   :  { %5094 = vmatprep.mubr.msk.f32.mxu0 %vm6419_vm0, %v6418_v0  ;;  %5093 = vmatpush3.msk.msra.mxu0 %vm718_vm4, %v590_v6  ;;  %v589_v10 = vld [vmem:[%s7413_s1] sm:$0xff]  ;;  %v5415_v11 = vpack.c.bf16 %v555_v9, %v554_v8  ;;  %v5424_v40 = vpack.c.bf16 %v595_v38, %v594_v37  ;;  %v600_v47 = vld [vmem:[%s7418_s6 + $0x8] sm:$0xff]  ;;  %v4796_v5 = vld [vmem:[#allocation26] ss:$0 sm:$0xff]  ;;  %s7428_s18 = sld [smem:[#allocation111_spill]]  ;;  %s7429_s22 = sld [smem:[#allocation113_spill]] }
 0x252   :  { %5097 = vmatprep.subr.mxu0 %v6418_v0  ;;  %v561_v19 = vld [vmem:[%s7414_s24] sm:$0xff]  ;;  %v598_v53 = vld [vmem:[%s7420_s12 + $0x8] sm:$0xff]  ;;  %s7430_s17 = sld [smem:[#allocation73_spill]]  ;;  %s7431_s20 = sld [smem:[#allocation112_spill]] }
 0x253   :  { %v5427_v21 = vpack.c.bf16 %v562_v20, %v561_v19  ;;  %v1184_v22 = vld [vmem:[%s7415_s2] sm:$0x3f]  ;;  %s7432_s14 = sld [smem:[#allocation115_spill]]  ;;  %s7433_s23 = sld [smem:[#allocation69_spill]] }
 0x254   :  { %v592_v29 = vld [vmem:[%s7416_s29] sm:$0xff]  ;;  %s7434_s26 = sld [smem:[#allocation105_spill]]  ;;  %s7435_s28 = sld [smem:[#allocation93_spill]] }
 0x255   :  { %v5421_v33 = vpack.c.bf16 %v593_v30, %v592_v29  ;;  %v559_v43 = vld [vmem:[%s7417_s21] sm:$0xff]  ;;  %s7436_s1 = sld [smem:[#allocation107_spill]]  ;;  %s7437_s24 = sld [smem:[#allocation94_spill]] }
 0x256   :  { %v5430_v45 = vpack.c.bf16 %v560_v44, %v559_v43  ;;  %v599_v46 = vld [vmem:[%s7418_s6] sm:$0xff]  ;;  %s7438_s2 = sld [smem:[#allocation92_spill]]  ;;  %s7439_s29 = sld [smem:[#allocation96_spill]] }
 0x257   :  { %v5433_v48 = vpack.c.bf16 %v600_v47, %v599_v46  ;;  %v1368_v49 = vld [vmem:[%s7419_s7] sm:$0x3f]  ;;  %v565_v47 = vld [vmem:[%s7424_s15 + $0x8] sm:$0xff]  ;;  %s7440_s21 = sld [smem:[#allocation74_spill]]  ;;  %s7441_s6 = sld [smem:[#allocation72_spill]] }
 0x258   :  { %v597_v52 = vld [vmem:[%s7420_s12] sm:$0xff]  ;;  %s7442_s7 = sld [smem:[#allocation75_spill]]  ;;  %s7443_s12 = sld [smem:[#allocation71_spill]] }
 0x259   :  { %v5436_v56 = vpack.c.bf16 %v598_v53, %v597_v52  ;;  %v564_v46 = vld [vmem:[%s7424_s15] sm:$0xff]  ;;  %v4800_v52 = vld [vmem:[#allocation22] ss:$0 sm:$0xff]  ;;  %s7449_s15 = sld [smem:[#allocation76_spill]] }
 0x31f   :  { %v710_v12 = vpop.f32.mrb[0].mxu0 }
 0x320   :  { %v5070_v13 = vpop.f32.mrb[1].mxu0  ;;  %5074 = vmatmul.mubr.msk.f32.vlgmr.msra.gmra.mrb[0].mxu1 %vm714_vm5, %v710_v12  ;;  %5095 = vmatmul.mubr.msk.f32.vlgmr.msra.gmra.mrb[4].mxu0 %vm714_vm5, %v710_v12  ;;  %v1369_v12 = vld [vmem:[%s7421_s5] sm:$0x3f]  ;;  %s6426_s5 = smov 112  }
 0x321   :  { %5098 = vmatpush3.msra.mxu0 %v589_v10  ;;  %5099 = vmatprep.mubr.msk.f32.mxu0 %vm6419_vm0, %v6418_v0 }
 0x322   :  { %5416 = vmatpush3.bf16.msra.mxu1 %v5415_v11  ;;  %5089 = vmatprep.mubr.msk.f32.mxu1 %vm6419_vm0, %v6418_v0 }
 0x323   :  { %v862_v14 = vpop.f32.mrb[2].mxu0  ;;  %5417 = vmatprep.subr.bf16.mxu1 %v6420_v7  ;;  %5426 = vmatprep.subr.bf16.mxu0 %v6420_v7 }
 0x324   :  { %5100 = vmatmul.mubr.msk.f32.vlgmr.msra.gmra.mrb[6].mxu0 %vm792_vm3, %v627_v4  ;;  %v5080_v15 = vpop.f32.mrb[3].mxu0 }
 0x325   :  { %5117 = vmatprep.mubr.msk.f32.mxu0 %vm6419_vm0, %v6418_v0  ;;  %5428 = vmatpush3.bf16.msra.mxu0 %v5427_v21  ;;  %v4792_v21 = vld [vmem:[#allocation10] ss:$0 sm:$0xff] }
 0x326   :  { %5419 = vmatpush3.bf16.msra.mxu1 %v5418_v18  ;;  %5429 = vmatprep.subr.bf16.mxu0 %v6420_v7 }
 0x327   :  { %5420 = vmatprep.subr.bf16.mxu1 %v6420_v7 }
 0x328   :  { %5118 = vmatmul.mubr.msk.f32.vlgmr.msra.gmra.mrb[8].mxu0 %vm1186_vm6, %v1184_v22 }
 0x329   :  { %5124 = vmatprep.mubr.msk.f32.mxu0 %vm6419_vm0, %v6418_v0  ;;  %5431 = vmatpush3.bf16.msra.mxu0 %v5430_v45 }
 0x32a   :  { %5435 = vmatprep.subr.bf16.mxu0 %v6420_v7 }
 0x3f3   :  { %v788_v24 = vpop.f32.mrb[0].mxu1  ;;  %v1023_v25 = vpop.f32.mrb[4].mxu0 }
 0x3f4   :  { %v863_v26 = vadd.f32 %v862_v14, %v788_v24  ;;  %v5075_v27 = vpop.f32.mrb[1].mxu1  ;;  %v5096_v28 = vpop.f32.mrb[5].mxu0 }
 0x3f6   :  { %v872_v31 = vadd.f32 %v4781_v23, %v863_v26  ;;  %v587_v26 = vld [vmem:[%s7422_s11 + $0x8] sm:$0xff] }
 0x3f7   :  { %v1093_v32 = vpop.f32.mrb[6].mxu0 }
 0x3f8   :  { %v873_v34 = vmax.f32 %v872_v31, 0.0  ;;  %v1094_v35 = vadd.f32 %v1093_v32, %v1023_v25  ;;  %v5101_v36 = vpop.f32.mrb[7].mxu0  ;;  %v586_v25 = vld [vmem:[%s7422_s11] sm:$0xff]  ;;  %s7446_s11 = sld [smem:[#allocation88_spill]] }
 0x3f9   :  { %v5442_v27 = vpack.c.bf16 %v587_v26, %v586_v25 }
 0x3fa   :  { %5090 = vmatmul.mubr.msk.f32.vlgmr.msra.gmra.mrb[2].mxu1 %vm880_vm7, %v873_v34  ;;  %v1103_v41 = vadd.f32 %v4787_v39, %v1094_v35  ;;  %v1185_v39 = vld [vmem:[%s7423_s3] sm:$0x3f]  ;;  %s7448_s3 = sld [smem:[#allocation90_spill]] }
 0x3fb   :  { %5422 = vmatpush3.bf16.msra.mxu1 %v5421_v33  ;;  %5110 = vmatprep.mubr.msk.f32.mxu1 %vm6419_vm0, %v6418_v0  ;;  %v1256_v50 = vpop.f32.mrb[8].mxu0 }
 0x3fc   :  { %5423 = vmatprep.subr.bf16.mxu1 %v6420_v7  ;;  %v1104_v42 = vmax.f32 %v1103_v41, 0.0  ;;  %v5119_v51 = vpop.f32.mrb[9].mxu0 }
 0x3ff   :  { %5425 = vmatpush3.bf16.msra.mxu1 %v5424_v40 }
 0x400   :  { %5432 = vmatprep.subr.bf16.mxu1 %v6420_v7 }
 0x402   :  { %5111 = vmatmul.mubr.msk.f32.vlgmr.msra.gmra.mrb[4].mxu1 %vm880_vm7, %v1104_v42 }
 0x403   :  { %5131 = vmatprep.mubr.msk.f32.mxu1 %vm6419_vm0, %v6418_v0  ;;  %5434 = vmatpush3.bf16.msra.mxu1 %v5433_v48  ;;  %v5439_v48 = vpack.c.bf16 %v565_v47, %v564_v46 }
 0x404   :  { %5438 = vmatprep.subr.bf16.mxu1 %v6420_v7 }
 0x406   :  { %5132 = vmatmul.mubr.msk.f32.vlgmr.msra.gmra.mrb[6].mxu1 %vm1186_vm6, %v1368_v49 }
 0x407   :  { %5145 = vmatprep.mubr.msk.f32.mxu1 %vm6419_vm0, %v6418_v0  ;;  %5440 = vmatpush3.bf16.msra.mxu1 %v5439_v48  ;;  %v4798_v48 = vld [vmem:[#allocation11] ss:$0 sm:$0xff] }
 0x4cd   :  { %v950_v55 = vpop.f32.mrb[2].mxu1 }
 0x4ce   :  { %v951_v57 = vadd.f32 %v4782_v54, %v950_v55  ;;  %v5091_v58 = vpop.f32.mrb[3].mxu1 }
 0x4cf   :  { %v7013_v58 = vld [vmem:[%s7425_s16 + $0x8] sm:$0xff] }
 0x4d0   :  { %5125 = vmatmul.mubr.msk.f32.vlgmr.msra.gmra.mrb[10].mxu0 %vm1186_vm6, %v951_v57 }
 0x4d1   :  { %5437 = vmatpush3.bf16.msra.mxu0 %v5436_v56  ;;  %5138 = vmatprep.mubr.msk.f32.mxu0 %vm6419_vm0, %v6418_v0  ;;  %v7005_v56 = vld [vmem:[%s7425_s16] sm:$0xff] }
 0x4d2   :  { %5441 = vmatprep.subr.bf16.mxu0 %v6420_v7 }
 0x4d5   :  { %v1180_v60 = vpop.f32.mrb[4].mxu1 }
 0x4d6   :  { %v1181_v61 = vadd.f32 %v4788_v59, %v1180_v60  ;;  %v5112_v62 = vpop.f32.mrb[5].mxu1  ;;  %v7016_v59 = vld [vmem:[%s7425_s16 + $0x10] sm:$0xff]  ;;  %v7023_v60 = vld [vmem:[%s7425_s16 + $0x18] sm:$0xff]  ;;  %s7450_s16 = sld [smem:[#allocation77_spill]] }
 0x4d7   :  { %v610_v62 = vld [vmem:[%s7427_s4] sm:$0xff]  ;;  %s7452_s4 = sld [smem:[#allocation78_spill]] }
 0x4d8   :  { %5139 = vmatmul.mubr.msk.f32.vlgmr.msra.gmra.mrb[12].mxu0 %vm1186_vm6, %v1181_v61  ;;  %v611_v61 = vld [vmem:[%s7426_s30] sm:$0xff]  ;;  %s7451_s30 = sld [smem:[#allocation79_spill]] }
 0x4d9   :  { %5152 = vmatprep.mubr.msk.f32.mxu0 %vm6419_vm0, %v6418_v0  ;;  %v1439_v63 = vpop.f32.mrb[6].mxu1  ;;  %5443 = vmatpush3.bf16.msra.mxu0 %v5442_v27 }
 0x4da   :  { %v5133_v1 = vpop.f32.mrb[7].mxu1  ;;  %5163 = vmatprep.subr.mxu0 %v611_v61 }
 0x4db   :  { %v614_v1 = vld [vmem:[%s7428_s18 + $0x8] sm:$0xff] }
 0x5a3   :  { %v1329_v2 = vpop.f32.mrb[10].mxu0 }
 0x5a4   :  { %v1330_v3 = vadd.f32 %v1329_v2, %v1256_v50  ;;  %v5126_v4 = vpop.f32.mrb[11].mxu0 }
 0x5a6   :  { %v1339_v24 = vadd.f32 %v4792_v21, %v1330_v3  ;;  %v620_v21 = vld [vmem:[%s7429_s22 + $0x8] sm:$0xff] }
 0x5a8   :  { %v4793_v30 = vmul.f32 -1.442695, %v1339_v24 }
 0x5ab   :  { %v1512_v6 = vpop.f32.mrb[12].mxu0 }
 0x5ac   :  { %v1513_v8 = vadd.f32 %v1512_v6, %v1439_v63  ;;  %v5140_v9 = vpop.f32.mrb[13].mxu0  ;;  %v613_v63 = vld [vmem:[%s7428_s18] sm:$0xff] }
 0x5ad   :  { %v5444_v2 = vpack.c.bf16 %v614_v1, %v613_v63  ;;  %v606_v63 = vld [vmem:[%s7436_s1 + $0x8] sm:$0xff] }
 0x5ae   :  { %v1522_v10 = vadd.f32 %v4796_v5, %v1513_v8  ;;  %v4819_v1 = vld [vmem:[#allocation35] ss:$0 sm:$0xff] }
 0x5b0   :  { %5654 = vtanh.f32 %v1522_v10  ;;  %v4797_v13 = vmul.f32 -1.442695, %v1522_v10  ;;  %v615_v10 = vld [vmem:[%s7428_s18 + $0x10] sm:$0xff] }
 0x5b2   :  { %5656 = vpow2.f32 %v4797_v13  ;;  %v4811_v13 = vld [vmem:[#allocation31] ss:$0 sm:$0xff] }
 0x5ba   :  { %v5655_v11 = vpop.eup %5654 }
 0x5bb   :  { %1536 = vrot.lane.b32.xlu0 %v5655_v11, %s6421_s10  ;;  %v616_v11 = vld [vmem:[%s7428_s18 + $0x18] sm:$0xff]  ;;  %s6427_s18 = smov [#allocation38]  }
 0x5bc   :  { %v5657_v14 = vpop.eup %5656 }
 0x5bd   :  { %v1526_v15 = vadd.f32 1.0, %v5657_v14 }
 0x5bf   :  { %1531 = vrot.lane.b32.xlu0 %v1369_v12, %s6422_s8  ;;  %5658 = vrcp.f32 %v1526_v15  ;;  %v5448_v12 = vpack.c.bf16 %v616_v11, %v615_v10 }
 0x5c9   :  { %v5659_v16 = vpop.eup %5658 }
 0x62d   :  { %v1537_v17 = vpop.permute.xlu0 %1536 }
 0x62e   :  { %v1539_v18 = vmul.f32 %v5659_v16, %v1537_v17 }
 0x630   :  { %1541 = vrot.lane.b32.xlu1 %v1539_v18, %s6422_s8 }
 0x631   :  { %v1532_v19 = vpop.permute.xlu0 %1531 }
 0x632   :  { %v1534_v20 = vmul.f32 %v5659_v16, %v1532_v19 }
 0x6a2   :  { %v1542_v22 = vpop.permute.xlu1 %1541 }
 0x6a3   :  { %v6978_v23 = vadd.f32 %v1542_v22, %v1534_v20  ;;  %v619_v20 = vld [vmem:[%s7429_s22] sm:$0xff]  ;;  %s4624_s22 = sshll.u32 %s6427_s18, 4  ;;  %s4625_s22 = int_to_ptr.vmem [resolvable:$true] %s4624_s22 }
 0x6a4   :  { %v5456_v22 = vpack.c.bf16 %v620_v21, %v619_v20  ;;  %v577_v20 = vld [vmem:[%s7438_s2] sm:$0xff]  ;;  %p6163_p9 = scmp.lt.s32.totalorder %s4625_s22, %s4625_s22 }
 0x6a5   :  { %5660 = vtanh.f32 %v6978_v23  ;;  %v583_v21 = vld [vmem:[%s7439_s29] sm:$0xff] }
 0x6a6   :  { %5662 = vtanh.f32 %v1339_v24  ;;  %v4812_v24 = vld [vmem:[#allocation32] ss:$0 sm:$0xff] }
 0x6a7   :  { %5664 = vpow2.f32 %v4793_v30  ;;  %v7051_v30 = vld [vmem:[%s7430_s17] sm:$0x3f]  ;;  %s6428_s17 = smov [#allocation41]  }
 0x6af   :  { %v5661_v28 = vpop.eup %5660 }
 0x6b0   :  { %1547 = vrot.lane.b32.xlu1 %v5661_v28, %s6423_s0  ;;  %v5663_v29 = vpop.eup %5662 }
 0x6b1   :  { %v5665_v31 = vpop.eup %5664 }
 0x6b2   :  { %v1343_v32 = vadd.f32 1.0, %v5665_v31  ;;  %v618_v31 = vld [vmem:[%s7431_s20] sm:$0xff]  ;;  %s4644_s20 = sshll.u32 %s6428_s17, 4  ;;  %s4645_s20 = int_to_ptr.vmem [resolvable:$true] %s4644_s20 }
 0x6b4   :  { %1353 = vrot.lane.b32.xlu1 %v5663_v29, %s6421_s10  ;;  %5666 = vrcp.f32 %v1343_v32  ;;  %v622_v32 = vld [vmem:[%s7432_s14] sm:$0xff]  ;;  %s7444_s10 = sld [smem:[#allocation87_spill]] }
 0x6be   :  { %v5667_v36 = vpop.eup %5666 }
 0x722   :  { %v1548_v33 = vpop.permute.xlu1 %1547 }
 0x723   :  { %v6983_v34 = vmul.f32 %v5659_v16, %v1548_v33  ;;  %v623_v33 = vld [vmem:[%s7432_s14 + $0x8] sm:$0xff] }
 0x725   :  { %v1654_v35 = vmax.f32 %v6983_v34, 0.0 }
 0x726   :  { %v1354_v37 = vpop.permute.xlu1 %1353 }
 0x727   :  { %v1356_v38 = vmul.f32 %v5667_v36, %v1354_v37  ;;  %1662 = vrot.lane.b32.xlu0 %v1654_v35, %s6424_s19  ;;  %v5459_v35 = vpack.c.bf16 %v623_v33, %v622_v32  ;;  %v4829_v33 = vld [vmem:[#allocation17] ss:$0 sm:$0xff] }
 0x729   :  { %1358 = vrot.lane.b32.xlu1 %v1356_v38, %s6422_s8 }
 0x72b   :  { %1348 = vrot.lane.b32.xlu0 %v1185_v39, %s6422_s8  ;;  %s7445_s8 = sld [smem:[#allocation86_spill]] }
 0x799   :  { %v1663_v40 = vpop.permute.xlu0 %1662 }
 0x79a   :  { %5153 = vmatmul.mubr.msk.f32.vlgmr.msra.gmra.mrb[14].mxu0 %vm1186_vm6, %v1663_v40  ;;  %v624_v40 = vld [vmem:[%s7432_s14 + $0x10] sm:$0xff] }
 0x79b   :  { %v1359_v43 = vpop.permute.xlu1 %1358  ;;  %5164 = vmatpush3.msra.mxu0 %v611_v61  ;;  %v578_v61 = vld [vmem:[%s7435_s28] sm:$0xff] }
 0x79c   :  { %5168 = vmatprep.subr.mxu0 %v610_v62 }
 0x79d   :  { %v1349_v41 = vpop.permute.xlu0 %1348 }
 0x79e   :  { %v1351_v42 = vmul.f32 %v5667_v36, %v1349_v41  ;;  %v625_v41 = vld [vmem:[%s7432_s14 + $0x18] sm:$0xff]  ;;  %s6158_s14 = scalar_lea.vmem %s4625_s22, 128 }
 0x79f   :  { %p6159_p8 = scmp.ne.s32.totalorder %s4625_s22, %s6158_s14  ;;  %p6164_p10 = scmp.lt.s32.totalorder %s6158_s14, %s6158_s14 }
 0x7a0   :  { %v6991_v44 = vadd.f32 %v1359_v43, %v1351_v42  ;;  %v5462_v42 = vpack.c.bf16 %v625_v41, %v624_v40  ;;  %v4818_v43 = vld [vmem:[#allocation34] ss:$0 sm:$0xff]  ;;  %v6425_v40 = vmov 0   ;;  %v4270_v41 = vld [vmem:[%s7440_s21] sm:$0x3f] }
 0x7a1   :  { %5653 = vset.pattern.permute.xlu1 %v6425_v40  ;;  %5652 = vset.pattern.permute.xlu0 %v6425_v40  ;;  %p6165_p11 = por %p6164_p10, %p6163_p9 }
 0x7a2   :  { %5668 = vtanh.f32 %v6991_v44 }
 0x7a3   :  { %p6166_p12 = pnand %p6165_p11, %p6159_p8 }
 0x7ac   :  { %v5669_v45 = vpop.eup %5668 }
 0x7ad   :  { %1364 = vrot.lane.b32.xlu0 %v5669_v45, %s6423_s0  ;;  %s7447_s0 = sld [smem:[#allocation89_spill]] }
 0x81f   :  { %v1365_v49 = vpop.permute.xlu0 %1364 }
 0x820   :  { %v6996_v50 = vmul.f32 %v5667_v36, %v1365_v49 }
 0x822   :  { %v1572_v51 = vmax.f32 %v6996_v50, 0.0 }
 0x824   :  { %1580 = vrot.lane.b32.xlu1 %v1572_v51, %s6424_s19 }
 0x86d   :  { %v1732_v53 = vpop.f32.mrb[14].mxu0 }
 0x86e   :  { %v7000_v54 = vadd.f32 %v4800_v52, %v1732_v53  ;;  %v5154_v55 = vpop.f32.mrb[15].mxu0  ;;  %v2574_v53 = vld [vmem:[%s7433_s23] sm:$0x3f] }
 0x86f   :  { %v603_v55 = vld [vmem:[%s7434_s26 + $0x8] sm:$0xff] }
 0x870   :  { %5155 = vmatprep.subr.msk.mxu1 %vm1749_vm8, %v7000_v54 }
 0x896   :  { %v1581_v57 = vpop.permute.xlu1 %1580 }
 0x897   :  { %5146 = vmatmul.mubr.msk.f32.vlgmr.msra.gmra.mrb[8].mxu1 %vm1186_vm6, %v1581_v57 }
 0x898   :  { %5156 = vmatpush3.msk.msra.mxu1 %vm1749_vm8, %v7000_v54  ;;  %5157 = vmatprep.mubr.msk.f32.mxu1 %vm1736_vm9, %v7005_v56 }
 0x899   :  { %5445 = vmatprep.subr.bf16.mxu1 %v5444_v2 }
 0x89b   :  { %5158 = vmatmul.mubr.msk.f32.vlgmr.msra.gmra.mrb[10].mxu1 %vm1736_vm9, %v7013_v58 }
 0x89c   :  { %5160 = vmatprep.mubr.msk.f32.mxu1 %vm1736_vm9, %v7016_v59  ;;  %5447 = vmatpush3.bf16.msra.mxu1 %v5444_v2  ;;  %v580_v2 = vld [vmem:[%s7437_s24] sm:$0xff] }
 0x89d   :  { %5449 = vmatprep.subr.bf16.mxu1 %v5448_v12 }
 0x89f   :  { %5161 = vmatmul.mubr.msk.f32.gmra.mrb[12].mxu1 %vm1736_vm9, %v7023_v60 }
 0x8a0   :  { %5451 = vmatpush3.bf16.msra.mxu1 %v5448_v12  ;;  %v607_v12 = vld [vmem:[%s7436_s1 + $0x10] sm:$0xff] }
 0x8a1   :  { %5455 = vmatprep.subr.bf16.mxu1 %v6420_v7 }
 0x96a   :  { %v7031_v3 = vpop.f32.mrb[8].mxu1 }
 0x96b   :  { %v5147_v4 = vpop.f32.mrb[9].mxu1  ;;  %v7074_v52 = vadd.f32 %v4798_v48, %v7031_v3  ;;  %v581_v3 = vld [vmem:[%s7437_s24 + $0x8] sm:$0xff] }
 0x96e   :  { %v5159_v5 = vpop.f32.mrb[10].mxu1 }
 0x96f   :  { %v1819_v6 = vpop.f32.mrb[11].mxu1 }
 0x972   :  { %v5162_v8 = vpop.f32.mrb[12].mxu1 }
 0x973   :  { %v1829_v9 = vpop.f32.mrb[13].mxu1 }
 0x974   :  { %5165 = vmatprep.mubr.msk.f32.mxu0 %vm792_vm3, %v1829_v9  ;;  %v5474_v9 = vpack.c.bf16 %v581_v3, %v580_v2  ;;  %v3048_v3 = vld [vmem:[%s7443_s12] sm:$0xff] }
 0x975   :  { %5166 = vmatmul.mubr.msk.f32.vlgmr.msra.gmra.mrb[16].mxu0 %vm792_vm3, %v5162_v8 }
 0x976   :  { %5170 = vmatprep.mubr.msk.f32.mxu0 %vm792_vm3, %v1819_v6  ;;  %5169 = vmatpush3.msra.mxu0 %v610_v62  ;;  %v605_v62 = vld [vmem:[%s7436_s1] sm:$0xff] }
 0x977   :  { %5452 = vmatprep.subr.bf16.mxu0 %v6420_v7 }
 0x97d   :  { %5171 = vmatmul.mubr.msk.f32.vlgmr.msra.gmra.mrb[16].mxu0 %vm792_vm3, %v5159_v5  ;;  %v5468_v5 = vpack.c.bf16 %v606_v63, %v605_v62 }
 0x97e   :  { %5188 = vmatprep.mubr.msk.f32.mxu0 %vm6419_vm0, %v6418_v0 }
 0xa50   :  { %v5172_v14 = vpop.f32.mrb[16].mxu0 }
 0xa51   :  { %v2007_v15 = vadd.f32 %v5172_v14, %v4811_v13  ;;  %v1991_v16 = vpop.f32.mrb[17].mxu0 }
 0xa52   :  { %v2006_v17 = vadd.f32 %v4811_v13, %v1991_v16  ;;  %v608_v13 = vld [vmem:[%s7436_s1 + $0x18] sm:$0xff] }
 0xa53   :  { %v2009_v19 = vmax.f32 %v2007_v15, 0.0  ;;  %v5471_v14 = vpack.c.bf16 %v608_v13, %v607_v12  ;;  %v4821_v15 = vld [vmem:[#allocation28] ss:$0 sm:$0xff] }
 0xa54   :  { %v2008_v18 = vmax.f32 %v2006_v17, 0.0  ;;  %v567_v12 = vld [vmem:[%s7445_s8] sm:$0xff] }
 0xa56   :  { %5181 = vmatprep.mubr.msk.f32.mxu1 %vm880_vm7, %v2008_v18 }
 0xa57   :  { %5182 = vmatmul.mubr.msk.f32.vlgmr.msra.gmra.mrb[14].mxu1 %vm880_vm7, %v2009_v19 }
 0xa58   :  { %5195 = vmatprep.mubr.msk.f32.mxu1 %vm6419_vm0, %v6418_v0  ;;  %5457 = vmatpush3.bf16.msra.mxu1 %v5456_v22  ;;  %v584_v22 = vld [vmem:[%s7439_s29 + $0x8] sm:$0xff] }
 0xa59   :  { %5458 = vmatprep.subr.bf16.mxu1 %v6420_v7 }
 0xb2a   :  { %v5183_v25 = vpop.f32.mrb[14].mxu1 }
 0xb2b   :  { %v2094_v26 = vadd.f32 %v5183_v25, %v4812_v24  ;;  %v2088_v27 = vpop.f32.mrb[15].mxu1 }
 0xb2c   :  { %v2089_v28 = vadd.f32 %v4812_v24, %v2088_v27  ;;  %v5477_v24 = vpack.c.bf16 %v584_v22, %v583_v21  ;;  %v4823_v27 = vld [vmem:[#allocation29] ss:$0 sm:$0xff] }
 0xb2e   :  { %v5453_v29 = vpack.c.bf16 %v2094_v26, %v2089_v28 }
 0xb30   :  { %5454 = vmatpush3.bf16.msra.mxu0 %v5453_v29 }
 0xb31   :  { %5198 = vmatprep.subr.mxu0 %v6418_v0 }
 0xb33   :  { %5189 = vmatmul.mubr.msk.f32.vlgmr.msra.gmra.mrb[18].mxu0 %vm1186_vm6, %v7051_v30 }
 0xb34   :  { %5199 = vmatpush3.msra.mxu0 %v618_v31  ;;  %5200 = vmatprep.mubr.msk.f32.mxu0 %vm6419_vm0, %v6418_v0 }
 0xb35   :  { %5464 = vmatprep.subr.bf16.mxu0 %v6420_v7 }
 0xb37   :  { %5201 = vmatmul.mubr.msk.f32.vlgmr.msra.gmra.mrb[20].mxu0 %vm792_vm3, %v7000_v54  ;;  %v602_v54 = vld [vmem:[%s7434_s26] sm:$0xff] }
 0xb38   :  { %5218 = vmatprep.mubr.msk.f32.mxu0 %vm6419_vm0, %v6418_v0  ;;  %v5465_v57 = vpack.c.bf16 %v603_v55, %v602_v54  ;;  %v4354_v54 = vsub.f32 1.0, %v4270_v41  ;;  %v4440_v55 = vld [vmem:[%s7442_s7] sm:$0xff] }
 0xb3a   :  { %5466 = vmatpush3.bf16.msra.mxu0 %v5465_v57  ;;  %v4441_v57 = vld [vmem:[%s7442_s7 + $0x8] sm:$0xff] }
 0xb3b   :  { %5467 = vmatprep.subr.bf16.mxu0 %v6420_v7 }
 0xc06   :  { %v2166_v36 = vpop.f32.mrb[18].mxu0 }
 0xc07   :  { %v5190_v37 = vpop.f32.mrb[19].mxu0  ;;  %5196 = vmatmul.mubr.msk.f32.vlgmr.msra.gmra.mrb[16].mxu1 %vm1186_vm6, %v2166_v36 }
 0xc08   :  { %5460 = vmatpush3.bf16.msra.mxu1 %v5459_v35  ;;  %5211 = vmatprep.mubr.msk.f32.mxu1 %vm6419_vm0, %v6418_v0 }
 0xc09   :  { %5461 = vmatprep.subr.bf16.mxu1 %v6420_v7 }
 0xc0a   :  { %v2311_v38 = vpop.f32.mrb[20].mxu0 }
 0xc0b   :  { %v5202_v39 = vpop.f32.mrb[21].mxu0 }
 0xc0c   :  { %5463 = vmatpush3.bf16.msra.mxu1 %v5462_v42  ;;  %v3149_v42 = vld [vmem:[%s7441_s6] sm:$0xff] }
 0xc0d   :  { %5232 = vmatprep.subr.mxu1 %v6418_v0 }
 0xcda   :  { %v2239_v45 = vpop.f32.mrb[16].mxu1 }
 0xcdb   :  { %v2312_v46 = vadd.f32 %v2311_v38, %v2239_v45  ;;  %v5197_v47 = vpop.f32.mrb[17].mxu1  ;;  %v3151_v45 = vld [vmem:[%s7441_s6 + $0x10] sm:$0xff] }
 0xcdd   :  { %v2321_v49 = vadd.f32 %v4818_v43, %v2312_v46  ;;  %v3150_v43 = vld [vmem:[%s7441_s6 + $0x8] sm:$0xff]  ;;  %v3152_v46 = vld [vmem:[%s7441_s6 + $0x18] sm:$0xff] }
 0xcdf   :  { %v2322_v51 = vmax.f32 %v2321_v49, 0.0 }
 0xce1   :  { %5212 = vmatmul.mubr.msk.f32.vlgmr.msra.gmra.mrb[18].mxu1 %vm880_vm7, %v2322_v51 }
 0xce2   :  { %5233 = vmatpush3.msk.msra.mxu1 %vm1749_vm8, %v7074_v52  ;;  %5234 = vmatprep.mubr.msk.f32.mxu1 %vm6419_vm0, %v6418_v0 }
 0xce3   :  { %5237 = vmatprep.subr.mxu1 %v6418_v0 }
 0xce5   :  { %5235 = vmatmul.mubr.msk.f32.vlgmr.msra.gmra.mrb[20].mxu1 %vm1736_vm9, %v2574_v53 }
 0xce6   :  { %5239 = vmatprep.mubr.msk.f32.mxu1 %vm6419_vm0, %v6418_v0  ;;  %5238 = vmatpush3.msra.mxu1 %v578_v61  ;;  %v4830_v61 = vld [vmem:[#allocation19] ss:$0 sm:$0xff] }
 0xce7   :  { %5473 = vmatprep.subr.bf16.mxu1 %v6420_v7 }
 0xdb4   :  { %v2398_v4 = vpop.f32.mrb[18].mxu1 }
 0xdb5   :  { %v2399_v6 = vadd.f32 %v4819_v1, %v2398_v4  ;;  %v5213_v8 = vpop.f32.mrb[19].mxu1  ;;  %v3049_v4 = vld [vmem:[%s7443_s12 + $0x8] sm:$0xff] }
 0xdb7   :  { %5219 = vmatmul.mubr.msk.f32.vlgmr.msra.gmra.mrb[22].mxu0 %vm1186_vm6, %v2399_v6 }
 0xdb8   :  { %v2647_v10 = vpop.f32.mrb[20].mxu1  ;;  %5469 = vmatpush3.bf16.msra.mxu0 %v5468_v5  ;;  %5229 = vmatprep.mubr.msk.f32.mxu0 %vm6419_vm0, %v6418_v0  ;;  %v3050_v5 = vld [vmem:[%s7443_s12 + $0x10] sm:$0xff] }
 0xdb9   :  { %5240 = vmatmul.mubr.msk.f32.vlgmr.msra.gmra.mrb[22].mxu1 %vm792_vm3, %v2647_v10  ;;  %5470 = vmatprep.subr.bf16.mxu0 %v6420_v7  ;;  %v5236_v11 = vpop.f32.mrb[21].mxu1 }
 0xdba   :  { %5475 = vmatpush3.bf16.msra.mxu1 %v5474_v9  ;;  %5251 = vmatprep.mubr.msk.f32.mxu1 %vm6419_vm0, %v6418_v0 }
 0xdbb   :  { %5261 = vmatprep.subr.msk.mxu1 %vm1749_vm8, %v7074_v52 }
 0xdbc   :  { %5472 = vmatpush3.bf16.msra.mxu0 %v5471_v14 }
 0xdbd   :  { %5242 = vmatprep.subr.mxu0 %v6418_v0 }
 0xe8a   :  { %v2477_v16 = vpop.f32.mrb[22].mxu0 }
 0xe8b   :  { %v2478_v17 = vadd.f32 %v4821_v15, %v2477_v16  ;;  %v5220_v18 = vpop.f32.mrb[23].mxu0 }
 0xe8c   :  { %v2720_v25 = vpop.f32.mrb[22].mxu1 }
 0xe8d   :  { %v2481_v19 = vmax.f32 %v2478_v17, 0.0  ;;  %v5241_v26 = vpop.f32.mrb[23].mxu1 }
 0xe8e   :  { %v569_v26 = vld [vmem:[%s7446_s11] sm:$0xff] }
 0xe8f   :  { %5230 = vmatmul.mubr.msk.f32.vlgmr.msra.gmra.mrb[24].mxu0 %vm880_vm7, %v2481_v19 }
 0xe90   :  { %5243 = vmatpush3.msra.mxu0 %v577_v20  ;;  %5244 = vmatprep.mubr.msk.f32.mxu0 %vm6419_vm0, %v6418_v0 }
 0xe91   :  { %5476 = vmatprep.subr.bf16.mxu0 %v6420_v7 }
 0xe93   :  { %5245 = vmatmul.mubr.msk.f32.vlgmr.msra.gmra.mrb[26].mxu0 %vm792_vm3, %v7074_v52 }
 0xe94   :  { %5478 = vmatpush3.bf16.msra.mxu0 %v5477_v24  ;;  %5258 = vmatprep.mubr.msk.f32.mxu0 %vm6419_vm0, %v6418_v0 }
 0xe95   :  { %5269 = vmatprep.subr.msk.mxu0 %vm1749_vm8, %v7074_v52 }
 0xf62   :  { %v2557_v28 = vpop.f32.mrb[24].mxu0 }
 0xf63   :  { %v2558_v29 = vadd.f32 %v4823_v27, %v2557_v28  ;;  %v5231_v31 = vpop.f32.mrb[25].mxu0 }
 0xf64   :  { %v572_v31 = vld [vmem:[%s7447_s0 + $0x8] sm:$0xff] }
 0xf65   :  { %v2563_v32 = vsel %vm2561_vm10, %v2558_v29, -inf  ;;  %2562 = vst.msk [vmem:[#allocation38] sm:$0x3f] %vm2561_vm10, %v2558_v29 }
 0xf66   :  { %2564 = vmax.xlane.f32.xlu0 %v2563_v32  ;;  %v2792_v35 = vpop.f32.mrb[26].mxu0 }
 0xf67   :  { %v2793_v36 = vadd.f32 %v2792_v35, %v2720_v25  ;;  %v5246_v37 = vpop.f32.mrb[27].mxu0  ;;  %v575_v35 = vld [vmem:[%s7448_s3 + $0x8] sm:$0xff] }
 0xf68   :  { %v4861_v37 = vld [vmem:[#allocation13] ss:$0 sm:$0xff] }
 0xf69   :  { %v2802_v38 = vadd.f32 %v4829_v33, %v2793_v36  ;;  %v574_v33 = vld [vmem:[%s7448_s3] sm:$0xff] }
 0xf6a   :  { %v5483_v36 = vpack.c.bf16 %v575_v35, %v574_v33 }
 0xf6b   :  { %v2803_v39 = vmax.f32 %v2802_v38, 0.0 }
 0xf6d   :  { %5252 = vmatmul.mubr.msk.f32.vlgmr.msra.gmra.mrb[24].mxu1 %vm1186_vm6, %v2803_v39 }
 0xf6e   :  { %5262 = vmatpush3.msk.msra.mxu1 %vm1749_vm8, %v7074_v52  ;;  %5263 = vmatprep.mubr.msk.f32.mxu1 %vm1736_vm9, %v7005_v56 }
 0xf6f   :  { %5277 = vmatprep.subr.msk.mxu1 %vm1749_vm8, %v7074_v52 }
 0xf71   :  { %5264 = vmatmul.mubr.msk.f32.vlgmr.msra.gmra.mrb[26].mxu1 %vm1736_vm9, %v7013_v58 }
 0xf72   :  { %5278 = vmatpush3.msk.msra.mxu1 %vm1749_vm8, %v7074_v52  ;;  %5266 = vmatprep.mubr.msk.f32.mxu1 %vm1736_vm9, %v7016_v59 }
 0xf75   :  { %5267 = vmatmul.mubr.msk.f32.gmra.mrb[28].mxu1 %vm1736_vm9, %v7023_v60 }
 0xf76   :  { %5279 = vmatprep.mubr.msk.f32.mxu1 %vm1736_vm9, %v3149_v42 }
 0xf79   :  { %5280 = vmatmul.mubr.msk.f32.vlgmr.msra.gmra.mrb[30].mxu1 %vm1736_vm9, %v3150_v43 }
 0xf7a   :  { %5282 = vmatprep.mubr.msk.f32.mxu1 %vm1736_vm9, %v3151_v45 }
 0xf7c   :  { %4273 = vperm.xlu0 %5652, %v4270_v41  }
 0xf7d   :  { %5283 = vmatmul.mubr.msk.f32.gmra.mrb[32].mxu1 %vm1736_vm9, %v3152_v46 }
 0xff3   :  { %v2565_v47 = vpop.xlane.xlu0 %2564 }
 0xff4   :  { %v2566_v48 = vsub.f32 %v2558_v29, %v2565_v47  ;;  %v571_v29 = vld [vmem:[%s7447_s0] sm:$0xff] }
 0xff5   :  { %v5479_v32 = vpack.c.bf16 %v572_v31, %v571_v29  ;;  %v3941_v29 = vld [vmem:[%s7452_s4] sm:$0xff]  ;;  %v3942_v31 = vld [vmem:[%s7452_s4 + $0x8] sm:$0xff] }
 0xff6   :  { %v2567_v49 = vmul.f32 1.442695, %v2566_v48 }
 0xff7   :  { %5480 = vmatprep.subr.bf16.mxu1 %v5479_v32 }
 0xff8   :  { %5670 = vpow2.f32 %v2567_v49  ;;  %5482 = vmatpush3.bf16.msra.mxu1 %v5479_v32  ;;  %v5503_v32 = vpack.c.bf16 %v3942_v31, %v3941_v29 }
 0xff9   :  { %5484 = vmatprep.subr.bf16.mxu1 %v5483_v36 }
0x1002   :  { %v7146_v51 = vpop.eup %5670 }
0x1003   :  { %v2569_v53 = vsel %vm2561_vm10, %v7146_v51, 0.0 }
0x1004   :  { %2570 = vadd.xlane.f32.xlu1 %v2569_v53 }
0x1015   :  { %4358 = vperm.xlu1 %5653, %v4354_v54  }
0x1019   :  { %4446 = vperm.xlu1 %5653, %v4440_v55  }
0x101d   :  { %4451 = vperm.xlu1 %5653, %v4441_v57   ;;  %v4862_v57 = vld [vmem:[#allocation14] ss:$0 sm:$0xff] }
0x1021   :  { %1558 = vrot.lane.b32.xlu1 %v6991_v44, %s6426_s5  ;;  %v3051_v44 = vld [vmem:[%s7443_s12 + $0x18] sm:$0xff] }
0x1040   :  { %v2879_v62 = vpop.f32.mrb[24].mxu1 }
0x1041   :  { %v2880_v63 = vadd.f32 %v4830_v61, %v2879_v62  ;;  %v5253_v1 = vpop.f32.mrb[25].mxu1 }
0x1043   :  { %v2883_v2 = vmax.f32 %v2880_v63, 0.0 }
0x1044   :  { %v5265_v13 = vpop.f32.mrb[26].mxu1 }
0x1045   :  { %5259 = vmatmul.mubr.msk.f32.vlgmr.msra.gmra.mrb[28].mxu0 %vm1186_vm6, %v2883_v2  ;;  %v3029_v14 = vpop.f32.mrb[27].mxu1 }
0x1046   :  { %5270 = vmatpush3.msk.msra.mxu0 %vm1749_vm8, %v7074_v52  ;;  %5271 = vmatprep.mubr.msk.f32.mxu0 %vm1736_vm9, %v3048_v3  ;;  %v568_v52 = vld [vmem:[%s7444_s10] sm:$0xff] }
0x1047   :  { %5285 = vmatprep.subr.mxu0 %v568_v52 }
0x1048   :  { %v5268_v15 = vpop.f32.mrb[28].mxu1 }
0x1049   :  { %5272 = vmatmul.mubr.msk.f32.vlgmr.msra.gmra.mrb[30].mxu0 %vm1736_vm9, %v3049_v4  ;;  %v3039_v16 = vpop.f32.mrb[29].mxu1 }
0x104a   :  { %5274 = vmatprep.mubr.msk.f32.mxu0 %vm1736_vm9, %v3050_v5  ;;  %5286 = vmatpush3.msra.mxu0 %v568_v52 }
0x104b   :  { %5293 = vmatprep.subr.mxu0 %v567_v12 }
0x104c   :  { %v5281_v17 = vpop.f32.mrb[30].mxu1 }
0x104d   :  { %5275 = vmatmul.mubr.msk.f32.gmra.mrb[32].mxu0 %vm1736_vm9, %v3051_v44  ;;  %v3231_v18 = vpop.f32.mrb[31].mxu1 }
0x1050   :  { %v5284_v19 = vpop.f32.mrb[32].mxu1 }
0x1051   :  { %v3241_v20 = vpop.f32.mrb[33].mxu1 }
0x1091   :  { %v2571_v6 = vpop.xlane.xlu1 %2570 }
0x1092   :  { %5672 = vrcp.f32 %v2571_v6 }
0x1095   :  { %v7165_v8 = vpop.permute.xlu1 %4358 }
0x1099   :  { %v7167_v9 = vpop.permute.xlu1 %4446 }
0x109c   :  { %v5673_v42 = vpop.eup %5672 }
0x109d   :  { %v7169_v10 = vpop.permute.xlu1 %4451  ;;  %v7195_v53 = vmul.f32 %v5673_v42, %v7146_v51 }
0x10a1   :  { %v1559_v11 = vpop.permute.xlu1 %1558 }
0x10a2   :  { %1561 = vst.msk [vmem:[#allocation41] sm:$0x3f] %vm1555_vm11, %v1559_v11  ;;  %v3857_v11 = vld [vmem:[%s7449_s15] sm:$0xff] }
0x1118   :  { %v7174_v21 = vpop.f32.mrb[28].mxu0 }
0x1119   :  { %v5260_v22 = vpop.f32.mrb[29].mxu0 }
0x111a   :  { %v4031_v22 = vld [vmem:[%s7451_s30 + $0x20] sm:$0xff] }
0x111c   :  { %v5273_v24 = vpop.f32.mrb[30].mxu0 }
0x111d   :  { %v3130_v25 = vpop.f32.mrb[31].mxu0 }
0x111e   :  { %5287 = vmatprep.mubr.msk.f32.mxu0 %vm792_vm3, %v3130_v25 }
0x111f   :  { %5288 = vmatmul.mubr.msk.f32.vlgmr.msra.gmra.mrb[34].mxu0 %vm792_vm3, %v5273_v24  ;;  %v4032_v24 = vld [vmem:[%s7451_s30 + $0x28] sm:$0xff] }
0x1120   :  { %v5276_v27 = vpop.f32.mrb[32].mxu0  ;;  %5294 = vmatpush3.msra.mxu0 %v567_v12  ;;  %v3949_v12 = vld [vmem:[%s7450_s16] sm:$0xff]  ;;  %v5495_v25 = vpack.c.bf16 %v4032_v24, %v4031_v22 }
0x1121   :  { %v3140_v28 = vpop.f32.mrb[33].mxu0  ;;  %5301 = vmatprep.subr.mxu0 %v569_v26 }
0x1122   :  { %5290 = vmatprep.mubr.msk.f32.mxu0 %vm792_vm3, %v3140_v28 }
0x1123   :  { %5291 = vmatmul.mubr.msk.f32.gmra.mrb[36].mxu0 %vm792_vm3, %v5276_v27  ;;  %v4034_v27 = vld [vmem:[%s7451_s30 + $0x38] sm:$0xff] }
0x1124   :  { %5295 = vmatprep.mubr.msk.f32.mxu0 %vm792_vm3, %v3029_v14  ;;  %v4028_v14 = vld [vmem:[%s7451_s30 + $0x8] sm:$0xff] }
0x1127   :  { %5296 = vmatmul.mubr.msk.f32.vlgmr.msra.gmra.mrb[34].mxu0 %vm792_vm3, %v5265_v13  ;;  %v4027_v13 = vld [vmem:[%s7451_s30] sm:$0xff] }
0x1128   :  { %5298 = vmatprep.mubr.msk.f32.mxu0 %vm792_vm3, %v3039_v16  ;;  %5302 = vmatpush3.msra.mxu0 %v569_v26  ;;  %v5487_v16 = vpack.c.bf16 %v4028_v14, %v4027_v13  ;;  %v4033_v26 = vld [vmem:[%s7451_s30 + $0x30] sm:$0xff]  ;;  %v4274_v14 = vpop.permute.xlu0 %4273 }
0x1129   :  { %5337 = vmatprep.subr.mxu0 %v3857_v11  ;;  %v5499_v28 = vpack.c.bf16 %v4034_v27, %v4033_v26 }
0x112b   :  { %5299 = vmatmul.mubr.msk.f32.gmra.mrb[36].mxu0 %vm792_vm3, %v5268_v15  ;;  %v4029_v15 = vld [vmem:[%s7451_s30 + $0x10] sm:$0xff] }
0x112c   :  { %5303 = vmatprep.mubr.msk.f32.mxu0 %vm792_vm3, %v3231_v18 }
0x112f   :  { %5304 = vmatmul.mubr.msk.f32.vlgmr.msra.gmra.mrb[34].mxu0 %vm792_vm3, %v5281_v17  ;;  %v4030_v17 = vld [vmem:[%s7451_s30 + $0x18] sm:$0xff] }
0x1130   :  { %5306 = vmatprep.mubr.msk.f32.mxu0 %vm792_vm3, %v3241_v20  ;;  %5338 = vmatpush3.msra.mxu0 %v3857_v11 }
0x1131   :  { %5342 = vmatprep.subr.mxu0 %v3949_v12 }
0x1133   :  { %5307 = vmatmul.mubr.msk.f32.gmra.mrb[36].mxu0 %vm792_vm3, %v5284_v19 }
0x1202   :  { %v5305_v38 = vpop.f32.mrb[34].mxu0 }
0x1203   :  { %v3552_v39 = vadd.f32 %v5305_v38, %v4861_v37  ;;  %v3522_v40 = vpop.f32.mrb[35].mxu0 }
0x1204   :  { %v3551_v41 = vadd.f32 %v4861_v37, %v3522_v40 }
0x1205   :  { %v3556_v46 = vmax.f32 %v3552_v39, 0.0 }
0x1206   :  { %v3555_v43 = vmax.f32 %v3551_v41, 0.0  ;;  %v5308_v45 = vpop.f32.mrb[36].mxu0 }
0x1207   :  { %v3554_v47 = vadd.f32 %v5308_v45, %v4861_v37  ;;  %v3532_v48 = vpop.f32.mrb[37].mxu0 }
0x1208   :  { %v3553_v49 = vadd.f32 %v4861_v37, %v3532_v48  ;;  %5313 = vmatprep.mubr.msk.f32.mxu1 %vm1186_vm6, %v3555_v43  ;;  %v3944_v48 = vld [vmem:[%s7452_s4 + $0x18] sm:$0xff] }
0x1209   :  { %5314 = vmatmul.mubr.msk.f32.vlgmr.msra.gmra.mrb[34].mxu1 %vm1186_vm6, %v3556_v46  ;;  %v3558_v55 = vmax.f32 %v3554_v47, 0.0  ;;  %v3943_v47 = vld [vmem:[%s7452_s4 + $0x10] sm:$0xff] }
0x120a   :  { %v3557_v54 = vmax.f32 %v3553_v49, 0.0  ;;  %5486 = vmatpush3.bf16.msra.mxu1 %v5483_v36  ;;  %v4867_v36 = vld [vmem:[#allocation16] ss:$0 sm:$0xff] }
0x120b   :  { %5329 = vmatprep.subr.msk.mxu1 %vm1749_vm8, %v7195_v53 }
0x120c   :  { %5316 = vmatprep.mubr.msk.f32.mxu1 %vm1186_vm6, %v3557_v54 }
0x120d   :  { %5317 = vmatmul.mubr.msk.f32.gmra.mrb[36].mxu1 %vm1186_vm6, %v3558_v55 }
0x12dc   :  { %v5315_v61 = vpop.f32.mrb[34].mxu1 }
0x12dd   :  { %v3649_v62 = vadd.f32 %v5315_v61, %v4862_v57  ;;  %v3643_v63 = vpop.f32.mrb[35].mxu1  ;;  %v3945_v61 = vld [vmem:[%s7452_s4 + $0x20] sm:$0xff] }
0x12de   :  { %v3644_v1 = vadd.f32 %v4862_v57, %v3643_v63 }
0x12df   :  { %v3663_v3 = vmax.f32 %v3649_v62, 0.0  ;;  %v3946_v62 = vld [vmem:[%s7452_s4 + $0x28] sm:$0xff] }
0x12e0   :  { %v3662_v2 = vmax.f32 %v3644_v1, 0.0  ;;  %v5318_v51 = vpop.f32.mrb[36].mxu1  ;;  %v5511_v63 = vpack.c.bf16 %v3946_v62, %v3945_v61  ;;  %v3947_v1 = vld [vmem:[%s7452_s4 + $0x30] sm:$0xff] }
0x12e1   :  { %v3659_v4 = vadd.f32 %v5318_v51, %v4862_v57  ;;  %v3653_v5 = vpop.f32.mrb[37].mxu1 }
0x12e2   :  { %v3654_v44 = vadd.f32 %v4862_v57, %v3653_v5  ;;  %5323 = vmatprep.mubr.msk.f32.mxu1 %vm1186_vm6, %v3662_v2  ;;  %v5507_v57 = vpack.c.bf16 %v3944_v48, %v3943_v47  ;;  %v3948_v2 = vld [vmem:[%s7452_s4 + $0x38] sm:$0xff] }
0x12e3   :  { %5324 = vmatmul.mubr.msk.f32.vlgmr.msra.gmra.mrb[38].mxu1 %vm1186_vm6, %v3663_v3  ;;  %v3665_v52 = vmax.f32 %v3659_v4, 0.0  ;;  %v5515_v51 = vpack.c.bf16 %v3948_v2, %v3947_v1  ;;  %v4832_v4 = vld [vmem:[#allocation20] ss:$0 sm:$0xff] }
0x12e4   :  { %v3664_v6 = vmax.f32 %v3654_v44, 0.0  ;;  %5330 = vmatpush3.msk.msra.mxu1 %vm1749_vm8, %v7195_v53  ;;  %v2960_v11 = vadd.f32 %v4832_v4, %v7174_v21  ;;  %v633_v21 = vld [vmem:[#allocation2] sm:$0x3] }
0x12e5   :  { %5488 = vmatprep.subr.bf16.mxu1 %v5487_v16 }
0x12e6   :  { %5326 = vmatprep.mubr.msk.f32.mxu1 %vm1186_vm6, %v3664_v6 }
0x12e7   :  { %5327 = vmatmul.mubr.msk.f32.gmra.mrb[40].mxu1 %vm1186_vm6, %v3665_v52 }
0x12e8   :  { %5331 = vmatprep.mubr.msk.f32.mxu1 %vm1736_vm9, %v7005_v56  ;;  %v5491_v56 = vpack.c.bf16 %v4030_v17, %v4029_v15  ;;  %v4355_v17 = vmul.f32 %v2960_v11, %v7195_v53 }
0x12eb   :  { %5332 = vmatmul.mubr.msk.f32.vlgmr.msra.gmra.mrb[42].mxu1 %vm1736_vm9, %v7013_v58 }
0x12ec   :  { %5334 = vmatprep.mubr.msk.f32.mxu1 %vm1736_vm9, %v7016_v59  ;;  %5490 = vmatpush3.bf16.msra.mxu1 %v5487_v16 }
0x12ed   :  { %5492 = vmatprep.subr.bf16.mxu1 %v5491_v56 }
0x12ef   :  { %5335 = vmatmul.mubr.msk.f32.gmra.mrb[44].mxu1 %vm1736_vm9, %v7023_v60 }
0x12f0   :  { %5494 = vmatpush3.bf16.msra.mxu1 %v5491_v56  ;;  %v4277_v56 = vmul.f32 %v4274_v14, %v2960_v11 }
0x12f1   :  { %5496 = vmatprep.subr.bf16.mxu1 %v5495_v25 }
0x12f4   :  { %5498 = vmatpush3.bf16.msra.mxu1 %v5495_v25 }
0x12f5   :  { %5500 = vmatprep.subr.bf16.mxu1 %v5499_v28 }
0x12f8   :  { %5502 = vmatpush3.bf16.msra.mxu1 %v5499_v28 }
0x12f9   :  { %5504 = vmatprep.subr.bf16.mxu1 %v5503_v32 }
0x13b6   :  { %v5325_v58 = vpop.f32.mrb[38].mxu1 }
0x13b7   :  { %v3750_v59 = vpop.f32.mrb[39].mxu1  ;;  %v3756_v37 = vadd.f32 %v5325_v58, %v4867_v36 }
0x13b8   :  { %v3751_v38 = vadd.f32 %v4867_v36, %v3750_v59 }
0x13ba   :  { %v5328_v60 = vpop.f32.mrb[40].mxu1 }
0x13bb   :  { %v3760_v18 = vpop.f32.mrb[41].mxu1  ;;  %v3766_v43 = vadd.f32 %v5328_v60, %v4867_v36 }
0x13bc   :  { %v3761_v45 = vadd.f32 %v4867_v36, %v3760_v18 }
0x13be   :  { %v5333_v19 = vpop.f32.mrb[42].mxu1 }
0x13bf   :  { %v3838_v20 = vpop.f32.mrb[43].mxu1 }
0x13c0   :  { %5339 = vmatprep.mubr.msk.f32.mxu0 %vm792_vm3, %v3838_v20 }
0x13c1   :  { %5340 = vmatmul.mubr.msk.f32.vlgmr.msra.gmra.mrb[38].mxu0 %vm792_vm3, %v5333_v19 }
0x13c2   :  { %5344 = vmatprep.mubr.msk.f32.mxu0 %vm792_vm3, %v3838_v20  ;;  %5343 = vmatpush3.msra.mxu0 %v3949_v12  ;;  %v5336_v33 = vpop.f32.mrb[44].mxu1 }
0x13c3   :  { %5519 = vmatprep.subr.bf16.mxu0 %v6420_v7  ;;  %v3848_v35 = vpop.f32.mrb[45].mxu1 }
0x13c5   :  { %5345 = vmatmul.mubr.msk.f32.vlgmr.msra.gmra.mrb[40].mxu0 %vm792_vm3, %v5333_v19 }
0x13c6   :  { %5389 = vmatprep.mubr.msk.f32.mxu0 %vm6419_vm0, %v6418_v0 }
0x1494   :  { %v5341_v39 = vpop.f32.mrb[38].mxu0 }
0x1495   :  { %v3940_v40 = vmul.f32 %v5341_v39, %v3756_v37  ;;  %v3930_v41 = vpop.f32.mrb[39].mxu0 }
0x1496   :  { %v3939_v42 = vmul.f32 %v3930_v41, %v3751_v38 }
0x1498   :  { %v5346_v46 = vpop.f32.mrb[40].mxu0 }
0x1499   :  { %v4026_v49 = vmul.f32 %v5346_v46, %v3766_v43  ;;  %v4016_v54 = vpop.f32.mrb[41].mxu0 }
0x149a   :  { %v4025_v55 = vmul.f32 %v4016_v54, %v3761_v45 }
0x149c   :  { %5363 = vmatprep.mubr.msk.f32.mxu1 %vm4035_vm12, %v4025_v55 }
0x149d   :  { %5364 = vmatmul.mubr.msk.f32.vlgmr.msra.gmra.mrb[46].mxu1 %vm4035_vm12, %v4026_v49 }
0x149e   :  { %5506 = vmatpush3.bf16.msra.mxu1 %v5503_v32  ;;  %5382 = vmatprep.mubr.msk.f32.mxu1 %vm4035_vm12, %v3939_v42 }
0x149f   :  { %5508 = vmatprep.subr.bf16.mxu1 %v5507_v57 }
0x14a2   :  { %5510 = vmatpush3.bf16.msra.mxu1 %v5507_v57 }
0x14a3   :  { %5512 = vmatprep.subr.bf16.mxu1 %v5511_v63 }
0x14a6   :  { %5514 = vmatpush3.bf16.msra.mxu1 %v5511_v63 }
0x14a7   :  { %5516 = vmatprep.subr.bf16.mxu1 %v5515_v51 }
0x14aa   :  { %5518 = vmatpush3.bf16.msra.mxu1 %v5515_v51 }
0x14ad   :  { %5383 = vmatmul.mubr.msk.f32.vlgmr.msra.gmra.mrb[46].mxu1 %vm4035_vm12, %v3940_v40 }
0x1580   :  { %v5384_v3 = vpop.f32.mrb[46].mxu1 }
0x1581   :  { %v4199_v5 = vmul.f32 0.5, %v5384_v3  ;;  %v4189_v44 = vpop.f32.mrb[47].mxu1 }
0x1582   :  { %v4198_v6 = vmul.f32 0.5, %v4189_v44 }
0x1583   :  { %v4443_v52 = vmul.f32 %v5336_v33, %v4199_v5 }
0x1584   :  { %v5520_v12 = vpack.c.bf16 %v4199_v5, %v4198_v6  ;;  %v4442_v13 = vmul.f32 %v4198_v6, %v3848_v35 }
0x1585   :  { %v4455_v15 = vmul.f32 %v7169_v10, %v4443_v52 }
0x1586   :  { %v4454_v16 = vmul.f32 %v7167_v9, %v4442_v13  ;;  %5521 = vmatpush3.bf16.msra.mxu0 %v5520_v12  ;;  %v4361_v9 = vmul.f32 %v7165_v8, %v4355_v17 }
0x1587   :  { %5392 = vmatprep.subr.mxu0 %v6418_v0 }
0x1588   :  { %v5523_v58 = vpack.c.bf16 %v4455_v15, %v4454_v16 }
0x1589   :  { %5390 = vmatmul.mubr.msk.f32.vlgmr.msra.gmra.mrb[42].mxu0 %vm1186_vm6, %v7051_v30  ;;  %v4439_v30 = vld [vmem:[#allocation5] sm:$0x3] }
0x158a   :  { %5393 = vmatpush3.msk.msra.mxu0 %vm1749_vm8, %v4277_v56  ;;  %5394 = vmatprep.mubr.msk.f32.mxu0 %vm6419_vm0, %v6418_v0 }
0x158b   :  { %5397 = vmatprep.subr.mxu0 %v6418_v0 }
0x158d   :  { %5395 = vmatmul.mubr.msk.f32.vlgmr.msra.gmra.mrb[44].mxu0 %vm1736_vm9, %v633_v21 }
0x158e   :  { %5398 = vmatpush3.msk.msra.mxu0 %vm1749_vm8, %v4361_v9  ;;  %5399 = vmatprep.mubr.msk.f32.mxu0 %vm6419_vm0, %v6418_v0 }
0x158f   :  { %5522 = vmatprep.subr.bf16.mxu0 %v6420_v7 }
0x1591   :  { %5400 = vmatmul.mubr.msk.f32.vlgmr.msra.gmra.mrb[46].mxu0 %vm1736_vm9, %v633_v21 }
0x1592   :  { %5524 = vmatpush3.bf16.msra.mxu0 %v5523_v58  ;;  %5406 = vmatprep.mubr.msk.f32.mxu0 %vm6419_vm0, %v6418_v0 }
0x1593   :  { %5409 = vmatprep.subr.mxu0 %v6418_v0 }
0x1595   :  { %5407 = vmatmul.mubr.msk.f32.vlgmr.msra.gmra.mrb[48].mxu0 %vm1186_vm6, %v4439_v30 }
0x1596   :  { %5411 = vmatprep.mubr.msk.f32.mxu0 %vm6419_vm0, %v6418_v0 }
0x165c   :  { %v4266_v8 = vpop.f32.mrb[42].mxu0 }
0x165d   :  { %v4276_v10 = vmul.f32 %v4274_v14, %v4266_v8  ;;  %v5391_v53 = vpop.f32.mrb[43].mxu0 }
0x165f   :  { %5410 = vmatpush3.msk.msra.mxu0 %vm1749_vm8, %v4276_v10 }
0x1660   :  { %5412 = vmatmul.mubr.msk.f32.vlgmr.msra.gmra.mrb[44].mxu0 %vm1736_vm9, %v633_v21 }
0x1664   :  { %v4431_v7 = vpop.f32.mrb[46].mxu0 }
0x1665   :  { %v4436_v59 = vsel %vm4435_vm13, %v4431_v7, 0.0  ;;  %v5401_v60 = vpop.f32.mrb[47].mxu0 }
0x1666   :  { %4437 = vadd.xlane.f32.xlu1 %v4436_v59 }
0x1668   :  { %v4525_v18 = vpop.f32.mrb[48].mxu0 }
0x1669   :  { %v4529_v19 = vsel %vm4435_vm13, %v4525_v18, 0.0  ;;  %v5408_v20 = vpop.f32.mrb[49].mxu0 }
0x166a   :  { %4530 = vadd.xlane.f32.xlu0 %v4529_v19 }
0x1677   :  { %1563 = vrot.lane.b32.xlu1 %v6983_v34, %s6424_s19 }
0x167b   :  { %1568 = vrot.lane.b32.xlu1 %v6978_v23, %s6426_s5 }
0x1680   :  { %1552 = vrot.lane.b32.xlu0 %v6996_v50, %s6424_s19 }
0x1681   :  { %6169 = shalt.err (!%p6166_p12)
}
0x1682   :  { %s7453_s23 = sld [smem:[#allocation118_spill]] }
0x1688   :  { %s6170_s26 = scalar_lea.hbm %s7453_s23, 128 }
0x1689   :  { %p6171_p13 = scmp.ne.s32.totalorder %s7453_s23, %s6170_s26  ;;  %p6174_p0 = scmp.lt.u32.totalorder %s6170_s26, %s7453_s23 }
0x168b   :  { %p6176_p1 = pnand %p6174_p0, %p6171_p13 }
0x168d   :  { %6179 = shalt.err (!%p6176_p1)
}
0x168e   :  { %4627 = dma.vmem_to_hbm [thread:$0]  %s4625_s22, 128, %s7453_s23, [#allocation39]  }
0x168f   :  { %s6180_s19 = scalar_lea.vmem %s4645_s20, 128  ;;  %p6185_p3 = scmp.lt.s32.totalorder %s4645_s20, %s4645_s20 }
0x1690   :  { %p6181_p2 = scmp.ne.s32.totalorder %s4645_s20, %s6180_s19  ;;  %p6186_p4 = scmp.lt.s32.totalorder %s6180_s19, %s6180_s19 }
0x1692   :  { %p6187_p5 = por %p6186_p4, %p6185_p3 }
0x1694   :  { %p6188_p6 = pnand %p6187_p5, %p6181_p2 }
0x1696   :  { %6191 = shalt.err (!%p6188_p6)
}
0x1697   :  { %s6192_s28 = scalar_lea.hbm %s6801_s27, 128 }
0x1698   :  { %p6193_p7 = scmp.ne.s32.totalorder %s6801_s27, %s6192_s28  ;;  %p6196_p8 = scmp.lt.u32.totalorder %s6192_s28, %s6801_s27 }
0x169a   :  { %p6198_p9 = pnand %p6196_p8, %p6193_p7 }
0x169c   :  { %6201 = shalt.err (!%p6198_p9)
}
0x169d   :  { %4647 = dma.vmem_to_hbm [thread:$0]  %s4645_s20, 128, %s6801_s27, [#allocation42]  }
0x169e   :  { %s6429_s1 = smov [#allocation43]   ;;  %s6430_s2 = smov [#allocation40]  }
0x169f   :  { %s4654_s24 = sshll.u32 %s6429_s1, 4  ;;  %s4634_s29 = sshll.u32 %s6430_s2, 4  ;;  %s4655_s24 = int_to_ptr.vmem [resolvable:$true] %s4654_s24  ;;  %s4635_s29 = int_to_ptr.vmem [resolvable:$true] %s4634_s29 }
0x16a0   :  { %s6431_s21 = smov [#allocation44]   ;;  %s6202_s7 = scalar_lea.vmem %s4655_s24, 128 }
0x16a1   :  { %s4664_s6 = sshll.u32 %s6431_s21, 4  ;;  %p6203_p10 = scmp.ne.s32.totalorder %s4655_s24, %s6202_s7  ;;  %s4665_s6 = int_to_ptr.vmem [resolvable:$true] %s4664_s6 }
0x16a2   :  { %p6207_p11 = scmp.lt.s32.totalorder %s4655_s24, %s4655_s24  ;;  %p6208_p12 = scmp.lt.s32.totalorder %s6202_s7, %s6202_s7 }
0x16a4   :  { %p6209_p13 = por %p6208_p12, %p6207_p11 }
0x16a6   :  { %p6210_p0 = pnand %p6209_p13, %p6203_p10 }
0x16f3   :  { %v4438_v0 = vpop.xlane.xlu1 %4437 }
0x16f7   :  { %v1564_v23 = vpop.permute.xlu1 %1563  ;;  %v4531_v34 = vpop.xlane.xlu0 %4530 }
0x16f8   :  { %1566 = vst.msk [vmem:[#allocation43] sm:$0x3f] %vm1555_vm11, %v1564_v23 }
0x16f9   :  { %6213 = shalt.err (!%p6210_p0)
}
0x16fa   :  { %s6214_s27 = scalar_lea.hbm %s6806_s9, 128 }
0x16fb   :  { %p6215_p1 = scmp.ne.s32.totalorder %s6806_s9, %s6214_s27  ;;  %p6218_p2 = scmp.lt.u32.totalorder %s6214_s27, %s6806_s9 }
0x16fd   :  { %p6220_p3 = pnand %p6218_p2, %p6215_p1 }
0x16ff   :  { %6223 = shalt.err (!%p6220_p3)
}
0x1700   :  { %4657 = dma.vmem_to_hbm [thread:$0]  %s4655_s24, 128, %s6806_s9, [#allocation42]   ;;  %v1569_v50 = vpop.permute.xlu1 %1568  ;;  %v1553_v22 = vpop.permute.xlu0 %1552 }
0x1701   :  { %1571 = vst.msk [vmem:[#allocation44] sm:$0x3f] %vm1555_vm11, %v1569_v50  ;;  %1556 = vst.msk [vmem:[#allocation40] sm:$0x3f] %vm1555_vm11, %v1553_v22  ;;  %s6224_s12 = scalar_lea.vmem %s4635_s29, 128  ;;  %p6229_p5 = scmp.lt.s32.totalorder %s4635_s29, %s4635_s29 }
0x1702   :  { %p6225_p4 = scmp.ne.s32.totalorder %s4635_s29, %s6224_s12  ;;  %p6230_p6 = scmp.lt.s32.totalorder %s6224_s12, %s6224_s12 }
0x1704   :  { %p6231_p7 = por %p6230_p6, %p6229_p5 }
0x1706   :  { %p6232_p8 = pnand %p6231_p7, %p6225_p4 }
0x1708   :  { %6235 = shalt.err (!%p6232_p8)
}
0x1709   :  { %s6236_s5 = scalar_lea.hbm %s6796_s13, 128 }
0x170a   :  { %p6237_p9 = scmp.ne.s32.totalorder %s6796_s13, %s6236_s5  ;;  %p6240_p10 = scmp.lt.u32.totalorder %s6236_s5, %s6796_s13 }
0x170c   :  { %p6242_p11 = pnand %p6240_p10, %p6237_p9 }
0x170e   :  { %6245 = shalt.err (!%p6242_p11)
}
0x170f   :  { %4637 = dma.vmem_to_hbm [thread:$0]  %s4635_s29, 128, %s6796_s13, [#allocation39]  }
0x1710   :  { %s6246_s9 = scalar_lea.vmem %s4665_s6, 128  ;;  %p6251_p13 = scmp.lt.s32.totalorder %s4665_s6, %s4665_s6 }
0x1711   :  { %p6247_p12 = scmp.ne.s32.totalorder %s4665_s6, %s6246_s9  ;;  %p6252_p0 = scmp.lt.s32.totalorder %s6246_s9, %s6246_s9 }
0x1713   :  { %p6253_p1 = por %p6252_p0, %p6251_p13 }
0x1715   :  { %p6254_p2 = pnand %p6253_p1, %p6247_p12 }
0x1717   :  { %6257 = shalt.err (!%p6254_p2)
}
0x1718   :  { %s6258_s10 = scalar_lea.hbm %s6811_s25, 128 }
0x1719   :  { %p6259_p3 = scmp.ne.s32.totalorder %s6811_s25, %s6258_s10  ;;  %p6262_p4 = scmp.lt.u32.totalorder %s6258_s10, %s6811_s25 }
0x171b   :  { %p6264_p5 = pnand %p6262_p4, %p6259_p3 }
0x171d   :  { %6267 = shalt.err (!%p6264_p5)
}
0x171e   :  { %4667 = dma.vmem_to_hbm [thread:$0]  %s4665_s6, 128, %s6811_s25, [#allocation45]   ;;  %v5525_v24 = vadd.f32 %v4531_v34, %v4438_v0 }
0x171f   :  { %s6432_s8 = smov [#allocation37]  }
0x1720   :  { %s4614_s11 = sshll.u32 %s6432_s8, 4  ;;  %s4615_s11 = int_to_ptr.vmem [resolvable:$true] %s4614_s11 }
0x1721   :  { %s6268_s13 = scalar_lea.vmem %s4615_s11, 32  ;;  %p6273_p7 = scmp.lt.s32.totalorder %s4615_s11, %s4615_s11 }
0x1722   :  { %p6269_p6 = scmp.ne.s32.totalorder %s4615_s11, %s6268_s13  ;;  %p6274_p8 = scmp.lt.s32.totalorder %s6268_s13, %s6268_s13 }
0x1724   :  { %p6275_p9 = por %p6274_p8, %p6273_p7 }
0x1726   :  { %p6276_p10 = pnand %p6275_p9, %p6269_p6 }
0x1733   :  { %v4601_v25 = vpop.f32.mrb[44].mxu0 }
0x1734   :  { %v5526_v26 = vadd.f32 %v5525_v24, %v4601_v25  ;;  %v5413_v27 = vpop.f32.mrb[45].mxu0 }
0x1736   :  { %4607 = vst.msk [vmem:[#allocation37] sm:$0x3] %vm4435_vm13, %v5526_v26 }
0x1737   :  { %6279 = shalt.err (!%p6276_p10)
}
0x1738   :  { %s7454_s0 = sld [smem:[#allocation117_spill]] }
0x173e   :  { %s6280_s25 = scalar_lea.hbm %s7454_s0, 32 }
0x173f   :  { %p6281_p11 = scmp.ne.s32.totalorder %s7454_s0, %s6280_s25  ;;  %p6284_p12 = scmp.lt.u32.totalorder %s6280_s25, %s7454_s0 }
0x1741   :  { %p6286_p13 = pnand %p6284_p12, %p6281_p11 }
0x1743   :  { %6289 = shalt.err (!%p6286_p13)
}
0x1744   :  { %4617 = dma.vmem_to_hbm [thread:$0]  %s4615_s11, 32, %s7454_s0, [#allocation4]  }
0x1745   :  { %6314 = dma.done.wait [#allocation4], 32  }
0x1746   :  { %6315 = vsyncadd [#allocation4], 4294967264 }
0x1747   :  { %6316 = dma.done.wait [#allocation39], 256  }
0x1748   :  { %6317 = vsyncadd [#allocation39], 4294967040 }
0x1749   :  { %6318 = dma.done.wait [#allocation42], 256  }
0x174a   :  { %6319 = vsyncadd [#allocation42], 4294967040 }
0x174b   :  { %6320 = dma.done.wait [#allocation45], 128  }
0x174c   :  { %6321 = vsyncadd [#allocation45], 4294967168 }
0x174d   :  { %4686 = vsyncpa [#allocation3], 1 }
0x174e   :  { %4687 = vsyncpa [#allocation6], 1 }
0x174f   :  { %4688 = vsyncpa [#allocation9], 1 }
0x1750   :  { %4689 = vsyncpa [#allocation12], 1 }
0x1751   :  { %4690 = vsyncpa [#allocation15], 1 }
0x1752   :  { %4691 = vsyncpa [#allocation18], 1 }
0x1753   :  { %4692 = vsyncpa [#allocation21], 1 }
0x1754   :  { %4693 = vsyncpa [#allocation24], 1 }
0x1755   :  { %4694 = vsyncpa [#allocation27], 1 }
0x1756   :  { %4695 = vsyncpa [#allocation30], 1 }
0x1757   :  { %4696 = vsyncpa [#allocation33], 1 }
0x1758   :  { %4697 = vsyncpa [#allocation36], 1 }
0x1759   :  { %4698 = vsyncpa [#allocation4], 1 }
0x175a   :  { %4699 = vsyncpa [#allocation39], 1 }
0x175b   :  { %4700 = vsyncpa [#allocation42], 1 }
0x175c   :  { %4701 = vsyncpa [#allocation45], 1 }

</bundles_post_ra>
